<compile_context>
chip_gen: v7x
topology: tpu7x:2x2x1
jax: 0.10.0
libtpu: 0.0.40
codegen_flags: <defaults>
</compile_context>

<pallas_src>
import jax
import jax.numpy as jnp
from jax import lax
from jax.experimental import pallas as pl
from jax.experimental.pallas import tpu as pltpu


def _round_up(x, m):
    return (x + m - 1) // m * m


# ----------------------------- Pallas kernel --------------------------------
def _make_lstm_classifier_kernel(T, B, Hp, unroll_limit=16):
    """Fused bidirectional-LSTM + linear head + softmax kernel factory."""
    G = 8 * Hp      # combined gate width:   [i_f|i_b|f_f|f_b|g_f|g_b|o_f|o_b]
    H2 = 2 * Hp     # combined hidden width: [h_f | h_b]

    def kernel(
        x_ref,       # (T*B, E)   embedded inputs, time-major rows
        wih_f_ref,   # (E, G)     fwd W_ih placed in fwd gate blocks (else 0)
        wih_b_ref,   # (E, G)     bwd W_ih placed in bwd gate blocks (else 0)
        whh_ref,     # (2*Hp, G)  block-diagonal recurrent weights
        b_ref,       # (1, G)     combined biases (b_ih + b_hh, both directions)
        wout_ref,    # (2*Hp, C)  output linear weight
        bout_ref,    # (1, C)     output linear bias
        o_ref,       # (B, C)     softmax class scores
        xpf_ref,     # (T*B, G)   scratch: precomputed x @ W_ih (forward)
        xpb_ref,     # (T*B, G)   scratch: precomputed x @ W_ih (reverse)
    ):
        x2d = x_ref[...]
        # Hoisted input projections: one MXU matmul per direction for all T*B
        # rows at once, off the serial dependency chain.
        xpf_ref[...] = jnp.dot(x2d, wih_f_ref[...], preferred_element_type=jnp.float32)
        xpb_ref[...] = jnp.dot(x2d, wih_b_ref[...], preferred_element_type=jnp.float32)

        # Pre-broadcast bias once (JAX does not CSE broadcast_in_dim in loops).
        bias = jnp.broadcast_to(b_ref[...], (B, G))

        def step(t, h, c):
            # Forward direction consumes x[t], reverse consumes x[T-1-t].
            if isinstance(t, int):          # fully-unrolled (static) path
                sf, sb = t * B, (T - 1 - t) * B
            else:                           # dynamic fallback path
                sf = pl.multiple_of(t * B, B)
                sb = pl.multiple_of((T - 1 - t) * B, B)
            xg = xpf_ref[pl.ds(sf, B), :] + xpb_ref[pl.ds(sb, B), :]
            gates = (
                xg
                + jnp.dot(h, whh_ref[...], preferred_element_type=jnp.float32)
                + bias
            )
            # 128-aligned whole-vreg gate slices (each (B, 2*Hp) = [fwd | bwd]).
            i = jax.nn.sigmoid(gates[:, 0 * Hp:2 * Hp])
            f = jax.nn.sigmoid(gates[:, 2 * Hp:4 * Hp])
            g = jnp.tanh(gates[:, 4 * Hp:6 * Hp])
            o = jax.nn.sigmoid(gates[:, 6 * Hp:8 * Hp])
            c_new = f * c + i * g
            h_new = o * jnp.tanh(c_new)
            return h_new, c_new

        h = jnp.zeros((B, H2), jnp.float32)
        c = jnp.zeros((B, H2), jnp.float32)
        if T <= unroll_limit:
            # Full unroll of the static-T recurrence -> straight-line code.
            for t in range(T):
                h, c = step(t, h, c)
        else:
            h, c = lax.fori_loop(0, T, lambda t, hc: step(t, *hc), (h, c))

        # Linear head on [h_fwd | h_bwd] (padded rows of wout are zero), softmax.
        logits = (
            jnp.dot(h, wout_ref[...], preferred_element_type=jnp.float32)
            + bout_ref[...]
        )
        m = jnp.max(logits, axis=1, keepdims=True)
        e = jnp.exp(logits - m)
        o_ref[...] = e / jnp.sum(e, axis=1, keepdims=True)

    return kernel


# ---------------------- parameter fusion / padding glue ----------------------
def _prepare_fused_params(params, Hp):
    """Pad H -> Hp (128-lane aligned), interleave fwd/bwd gate blocks and build
    the block-diagonal recurrent matrix.  One-time glue outside the hot path."""
    H = params["whh_f"].shape[0]
    C = params["bout"].shape[-1]
    G = 8 * Hp

    def place_cols(w, direction):
        # w: (rows, 4H) in PyTorch gate order [i, f, g, o] -> (rows, G),
        # placing gate k of this direction into lane block 2*k + direction.
        rows = w.shape[0]
        out = jnp.zeros((rows, G), jnp.float32)
        for k in range(4):
            blk = 2 * k + direction
            out = out.at[:, blk * Hp: blk * Hp + H].set(w[:, k * H:(k + 1) * H])
        return out

    wih_f = place_cols(params["wih_f"], 0)                              # (E, G)
    wih_b = place_cols(params["wih_b"], 1)                              # (E, G)
    bias = place_cols(params["b_f"], 0) + place_cols(params["b_b"], 1)  # (1, G)

    whh_f = jnp.zeros((Hp, G), jnp.float32).at[:H, :].set(place_cols(params["whh_f"], 0))
    whh_b = jnp.zeros((Hp, G), jnp.float32).at[:H, :].set(place_cols(params["whh_b"], 1))
    whh = jnp.concatenate([whh_f, whh_b], axis=0)                       # (2Hp, G)

    wout = jnp.zeros((2 * Hp, C), jnp.float32)
    wout = wout.at[:H, :].set(params["wout_f"])
    wout = wout.at[Hp:Hp + H, :].set(params["wout_b"])                  # (2Hp, C)

    return wih_f, wih_b, whh, bias, wout


# ------------------------------ JAX wrapper ----------------------------------
def lstm_classifier_forward(input_seq, input_lengths, params):
    """input_seq: (T, B) int32.  input_lengths is accepted but unused
    (matching the PyTorch forward, which ignores it)."""
    del input_lengths
    emb = params["embedding"]                        # (V, E)
    # TODO(synk): fuse this gather into the kernel (scalar-prefetch ids + per-row
    # DMA from the embedding table) to avoid the HBM round-trip of `embedded`.
    embedded = emb[input_seq].astype(jnp.float32)    # (T, B, E)
    T, B, E = embedded.shape
    H = params["whh_f"].shape[0]
    C = params["bout"].shape[-1]

    Hp = _round_up(H, 128)                           # lane-align each gate block
    G = 8 * Hp

    wih_f, wih_b, whh, bias, wout = _prepare_fused_params(params, Hp)
    x2d = embedded.reshape(T * B, E)                 # time-major rows

    kernel = _make_lstm_classifier_kernel(T, B, Hp)
    vmem = pl.BlockSpec(memory_space=pltpu.MemorySpace.VMEM)
    out = pl.pallas_call(
        kernel,
        out_shape=jax.ShapeDtypeStruct((B, C), jnp.float32),
        in_specs=[vmem] * 7,
        out_specs=vmem,
        scratch_shapes=[
            pltpu.VMEM((T * B, G), jnp.float32),     # x @ W_ih (forward dir)
            pltpu.VMEM((T * B, G), jnp.float32),     # x @ W_ih (reverse dir)
        ],
    )(x2d, wih_f, wih_b, whh, bias, wout, params["bout"])
    return out


# --------------------------- pure-JAX reference ------------------------------
def _reference_forward(input_seq, params):
    emb = params["embedding"]
    x = emb[input_seq].astype(jnp.float32)  # (T, B, E)
    T, B, _ = x.shape
    H = params["whh_f"].shape[0]

    def run_dir(xs, wih, whh, b):
        h = jnp.zeros((B, H), jnp.float32)
        c = jnp.zeros((B, H), jnp.float32)
        for t in range(xs.shape[0]):
            gates = xs[t] @ wih + h @ whh + b
            i = jax.nn.sigmoid(gates[:, :H])
            f = jax.nn.sigmoid(gates[:, H:2 * H])
            g = jnp.tanh(gates[:, 2 * H:3 * H])
            o = jax.nn.sigmoid(gates[:, 3 * H:])
            c = f * c + i * g
            h = o * jnp.tanh(c)
        return h

    h_f = run_dir(x, params["wih_f"], params["whh_f"], params["b_f"])
    h_b = run_dir(x[::-1], params["wih_b"], params["whh_b"], params["b_b"])
    logits = h_f @ params["wout_f"] + h_b @ params["wout_b"] + params["bout"]
    return jax.nn.softmax(logits, axis=1)


# --------------------------------- main --------------------------------------
if __name__ == "__main__":
    # Small config consistent with the module:
    # n_layers=1 (so dropout is a no-op), bidirectional=True.
    T, B = 8, 8
    VOCAB, E, H, C = 50, 32, 32, 4

    key = jax.random.PRNGKey(0)
    ks = jax.random.split(key, 12)

    def u(k, shape, scale=0.1):
        return (jax.random.uniform(k, shape, jnp.float32) * 2.0 - 1.0) * scale

    params = {
        "embedding": u(ks[0], (VOCAB, E), scale=1.0),
        # PyTorch stores W_ih as (4H, E); we pre-transpose to (E, 4H).
        "wih_f": u(ks[1], (E, 4 * H)),
        "whh_f": u(ks[2], (H, 4 * H)),
        "b_f":   u(ks[3], (1, 4 * H)),      # b_ih + b_hh combined
        "wih_b": u(ks[4], (E, 4 * H)),
        "whh_b": u(ks[5], (H, 4 * H)),
        "b_b":   u(ks[6], (1, 4 * H)),
        # nn.Linear(2H, C): weight (C, 2H) -> transposed and split into halves.
        "wout_f": u(ks[7], (H, C)),
        "wout_b": u(ks[8], (H, C)),
        "bout":   u(ks[9], (1, C)),
    }

    input_seq = jax.random.randint(ks[10], (T, B), 0, VOCAB, dtype=jnp.int32)
    input_lengths = jnp.full((B,), T, dtype=jnp.int32)

    scores = lstm_classifier_forward(input_seq, input_lengths, params)
    scores = jax.block_until_ready(scores)

    ref = _reference_forward(input_seq, params)
    assert scores.shape == (B, C)
    assert jnp.allclose(scores, ref, atol=2e-5, rtol=1e-5), "mismatch vs reference"
    assert jnp.allclose(jnp.sum(scores, axis=1), 1.0, atol=1e-5)

    print("KERNEL_OK")
</pallas_src>

<mosaic_0001>
module attributes {stable_mosaic.version = 11 : i64} {
  func.func @kernel(%arg0: memref<64x32xf32, #tpu.memory_space<vmem>>, %arg1: memref<32x1024xf32, #tpu.memory_space<vmem>>, %arg2: memref<32x1024xf32, #tpu.memory_space<vmem>>, %arg3: memref<256x1024xf32, #tpu.memory_space<vmem>>, %arg4: memref<1x1024xf32, #tpu.memory_space<vmem>>, %arg5: memref<256x4xf32, #tpu.memory_space<vmem>>, %arg6: memref<1x4xf32, #tpu.memory_space<vmem>>, %arg7: memref<8x4xf32, #tpu.memory_space<vmem>>, %arg8: memref<64x1024xf32, #tpu.memory_space<vmem>>, %arg9: memref<64x1024xf32, #tpu.memory_space<vmem>>) attributes {dimension_semantics = [], scalar_prefetch = 0 : i64, scratch_operands = 2 : i64, tpu.core_type = #tpu.core_type<tc>} {
    %c0 = arith.constant 0 : index
    %c0_0 = arith.constant 0 : index
    %0 = vector.load %arg0[%c0, %c0_0] : memref<64x32xf32, #tpu.memory_space<vmem>>, vector<64x32xf32>
    %c0_1 = arith.constant 0 : index
    %c0_2 = arith.constant 0 : index
    %1 = vector.load %arg1[%c0_1, %c0_2] : memref<32x1024xf32, #tpu.memory_space<vmem>>, vector<32x1024xf32>
    %cst = arith.constant dense<0.000000e+00> : vector<64x1024xf32>
    %2 = tpu.matmul %0, %1, %cst {dimension_numbers = #tpu.dot_dimension_numbers<[1], [0], [0], [1], [0, 0, 1, 1], [], []>} : vector<64x32xf32>, vector<32x1024xf32>, vector<64x1024xf32> -> vector<64x1024xf32>
    %c0_3 = arith.constant 0 : index
    %c0_4 = arith.constant 0 : index
    %3 = vector.load %arg8[%c0_3, %c0_4] : memref<64x1024xf32, #tpu.memory_space<vmem>>, vector<64x1024xf32>
    tpu.vector_store %arg8[%c0_3, %c0_4], %2 {strides = array<i32>} : memref<64x1024xf32, #tpu.memory_space<vmem>>, vector<64x1024xf32>,
    %c0_5 = arith.constant 0 : index
    %c0_6 = arith.constant 0 : index
    %4 = vector.load %arg2[%c0_5, %c0_6] : memref<32x1024xf32, #tpu.memory_space<vmem>>, vector<32x1024xf32>
    %cst_7 = arith.constant dense<0.000000e+00> : vector<64x1024xf32>
    %5 = tpu.matmul %0, %4, %cst_7 {dimension_numbers = #tpu.dot_dimension_numbers<[1], [0], [0], [1], [0, 0, 1, 1], [], []>} : vector<64x32xf32>, vector<32x1024xf32>, vector<64x1024xf32> -> vector<64x1024xf32>
    %c0_8 = arith.constant 0 : index
    %c0_9 = arith.constant 0 : index
    %6 = vector.load %arg9[%c0_8, %c0_9] : memref<64x1024xf32, #tpu.memory_space<vmem>>, vector<64x1024xf32>
    tpu.vector_store %arg9[%c0_8, %c0_9], %5 {strides = array<i32>} : memref<64x1024xf32, #tpu.memory_space<vmem>>, vector<64x1024xf32>,
    %c0_10 = arith.constant 0 : index
    %c0_11 = arith.constant 0 : index
    %7 = vector.load %arg4[%c0_10, %c0_11] : memref<1x1024xf32, #tpu.memory_space<vmem>>, vector<1x1024xf32>
    %8 = vector.shape_cast %7 : vector<1x1024xf32> to vector<1x1024xf32>
    %9 = vector.broadcast %8 : vector<1x1024xf32> to vector<8x1024xf32>
    %cst_12 = arith.constant 0.000000e+00 : f32
    %10 = vector.broadcast %cst_12 : f32 to vector<8x256xf32>
    %cst_13 = arith.constant 0.000000e+00 : f32
    %11 = vector.broadcast %cst_13 : f32 to vector<8x256xf32>
    %c0_14 = arith.constant 0 : index
    %c0_15 = arith.constant 0 : index
    %12 = vector.load %arg8[%c0_14, %c0_15] : memref<64x1024xf32, #tpu.memory_space<vmem>>, vector<8x1024xf32>
    %c56 = arith.constant 56 : index
    %c0_16 = arith.constant 0 : index
    %13 = vector.load %arg9[%c56, %c0_16] : memref<64x1024xf32, #tpu.memory_space<vmem>>, vector<8x1024xf32>
    %14 = arith.addf %12, %13 : vector<8x1024xf32>
    %c0_17 = arith.constant 0 : index
    %c0_18 = arith.constant 0 : index
    %15 = vector.load %arg3[%c0_17, %c0_18] : memref<256x1024xf32, #tpu.memory_space<vmem>>, vector<256x1024xf32>
    %cst_19 = arith.constant dense<0.000000e+00> : vector<8x1024xf32>
    %16 = tpu.matmul %10, %15, %cst_19 {dimension_numbers = #tpu.dot_dimension_numbers<[1], [0], [0], [1], [0, 0, 1, 1], [], []>} : vector<8x256xf32>, vector<256x1024xf32>, vector<8x1024xf32> -> vector<8x1024xf32>
    %17 = arith.addf %14, %16 : vector<8x1024xf32>
    %18 = arith.addf %17, %9 : vector<8x1024xf32>
    %19 = vector.extract_strided_slice %18 {offsets = [0, 0], sizes = [8, 256], strides = [1, 1]} : vector<8x1024xf32> to vector<8x256xf32>
    %20 = arith.negf %19 : vector<8x256xf32>
    %21 = math.exp %20 : vector<8x256xf32>
    %cst_20 = arith.constant 1.000000e+00 : f32
    %22 = vector.broadcast %cst_20 : f32 to vector<8x256xf32>
    %23 = arith.addf %22, %21 : vector<8x256xf32>
    %24 = arith.divf %22, %23 : vector<8x256xf32>
    %25 = vector.extract_strided_slice %18 {offsets = [0, 256], sizes = [8, 256], strides = [1, 1]} : vector<8x1024xf32> to vector<8x256xf32>
    %26 = arith.negf %25 : vector<8x256xf32>
    %27 = math.exp %26 : vector<8x256xf32>
    %cst_21 = arith.constant 1.000000e+00 : f32
    %28 = vector.broadcast %cst_21 : f32 to vector<8x256xf32>
    %29 = arith.addf %28, %27 : vector<8x256xf32>
    %30 = arith.divf %28, %29 : vector<8x256xf32>
    %31 = vector.extract_strided_slice %18 {offsets = [0, 512], sizes = [8, 256], strides = [1, 1]} : vector<8x1024xf32> to vector<8x256xf32>
    %32 = math.tanh %31 : vector<8x256xf32>
    %33 = vector.extract_strided_slice %18 {offsets = [0, 768], sizes = [8, 256], strides = [1, 1]} : vector<8x1024xf32> to vector<8x256xf32>
    %34 = arith.negf %33 : vector<8x256xf32>
    %35 = math.exp %34 : vector<8x256xf32>
    %cst_22 = arith.constant 1.000000e+00 : f32
    %36 = vector.broadcast %cst_22 : f32 to vector<8x256xf32>
    %37 = arith.addf %36, %35 : vector<8x256xf32>
    %38 = arith.divf %36, %37 : vector<8x256xf32>
    %39 = arith.mulf %30, %11 : vector<8x256xf32>
    %40 = arith.mulf %24, %32 : vector<8x256xf32>
    %41 = arith.addf %39, %40 : vector<8x256xf32>
    %42 = math.tanh %41 : vector<8x256xf32>
    %43 = arith.mulf %38, %42 : vector<8x256xf32>
    %c8 = arith.constant 8 : index
    %c0_23 = arith.constant 0 : index
    %44 = vector.load %arg8[%c8, %c0_23] : memref<64x1024xf32, #tpu.memory_space<vmem>>, vector<8x1024xf32>
    %c48 = arith.constant 48 : index
    %c0_24 = arith.constant 0 : index
    %45 = vector.load %arg9[%c48, %c0_24] : memref<64x1024xf32, #tpu.memory_space<vmem>>, vector<8x1024xf32>
    %46 = arith.addf %44, %45 : vector<8x1024xf32>
    %c0_25 = arith.constant 0 : index
    %c0_26 = arith.constant 0 : index
    %47 = vector.load %arg3[%c0_25, %c0_26] : memref<256x1024xf32, #tpu.memory_space<vmem>>, vector<256x1024xf32>
    %cst_27 = arith.constant dense<0.000000e+00> : vector<8x1024xf32>
    %48 = tpu.matmul %43, %47, %cst_27 {dimension_numbers = #tpu.dot_dimension_numbers<[1], [0], [0], [1], [0, 0, 1, 1], [], []>} : vector<8x256xf32>, vector<256x1024xf32>, vector<8x1024xf32> -> vector<8x1024xf32>
    %49 = arith.addf %46, %48 : vector<8x1024xf32>
    %50 = arith.addf %49, %9 : vector<8x1024xf32>
    %51 = vector.extract_strided_slice %50 {offsets = [0, 0], sizes = [8, 256], strides = [1, 1]} : vector<8x1024xf32> to vector<8x256xf32>
    %52 = arith.negf %51 : vector<8x256xf32>
    %53 = math.exp %52 : vector<8x256xf32>
    %cst_28 = arith.constant 1.000000e+00 : f32
    %54 = vector.broadcast %cst_28 : f32 to vector<8x256xf32>
    %55 = arith.addf %54, %53 : vector<8x256xf32>
    %56 = arith.divf %54, %55 : vector<8x256xf32>
    %57 = vector.extract_strided_slice %50 {offsets = [0, 256], sizes = [8, 256], strides = [1, 1]} : vector<8x1024xf32> to vector<8x256xf32>
    %58 = arith.negf %57 : vector<8x256xf32>
    %59 = math.exp %58 : vector<8x256xf32>
    %cst_29 = arith.constant 1.000000e+00 : f32
    %60 = vector.broadcast %cst_29 : f32 to vector<8x256xf32>
    %61 = arith.addf %60, %59 : vector<8x256xf32>
    %62 = arith.divf %60, %61 : vector<8x256xf32>
    %63 = vector.extract_strided_slice %50 {offsets = [0, 512], sizes = [8, 256], strides = [1, 1]} : vector<8x1024xf32> to vector<8x256xf32>
    %64 = math.tanh %63 : vector<8x256xf32>
    %65 = vector.extract_strided_slice %50 {offsets = [0, 768], sizes = [8, 256], strides = [1, 1]} : vector<8x1024xf32> to vector<8x256xf32>
    %66 = arith.negf %65 : vector<8x256xf32>
    %67 = math.exp %66 : vector<8x256xf32>
    %cst_30 = arith.constant 1.000000e+00 : f32
    %68 = vector.broadcast %cst_30 : f32 to vector<8x256xf32>
    %69 = arith.addf %68, %67 : vector<8x256xf32>
    %70 = arith.divf %68, %69 : vector<8x256xf32>
    %71 = arith.mulf %62, %41 : vector<8x256xf32>
    %72 = arith.mulf %56, %64 : vector<8x256xf32>
    %73 = arith.addf %71, %72 : vector<8x256xf32>
    %74 = math.tanh %73 : vector<8x256xf32>
    %75 = arith.mulf %70, %74 : vector<8x256xf32>
    %c16 = arith.constant 16 : index
    %c0_31 = arith.constant 0 : index
    %76 = vector.load %arg8[%c16, %c0_31] : memref<64x1024xf32, #tpu.memory_space<vmem>>, vector<8x1024xf32>
    %c40 = arith.constant 40 : index
    %c0_32 = arith.constant 0 : index
    %77 = vector.load %arg9[%c40, %c0_32] : memref<64x1024xf32, #tpu.memory_space<vmem>>, vector<8x1024xf32>
    %78 = arith.addf %76, %77 : vector<8x1024xf32>
    %c0_33 = arith.constant 0 : index
    %c0_34 = arith.constant 0 : index
    %79 = vector.load %arg3[%c0_33, %c0_34] : memref<256x1024xf32, #tpu.memory_space<vmem>>, vector<256x1024xf32>
    %cst_35 = arith.constant dense<0.000000e+00> : vector<8x1024xf32>
    %80 = tpu.matmul %75, %79, %cst_35 {dimension_numbers = #tpu.dot_dimension_numbers<[1], [0], [0], [1], [0, 0, 1, 1], [], []>} : vector<8x256xf32>, vector<256x1024xf32>, vector<8x1024xf32> -> vector<8x1024xf32>
    %81 = arith.addf %78, %80 : vector<8x1024xf32>
    %82 = arith.addf %81, %9 : vector<8x1024xf32>
    %83 = vector.extract_strided_slice %82 {offsets = [0, 0], sizes = [8, 256], strides = [1, 1]} : vector<8x1024xf32> to vector<8x256xf32>
    %84 = arith.negf %83 : vector<8x256xf32>
    %85 = math.exp %84 : vector<8x256xf32>
    %cst_36 = arith.constant 1.000000e+00 : f32
    %86 = vector.broadcast %cst_36 : f32 to vector<8x256xf32>
    %87 = arith.addf %86, %85 : vector<8x256xf32>
    %88 = arith.divf %86, %87 : vector<8x256xf32>
    %89 = vector.extract_strided_slice %82 {offsets = [0, 256], sizes = [8, 256], strides = [1, 1]} : vector<8x1024xf32> to vector<8x256xf32>
    %90 = arith.negf %89 : vector<8x256xf32>
    %91 = math.exp %90 : vector<8x256xf32>
    %cst_37 = arith.constant 1.000000e+00 : f32
    %92 = vector.broadcast %cst_37 : f32 to vector<8x256xf32>
    %93 = arith.addf %92, %91 : vector<8x256xf32>
    %94 = arith.divf %92, %93 : vector<8x256xf32>
    %95 = vector.extract_strided_slice %82 {offsets = [0, 512], sizes = [8, 256], strides = [1, 1]} : vector<8x1024xf32> to vector<8x256xf32>
    %96 = math.tanh %95 : vector<8x256xf32>
    %97 = vector.extract_strided_slice %82 {offsets = [0, 768], sizes = [8, 256], strides = [1, 1]} : vector<8x1024xf32> to vector<8x256xf32>
    %98 = arith.negf %97 : vector<8x256xf32>
    %99 = math.exp %98 : vector<8x256xf32>
    %cst_38 = arith.constant 1.000000e+00 : f32
    %100 = vector.broadcast %cst_38 : f32 to vector<8x256xf32>
    %101 = arith.addf %100, %99 : vector<8x256xf32>
    %102 = arith.divf %100, %101 : vector<8x256xf32>
    %103 = arith.mulf %94, %73 : vector<8x256xf32>
    %104 = arith.mulf %88, %96 : vector<8x256xf32>
    %105 = arith.addf %103, %104 : vector<8x256xf32>
    %106 = math.tanh %105 : vector<8x256xf32>
    %107 = arith.mulf %102, %106 : vector<8x256xf32>
    %c24 = arith.constant 24 : index
    %c0_39 = arith.constant 0 : index
    %108 = vector.load %arg8[%c24, %c0_39] : memref<64x1024xf32, #tpu.memory_space<vmem>>, vector<8x1024xf32>
    %c32 = arith.constant 32 : index
    %c0_40 = arith.constant 0 : index
    %109 = vector.load %arg9[%c32, %c0_40] : memref<64x1024xf32, #tpu.memory_space<vmem>>, vector<8x1024xf32>
    %110 = arith.addf %108, %109 : vector<8x1024xf32>
    %c0_41 = arith.constant 0 : index
    %c0_42 = arith.constant 0 : index
    %111 = vector.load %arg3[%c0_41, %c0_42] : memref<256x1024xf32, #tpu.memory_space<vmem>>, vector<256x1024xf32>
    %cst_43 = arith.constant dense<0.000000e+00> : vector<8x1024xf32>
    %112 = tpu.matmul %107, %111, %cst_43 {dimension_numbers = #tpu.dot_dimension_numbers<[1], [0], [0], [1], [0, 0, 1, 1], [], []>} : vector<8x256xf32>, vector<256x1024xf32>, vector<8x1024xf32> -> vector<8x1024xf32>
    %113 = arith.addf %110, %112 : vector<8x1024xf32>
    %114 = arith.addf %113, %9 : vector<8x1024xf32>
    %115 = vector.extract_strided_slice %114 {offsets = [0, 0], sizes = [8, 256], strides = [1, 1]} : vector<8x1024xf32> to vector<8x256xf32>
    %116 = arith.negf %115 : vector<8x256xf32>
    %117 = math.exp %116 : vector<8x256xf32>
    %cst_44 = arith.constant 1.000000e+00 : f32
    %118 = vector.broadcast %cst_44 : f32 to vector<8x256xf32>
    %119 = arith.addf %118, %117 : vector<8x256xf32>
    %120 = arith.divf %118, %119 : vector<8x256xf32>
    %121 = vector.extract_strided_slice %114 {offsets = [0, 256], sizes = [8, 256], strides = [1, 1]} : vector<8x1024xf32> to vector<8x256xf32>
    %122 = arith.negf %121 : vector<8x256xf32>
    %123 = math.exp %122 : vector<8x256xf32>
    %cst_45 = arith.constant 1.000000e+00 : f32
    %124 = vector.broadcast %cst_45 : f32 to vector<8x256xf32>
    %125 = arith.addf %124, %123 : vector<8x256xf32>
    %126 = arith.divf %124, %125 : vector<8x256xf32>
    %127 = vector.extract_strided_slice %114 {offsets = [0, 512], sizes = [8, 256], strides = [1, 1]} : vector<8x1024xf32> to vector<8x256xf32>
    %128 = math.tanh %127 : vector<8x256xf32>
    %129 = vector.extract_strided_slice %114 {offsets = [0, 768], sizes = [8, 256], strides = [1, 1]} : vector<8x1024xf32> to vector<8x256xf32>
    %130 = arith.negf %129 : vector<8x256xf32>
    %131 = math.exp %130 : vector<8x256xf32>
    %cst_46 = arith.constant 1.000000e+00 : f32
    %132 = vector.broadcast %cst_46 : f32 to vector<8x256xf32>
    %133 = arith.addf %132, %131 : vector<8x256xf32>
    %134 = arith.divf %132, %133 : vector<8x256xf32>
    %135 = arith.mulf %126, %105 : vector<8x256xf32>
    %136 = arith.mulf %120, %128 : vector<8x256xf32>
    %137 = arith.addf %135, %136 : vector<8x256xf32>
    %138 = math.tanh %137 : vector<8x256xf32>
    %139 = arith.mulf %134, %138 : vector<8x256xf32>
    %c32_47 = arith.constant 32 : index
    %c0_48 = arith.constant 0 : index
    %140 = vector.load %arg8[%c32_47, %c0_48] : memref<64x1024xf32, #tpu.memory_space<vmem>>, vector<8x1024xf32>
    %c24_49 = arith.constant 24 : index
    %c0_50 = arith.constant 0 : index
    %141 = vector.load %arg9[%c24_49, %c0_50] : memref<64x1024xf32, #tpu.memory_space<vmem>>, vector<8x1024xf32>
    %142 = arith.addf %140, %141 : vector<8x1024xf32>
    %c0_51 = arith.constant 0 : index
    %c0_52 = arith.constant 0 : index
    %143 = vector.load %arg3[%c0_51, %c0_52] : memref<256x1024xf32, #tpu.memory_space<vmem>>, vector<256x1024xf32>
    %cst_53 = arith.constant dense<0.000000e+00> : vector<8x1024xf32>
    %144 = tpu.matmul %139, %143, %cst_53 {dimension_numbers = #tpu.dot_dimension_numbers<[1], [0], [0], [1], [0, 0, 1, 1], [], []>} : vector<8x256xf32>, vector<256x1024xf32>, vector<8x1024xf32> -> vector<8x1024xf32>
    %145 = arith.addf %142, %144 : vector<8x1024xf32>
    %146 = arith.addf %145, %9 : vector<8x1024xf32>
    %147 = vector.extract_strided_slice %146 {offsets = [0, 0], sizes = [8, 256], strides = [1, 1]} : vector<8x1024xf32> to vector<8x256xf32>
    %148 = arith.negf %147 : vector<8x256xf32>
    %149 = math.exp %148 : vector<8x256xf32>
    %cst_54 = arith.constant 1.000000e+00 : f32
    %150 = vector.broadcast %cst_54 : f32 to vector<8x256xf32>
    %151 = arith.addf %150, %149 : vector<8x256xf32>
    %152 = arith.divf %150, %151 : vector<8x256xf32>
    %153 = vector.extract_strided_slice %146 {offsets = [0, 256], sizes = [8, 256], strides = [1, 1]} : vector<8x1024xf32> to vector<8x256xf32>
    %154 = arith.negf %153 : vector<8x256xf32>
    %155 = math.exp %154 : vector<8x256xf32>
    %cst_55 = arith.constant 1.000000e+00 : f32
    %156 = vector.broadcast %cst_55 : f32 to vector<8x256xf32>
    %157 = arith.addf %156, %155 : vector<8x256xf32>
    %158 = arith.divf %156, %157 : vector<8x256xf32>
    %159 = vector.extract_strided_slice %146 {offsets = [0, 512], sizes = [8, 256], strides = [1, 1]} : vector<8x1024xf32> to vector<8x256xf32>
    %160 = math.tanh %159 : vector<8x256xf32>
    %161 = vector.extract_strided_slice %146 {offsets = [0, 768], sizes = [8, 256], strides = [1, 1]} : vector<8x1024xf32> to vector<8x256xf32>
    %162 = arith.negf %161 : vector<8x256xf32>
    %163 = math.exp %162 : vector<8x256xf32>
    %cst_56 = arith.constant 1.000000e+00 : f32
    %164 = vector.broadcast %cst_56 : f32 to vector<8x256xf32>
    %165 = arith.addf %164, %163 : vector<8x256xf32>
    %166 = arith.divf %164, %165 : vector<8x256xf32>
    %167 = arith.mulf %158, %137 : vector<8x256xf32>
    %168 = arith.mulf %152, %160 : vector<8x256xf32>
    %169 = arith.addf %167, %168 : vector<8x256xf32>
    %170 = math.tanh %169 : vector<8x256xf32>
    %171 = arith.mulf %166, %170 : vector<8x256xf32>
    %c40_57 = arith.constant 40 : index
    %c0_58 = arith.constant 0 : index
    %172 = vector.load %arg8[%c40_57, %c0_58] : memref<64x1024xf32, #tpu.memory_space<vmem>>, vector<8x1024xf32>
    %c16_59 = arith.constant 16 : index
    %c0_60 = arith.constant 0 : index
    %173 = vector.load %arg9[%c16_59, %c0_60] : memref<64x1024xf32, #tpu.memory_space<vmem>>, vector<8x1024xf32>
    %174 = arith.addf %172, %173 : vector<8x1024xf32>
    %c0_61 = arith.constant 0 : index
    %c0_62 = arith.constant 0 : index
    %175 = vector.load %arg3[%c0_61, %c0_62] : memref<256x1024xf32, #tpu.memory_space<vmem>>, vector<256x1024xf32>
    %cst_63 = arith.constant dense<0.000000e+00> : vector<8x1024xf32>
    %176 = tpu.matmul %171, %175, %cst_63 {dimension_numbers = #tpu.dot_dimension_numbers<[1], [0], [0], [1], [0, 0, 1, 1], [], []>} : vector<8x256xf32>, vector<256x1024xf32>, vector<8x1024xf32> -> vector<8x1024xf32>
    %177 = arith.addf %174, %176 : vector<8x1024xf32>
    %178 = arith.addf %177, %9 : vector<8x1024xf32>
    %179 = vector.extract_strided_slice %178 {offsets = [0, 0], sizes = [8, 256], strides = [1, 1]} : vector<8x1024xf32> to vector<8x256xf32>
    %180 = arith.negf %179 : vector<8x256xf32>
    %181 = math.exp %180 : vector<8x256xf32>
    %cst_64 = arith.constant 1.000000e+00 : f32
    %182 = vector.broadcast %cst_64 : f32 to vector<8x256xf32>
    %183 = arith.addf %182, %181 : vector<8x256xf32>
    %184 = arith.divf %182, %183 : vector<8x256xf32>
    %185 = vector.extract_strided_slice %178 {offsets = [0, 256], sizes = [8, 256], strides = [1, 1]} : vector<8x1024xf32> to vector<8x256xf32>
    %186 = arith.negf %185 : vector<8x256xf32>
    %187 = math.exp %186 : vector<8x256xf32>
    %cst_65 = arith.constant 1.000000e+00 : f32
    %188 = vector.broadcast %cst_65 : f32 to vector<8x256xf32>
    %189 = arith.addf %188, %187 : vector<8x256xf32>
    %190 = arith.divf %188, %189 : vector<8x256xf32>
    %191 = vector.extract_strided_slice %178 {offsets = [0, 512], sizes = [8, 256], strides = [1, 1]} : vector<8x1024xf32> to vector<8x256xf32>
    %192 = math.tanh %191 : vector<8x256xf32>
    %193 = vector.extract_strided_slice %178 {offsets = [0, 768], sizes = [8, 256], strides = [1, 1]} : vector<8x1024xf32> to vector<8x256xf32>
    %194 = arith.negf %193 : vector<8x256xf32>
    %195 = math.exp %194 : vector<8x256xf32>
    %cst_66 = arith.constant 1.000000e+00 : f32
    %196 = vector.broadcast %cst_66 : f32 to vector<8x256xf32>
    %197 = arith.addf %196, %195 : vector<8x256xf32>
    %198 = arith.divf %196, %197 : vector<8x256xf32>
    %199 = arith.mulf %190, %169 : vector<8x256xf32>
    %200 = arith.mulf %184, %192 : vector<8x256xf32>
    %201 = arith.addf %199, %200 : vector<8x256xf32>
    %202 = math.tanh %201 : vector<8x256xf32>
    %203 = arith.mulf %198, %202 : vector<8x256xf32>
    %c48_67 = arith.constant 48 : index
    %c0_68 = arith.constant 0 : index
    %204 = vector.load %arg8[%c48_67, %c0_68] : memref<64x1024xf32, #tpu.memory_space<vmem>>, vector<8x1024xf32>
    %c8_69 = arith.constant 8 : index
    %c0_70 = arith.constant 0 : index
    %205 = vector.load %arg9[%c8_69, %c0_70] : memref<64x1024xf32, #tpu.memory_space<vmem>>, vector<8x1024xf32>
    %206 = arith.addf %204, %205 : vector<8x1024xf32>
    %c0_71 = arith.constant 0 : index
    %c0_72 = arith.constant 0 : index
    %207 = vector.load %arg3[%c0_71, %c0_72] : memref<256x1024xf32, #tpu.memory_space<vmem>>, vector<256x1024xf32>
    %cst_73 = arith.constant dense<0.000000e+00> : vector<8x1024xf32>
    %208 = tpu.matmul %203, %207, %cst_73 {dimension_numbers = #tpu.dot_dimension_numbers<[1], [0], [0], [1], [0, 0, 1, 1], [], []>} : vector<8x256xf32>, vector<256x1024xf32>, vector<8x1024xf32> -> vector<8x1024xf32>
    %209 = arith.addf %206, %208 : vector<8x1024xf32>
    %210 = arith.addf %209, %9 : vector<8x1024xf32>
    %211 = vector.extract_strided_slice %210 {offsets = [0, 0], sizes = [8, 256], strides = [1, 1]} : vector<8x1024xf32> to vector<8x256xf32>
    %212 = arith.negf %211 : vector<8x256xf32>
    %213 = math.exp %212 : vector<8x256xf32>
    %cst_74 = arith.constant 1.000000e+00 : f32
    %214 = vector.broadcast %cst_74 : f32 to vector<8x256xf32>
    %215 = arith.addf %214, %213 : vector<8x256xf32>
    %216 = arith.divf %214, %215 : vector<8x256xf32>
    %217 = vector.extract_strided_slice %210 {offsets = [0, 256], sizes = [8, 256], strides = [1, 1]} : vector<8x1024xf32> to vector<8x256xf32>
    %218 = arith.negf %217 : vector<8x256xf32>
    %219 = math.exp %218 : vector<8x256xf32>
    %cst_75 = arith.constant 1.000000e+00 : f32
    %220 = vector.broadcast %cst_75 : f32 to vector<8x256xf32>
    %221 = arith.addf %220, %219 : vector<8x256xf32>
    %222 = arith.divf %220, %221 : vector<8x256xf32>
    %223 = vector.extract_strided_slice %210 {offsets = [0, 512], sizes = [8, 256], strides = [1, 1]} : vector<8x1024xf32> to vector<8x256xf32>
    %224 = math.tanh %223 : vector<8x256xf32>
    %225 = vector.extract_strided_slice %210 {offsets = [0, 768], sizes = [8, 256], strides = [1, 1]} : vector<8x1024xf32> to vector<8x256xf32>
    %226 = arith.negf %225 : vector<8x256xf32>
    %227 = math.exp %226 : vector<8x256xf32>
    %cst_76 = arith.constant 1.000000e+00 : f32
    %228 = vector.broadcast %cst_76 : f32 to vector<8x256xf32>
    %229 = arith.addf %228, %227 : vector<8x256xf32>
    %230 = arith.divf %228, %229 : vector<8x256xf32>
    %231 = arith.mulf %222, %201 : vector<8x256xf32>
    %232 = arith.mulf %216, %224 : vector<8x256xf32>
    %233 = arith.addf %231, %232 : vector<8x256xf32>
    %234 = math.tanh %233 : vector<8x256xf32>
    %235 = arith.mulf %230, %234 : vector<8x256xf32>
    %c56_77 = arith.constant 56 : index
    %c0_78 = arith.constant 0 : index
    %236 = vector.load %arg8[%c56_77, %c0_78] : memref<64x1024xf32, #tpu.memory_space<vmem>>, vector<8x1024xf32>
    %c0_79 = arith.constant 0 : index
    %c0_80 = arith.constant 0 : index
    %237 = vector.load %arg9[%c0_79, %c0_80] : memref<64x1024xf32, #tpu.memory_space<vmem>>, vector<8x1024xf32>
    %238 = arith.addf %236, %237 : vector<8x1024xf32>
    %c0_81 = arith.constant 0 : index
    %c0_82 = arith.constant 0 : index
    %239 = vector.load %arg3[%c0_81, %c0_82] : memref<256x1024xf32, #tpu.memory_space<vmem>>, vector<256x1024xf32>
    %cst_83 = arith.constant dense<0.000000e+00> : vector<8x1024xf32>
    %240 = tpu.matmul %235, %239, %cst_83 {dimension_numbers = #tpu.dot_dimension_numbers<[1], [0], [0], [1], [0, 0, 1, 1], [], []>} : vector<8x256xf32>, vector<256x1024xf32>, vector<8x1024xf32> -> vector<8x1024xf32>
    %241 = arith.addf %238, %240 : vector<8x1024xf32>
    %242 = arith.addf %241, %9 : vector<8x1024xf32>
    %243 = vector.extract_strided_slice %242 {offsets = [0, 0], sizes = [8, 256], strides = [1, 1]} : vector<8x1024xf32> to vector<8x256xf32>
    %244 = arith.negf %243 : vector<8x256xf32>
    %245 = math.exp %244 : vector<8x256xf32>
    %cst_84 = arith.constant 1.000000e+00 : f32
    %246 = vector.broadcast %cst_84 : f32 to vector<8x256xf32>
    %247 = arith.addf %246, %245 : vector<8x256xf32>
    %248 = arith.divf %246, %247 : vector<8x256xf32>
    %249 = vector.extract_strided_slice %242 {offsets = [0, 256], sizes = [8, 256], strides = [1, 1]} : vector<8x1024xf32> to vector<8x256xf32>
    %250 = arith.negf %249 : vector<8x256xf32>
    %251 = math.exp %250 : vector<8x256xf32>
    %cst_85 = arith.constant 1.000000e+00 : f32
    %252 = vector.broadcast %cst_85 : f32 to vector<8x256xf32>
    %253 = arith.addf %252, %251 : vector<8x256xf32>
    %254 = arith.divf %252, %253 : vector<8x256xf32>
    %255 = vector.extract_strided_slice %242 {offsets = [0, 512], sizes = [8, 256], strides = [1, 1]} : vector<8x1024xf32> to vector<8x256xf32>
    %256 = math.tanh %255 : vector<8x256xf32>
    %257 = vector.extract_strided_slice %242 {offsets = [0, 768], sizes = [8, 256], strides = [1, 1]} : vector<8x1024xf32> to vector<8x256xf32>
    %258 = arith.negf %257 : vector<8x256xf32>
    %259 = math.exp %258 : vector<8x256xf32>
    %cst_86 = arith.constant 1.000000e+00 : f32
    %260 = vector.broadcast %cst_86 : f32 to vector<8x256xf32>
    %261 = arith.addf %260, %259 : vector<8x256xf32>
    %262 = arith.divf %260, %261 : vector<8x256xf32>
    %263 = arith.mulf %254, %233 : vector<8x256xf32>
    %264 = arith.mulf %248, %256 : vector<8x256xf32>
    %265 = arith.addf %263, %264 : vector<8x256xf32>
    %266 = math.tanh %265 : vector<8x256xf32>
    %267 = arith.mulf %262, %266 : vector<8x256xf32>
    %c0_87 = arith.constant 0 : index
    %c0_88 = arith.constant 0 : index
    %268 = vector.load %arg5[%c0_87, %c0_88] : memref<256x4xf32, #tpu.memory_space<vmem>>, vector<256x4xf32>
    %cst_89 = arith.constant dense<0.000000e+00> : vector<8x4xf32>
    %269 = tpu.matmul %267, %268, %cst_89 {dimension_numbers = #tpu.dot_dimension_numbers<[1], [0], [0], [1], [0, 0, 1, 1], [], []>} : vector<8x256xf32>, vector<256x4xf32>, vector<8x4xf32> -> vector<8x4xf32>
    %c0_90 = arith.constant 0 : index
    %c0_91 = arith.constant 0 : index
    %270 = vector.load %arg6[%c0_90, %c0_91] : memref<1x4xf32, #tpu.memory_space<vmem>>, vector<1x4xf32>
    %271 = vector.broadcast %270 : vector<1x4xf32> to vector<8x4xf32>
    %272 = arith.addf %269, %271 : vector<8x4xf32>
    %cst_92 = arith.constant dense<0xFF800000> : vector<8xf32>
    %273 = vector.multi_reduction <maximumf>, %272, %cst_92 [1] : vector<8x4xf32> to vector<8xf32>
    %274 = vector.shape_cast %273 : vector<8xf32> to vector<8x1xf32>
    %275 = vector.broadcast %274 : vector<8x1xf32> to vector<8x4xf32>
    %276 = arith.subf %272, %275 : vector<8x4xf32>
    %277 = math.exp %276 : vector<8x4xf32>
    %cst_93 = arith.constant dense<0.000000e+00> : vector<8xf32>
    %278 = vector.multi_reduction <add>, %277, %cst_93 [1] : vector<8x4xf32> to vector<8xf32>
    %279 = vector.shape_cast %278 : vector<8xf32> to vector<8x1xf32>
    %280 = vector.broadcast %279 : vector<8x1xf32> to vector<8x4xf32>
    %281 = arith.divf %277, %280 : vector<8x4xf32>
    %c0_94 = arith.constant 0 : index
    %c0_95 = arith.constant 0 : index
    %282 = vector.load %arg7[%c0_94, %c0_95] : memref<8x4xf32, #tpu.memory_space<vmem>>, vector<8x4xf32>
    tpu.vector_store %arg7[%c0_94, %c0_95], %281 {strides = array<i32>} : memref<8x4xf32, #tpu.memory_space<vmem>>, vector<8x4xf32>,
    return
  }
}

</mosaic_0001>

<bundles_post_ra>
// kernel: tpu_custom_call.1
= control target key start
LH: loop header
LB: loop body
LE: loop exit
PB: predicated region body
PF: predicated region fallthrough
CT: control target
= control target key end

     0   :  { %12 = vsyncpa [#allocation5], 0  ;;  %s9314_s0 = inlined_call_operand.vmem [shape: f32[64,32], index: 0, kind: input, shape index: {}]   ;;  %s9315_s1 = inlined_call_operand.vmem [shape: f32[32,1024], index: 1, kind: input, shape index: {}]   ;;  %s9316_s2 = inlined_call_operand.hbm [shape: f32[32,1024], index: 2, kind: input, shape index: {}]   ;;  %s9317_s3 = inlined_call_operand.hbm [shape: f32[256,1024], index: 3, kind: input, shape index: {}]   ;;  %s9318_s4 = inlined_call_operand.vmem [shape: f32[1,1024], index: 4, kind: input, shape index: {}]   ;;  %s9319_s5 = inlined_call_operand.vmem [shape: f32[256,4], index: 5, kind: input, shape index: {}]   ;;  %s9320_s6 = inlined_call_operand.vmem [shape: f32[1,4], index: 6, kind: input, shape index: {}]   ;;  %s9321_s7 = inlined_call_operand.vmem [shape: f32[8,4], index: 7, kind: output, shape index: {}]  }
   0x1   :  { %13 = vsyncpa [#allocation7], 0  ;;  %s7322_s24 = smov [#allocation4]   ;;  %s7274_s28 = scalar_lea.hbm %s9316_s2, 4096 }
   0x2   :  { %s23_s25 = sshll.u32 %s7322_s24, 4  ;;  %p7275_p0 = scmp.ne.s32.totalorder %s9316_s2, %s7274_s28  ;;  %s24_s25 = int_to_ptr.vmem [resolvable:$true] %s23_s25 }
   0x3   :  { %p7278_p1 = scmp.lt.u32.totalorder %s7274_s28, %s9316_s2 }
   0x5   :  { %p7280_p2 = pnand %p7278_p1, %p7275_p0 }
   0x7   :  { %7283 = shalt.err (!%p7280_p2)
}
   0x8   :  { %s7284_s10 = scalar_lea.vmem %s24_s25, 4096  ;;  %p7289_p4 = scmp.lt.s32.totalorder %s24_s25, %s24_s25 }
   0x9   :  { %p7285_p3 = scmp.ne.s32.totalorder %s24_s25, %s7284_s10  ;;  %p7290_p5 = scmp.lt.s32.totalorder %s7284_s10, %s7284_s10 }
   0xb   :  { %p7291_p6 = por %p7290_p5, %p7289_p4 }
   0xd   :  { %p7292_p7 = pnand %p7291_p6, %p7285_p3 }
   0xf   :  { %7295 = shalt.err (!%p7292_p7)
}
  0x10   :  { %s7323_s11 = smov 1024   ;;  %s7324_s12 = smov 64  }
  0x11   :  { %29 = dma.hbm_to_vmem [thread:$0]  %s9316_s2, 4096, %s24_s25, [#allocation5], %s7323_s11, %s7323_s11, %s7324_s12  }
  0x12   :  { %s7325_s15 = smov [#allocation6]   ;;  %s7296_s19 = scalar_lea.hbm %s9317_s3, 32768 }
  0x13   :  { %s35_s16 = sshll.u32 %s7325_s15, 4  ;;  %p7297_p8 = scmp.ne.s32.totalorder %s9317_s3, %s7296_s19  ;;  %s36_s16 = int_to_ptr.vmem [resolvable:$true] %s35_s16 }
  0x14   :  { %p7300_p9 = scmp.lt.u32.totalorder %s7296_s19, %s9317_s3 }
  0x16   :  { %p7302_p10 = pnand %p7300_p9, %p7297_p8 }
  0x18   :  { %7305 = shalt.err (!%p7302_p10)
}
  0x19   :  { %s7306_s24 = scalar_lea.vmem %s36_s16, 32768  ;;  %p7311_p12 = scmp.lt.s32.totalorder %s36_s16, %s36_s16 }
  0x1a   :  { %p7307_p11 = scmp.ne.s32.totalorder %s36_s16, %s7306_s24  ;;  %p7312_p13 = scmp.lt.s32.totalorder %s7306_s24, %s7306_s24 }
  0x1c   :  { %p7313_p0 = por %p7312_p13, %p7311_p12 }
  0x1e   :  { %p7314_p1 = pnand %p7313_p0, %p7307_p11 }
  0x20   :  { %7317 = shalt.err (!%p7314_p1)
}
  0x21   :  { %41 = dma.hbm_to_vmem [thread:$0]  %s9317_s3, 32768, %s36_s16, [#allocation7], %s7323_s11, %s7323_s11, %s7324_s12  }
  0x22   :  { %7318 = dma.done.wait [#allocation5], 4096  }
  0x23   :  { %7319 = vsyncadd [#allocation5], 4294963200 }
  0x24   :  { %7320 = dma.done.wait [#allocation7], 32768  }
  0x25   :  { %7321 = vsyncadd [#allocation7], 4294934528  ;;  %v9322_v0 = vmov 0.0   ;;  %v63_v1 = vld [vmem:[%s9315_s1 + $0x8] sm:$0xff]  ;;  %v62_v3 = vld [vmem:[%s9315_s1] sm:$0xff]  ;;  %vm94_vm0 = vcmask 261120  }
  0x26   :  { %183 = vmatprep.mubr.f32.mxu0 %v9322_v0  ;;  %207 = vmatprep.mubr.f32.mxu1 %v9322_v0  ;;  %v71_v2 = vld [vmem:[%s9315_s1 + $0x48] sm:$0xff]  ;;  %v70_v5 = vld [vmem:[%s9315_s1 + $0x40] sm:$0xff]  ;;  %v65_v12 = vld [vmem:[%s9315_s1 + $0x18] sm:$0xff]  ;;  %vm4566_vm1 = vcmask 31744  }
  0x27   :  { %v4733_v4 = vpack.c.bf16 %v71_v2, %v63_v1  ;;  %v79_v6 = vld [vmem:[%s9315_s1 + $0x88] sm:$0xff]  ;;  %v4735_v8 = vpack.c.bf16 %v70_v5, %v62_v3  ;;  %v78_v10 = vld [vmem:[%s9315_s1 + $0x80] sm:$0xff]  ;;  %v73_v13 = vld [vmem:[%s9315_s1 + $0x58] sm:$0xff] }
  0x28   :  { %v87_v7 = vld [vmem:[%s9315_s1 + $0xc8] sm:$0xff]  ;;  %v86_v11 = vld [vmem:[%s9315_s1 + $0xc0] sm:$0xff]  ;;  %v4741_v15 = vpack.c.bf16 %v73_v13, %v65_v12  ;;  %v64_v16 = vld [vmem:[%s9315_s1 + $0x10] sm:$0xff] }
  0x29   :  { %v4737_v9 = vpack.c.bf16 %v87_v7, %v79_v6  ;;  %4734 = vmatprep.subr.bf16.mxu0 %v4733_v4  ;;  %6877 = vmatprep.subr.bf16.mxu1 %v4733_v4  ;;  %v4739_v14 = vpack.c.bf16 %v86_v11, %v78_v10  ;;  %v72_v17 = vld [vmem:[%s9315_s1 + $0x50] sm:$0xff]  ;;  %v81_v18 = vld [vmem:[%s9315_s1 + $0x98] sm:$0xff]  ;;  %v67_v20 = vld [vmem:[%s9315_s1 + $0x28] sm:$0xff] }
  0x2a   :  { %4736 = vmatpush1.bf16.msra.mxu0 %v4735_v8  ;;  %6879 = vmatpush1.bf16.msra.mxu1 %v4735_v8  ;;  %v89_v19 = vld [vmem:[%s9315_s1 + $0xd8] sm:$0xff]  ;;  %v7441_v21 = vld [vmem:[%s9314_s0] sm:$0xff]  ;;  %v75_v22 = vld [vmem:[%s9315_s1 + $0x68] sm:$0xff]  ;;  %v4743_v24 = vpack.c.bf16 %v72_v17, %v64_v16 }
  0x2b   :  { %4738 = vmatprep.subr.bf16.mxu0 %v4737_v9  ;;  %6878 = vmatprep.subr.bf16.mxu1 %v4737_v9  ;;  %v7449_v23 = vld [vmem:[%s9314_s0 + $0x20] sm:$0xff]  ;;  %v4749_v25 = vpack.c.bf16 %v75_v22, %v67_v20  ;;  %v4745_v28 = vpack.c.bf16 %v89_v19, %v81_v18  ;;  %v80_v29 = vld [vmem:[%s9315_s1 + $0x90] sm:$0xff]  ;;  %v83_v32 = vld [vmem:[%s9315_s1 + $0xa8] sm:$0xff] }
  0x2c   :  { %v66_v26 = vld [vmem:[%s9315_s1 + $0x20] sm:$0xff]  ;;  %v88_v30 = vld [vmem:[%s9315_s1 + $0xd0] sm:$0xff]  ;;  %v91_v33 = vld [vmem:[%s9315_s1 + $0xe8] sm:$0xff] }
  0x2d   :  { %v74_v27 = vld [vmem:[%s9315_s1 + $0x60] sm:$0xff]  ;;  %v69_v36 = vld [vmem:[%s9315_s1 + $0x38] sm:$0xff]  ;;  %v7489_v38 = vld [vmem:[%s9314_s0 + $0x8] sm:$0xff]  ;;  %v4747_v40 = vpack.c.bf16 %v88_v30, %v80_v29  ;;  %v4753_v41 = vpack.c.bf16 %v91_v33, %v83_v32 }
  0x2e   :  { %4740 = vmatpush1.bf16.msra.mxu0 %v4739_v14  ;;  %6880 = vmatpush1.bf16.msra.mxu1 %v4739_v14  ;;  %v4751_v31 = vpack.c.bf16 %v74_v27, %v66_v26  ;;  %v82_v34 = vld [vmem:[%s9315_s1 + $0xa0] sm:$0xff]  ;;  %v77_v37 = vld [vmem:[%s9315_s1 + $0x78] sm:$0xff]  ;;  %v7494_v39 = vld [vmem:[%s9314_s0 + $0x28] sm:$0xff] }
  0x2f   :  { %4742 = vmatprep.subr.bf16.mxu1 %v4741_v15  ;;  %4750 = vmatprep.subr.bf16.mxu0 %v4749_v25  ;;  %v90_v35 = vld [vmem:[%s9315_s1 + $0xe0] sm:$0xff]  ;;  %v4757_v43 = vpack.c.bf16 %v77_v37, %v69_v36  ;;  %v636_v44 = vld [vmem:[#allocation4 + $0x8] sm:$0xff]  ;;  %v7506_v46 = vld [vmem:[%s9314_s0 + $0x10] sm:$0xff] }
  0x30   :  { %v4755_v42 = vpack.c.bf16 %v90_v35, %v82_v34  ;;  %v644_v45 = vld [vmem:[#allocation4 + $0x48] sm:$0xff]  ;;  %v7511_v47 = vld [vmem:[%s9314_s0 + $0x30] sm:$0xff]  ;;  %v7522_v49 = vld [vmem:[%s9314_s0 + $0x18] sm:$0xff] }
  0x31   :  { %4585 = vmatmul.mubr.msk.f32.vlgmr.msra.gmra.mrb[0].mxu0 %vm94_vm0, %v7441_v21  ;;  %4589 = vmatmul.mubr.msk.f32.vlgmr.msra.gmra.mrb[0].mxu1 %vm94_vm0, %v7449_v23  ;;  %v4765_v48 = vpack.c.bf16 %v644_v45, %v636_v44  ;;  %v7527_v50 = vld [vmem:[%s9314_s0 + $0x38] sm:$0xff]  ;;  %v68_v51 = vld [vmem:[%s9315_s1 + $0x30] sm:$0xff]  ;;  %v635_v55 = vld [vmem:[#allocation4] sm:$0xff] }
  0x32   :  { %4744 = vmatpush1.bf16.msra.mxu1 %v4743_v24  ;;  %189 = vmatprep.mubr.f32.mxu0 %v9322_v0  ;;  %v76_v52 = vld [vmem:[%s9315_s1 + $0x70] sm:$0xff]  ;;  %v85_v53 = vld [vmem:[%s9315_s1 + $0xb8] sm:$0xff]  ;;  %v643_v56 = vld [vmem:[#allocation4 + $0x40] sm:$0xff] }
  0x33   :  { %213 = vmatprep.mubr.f32.mxu1 %v9322_v0  ;;  %4746 = vmatprep.subr.bf16.mxu1 %v4745_v28  ;;  %v93_v54 = vld [vmem:[%s9315_s1 + $0xf8] sm:$0xff]  ;;  %v4759_v57 = vpack.c.bf16 %v76_v52, %v68_v51  ;;  %v84_v59 = vld [vmem:[%s9315_s1 + $0xb0] sm:$0xff]  ;;  %v4767_v61 = vpack.c.bf16 %v643_v56, %v635_v55  ;;  %v652_v62 = vld [vmem:[#allocation4 + $0x88] sm:$0xff] }
  0x34   :  { %4752 = vmatpush1.bf16.msra.mxu0 %v4751_v31  ;;  %v4761_v58 = vpack.c.bf16 %v93_v54, %v85_v53  ;;  %v92_v60 = vld [vmem:[%s9315_s1 + $0xf0] sm:$0xff]  ;;  %v660_v63 = vld [vmem:[#allocation4 + $0xc8] sm:$0xff]  ;;  %v651_v1 = vld [vmem:[#allocation4 + $0x80] sm:$0xff] }
  0x35   :  { %4586 = vmatmul.mubr.msk.f32.gmra.mrb[2].mxu0 %vm94_vm0, %v7489_v38  ;;  %4590 = vmatmul.mubr.msk.f32.gmra.mrb[2].mxu1 %vm94_vm0, %v7494_v39  ;;  %v659_v2 = vld [vmem:[#allocation4 + $0xc0] sm:$0xff]  ;;  %v638_v3 = vld [vmem:[#allocation4 + $0x18] sm:$0xff]  ;;  %v4763_v5 = vpack.c.bf16 %v92_v60, %v84_v59  ;;  %v4769_v6 = vpack.c.bf16 %v660_v63, %v652_v62  ;;  %v640_v9 = vld [vmem:[#allocation4 + $0x28] sm:$0xff] }
  0x36   :  { %195 = vmatprep.mubr.f32.mxu0 %v9322_v0  ;;  %219 = vmatprep.mubr.f32.mxu1 %v9322_v0  ;;  %v646_v4 = vld [vmem:[#allocation4 + $0x58] sm:$0xff]  ;;  %v4771_v7 = vpack.c.bf16 %v659_v2, %v651_v1  ;;  %v648_v10 = vld [vmem:[#allocation4 + $0x68] sm:$0xff]  ;;  %v637_v12 = vld [vmem:[#allocation4 + $0x10] sm:$0xff] }
  0x37   :  { %4748 = vmatpush1.bf16.msra.mxu1 %v4747_v40  ;;  %4754 = vmatprep.subr.bf16.mxu0 %v4753_v41  ;;  %v4773_v8 = vpack.c.bf16 %v646_v4, %v638_v3  ;;  %v4781_v11 = vpack.c.bf16 %v648_v10, %v640_v9  ;;  %v645_v13 = vld [vmem:[#allocation4 + $0x50] sm:$0xff]  ;;  %v654_v14 = vld [vmem:[#allocation4 + $0x98] sm:$0xff]  ;;  %v639_v16 = vld [vmem:[#allocation4 + $0x20] sm:$0xff] }
  0x38   :  { %4756 = vmatpush1.bf16.msra.mxu0 %v4755_v42  ;;  %4758 = vmatprep.subr.bf16.mxu1 %v4757_v43  ;;  %v662_v15 = vld [vmem:[#allocation4 + $0xd8] sm:$0xff]  ;;  %v647_v17 = vld [vmem:[#allocation4 + $0x60] sm:$0xff]  ;;  %v4775_v18 = vpack.c.bf16 %v645_v13, %v637_v12  ;;  %v653_v20 = vld [vmem:[#allocation4 + $0x90] sm:$0xff] }
  0x39   :  { %4587 = vmatmul.mubr.msk.f32.gmra.mrb[4].mxu0 %vm94_vm0, %v7506_v46  ;;  %4591 = vmatmul.mubr.msk.f32.gmra.mrb[4].mxu1 %vm94_vm0, %v7511_v47  ;;  %v4777_v19 = vpack.c.bf16 %v662_v15, %v654_v14  ;;  %v661_v22 = vld [vmem:[#allocation4 + $0xd0] sm:$0xff]  ;;  %v4783_v24 = vpack.c.bf16 %v647_v17, %v639_v16  ;;  %v656_v25 = vld [vmem:[#allocation4 + $0xa8] sm:$0xff]  ;;  %v655_v27 = vld [vmem:[#allocation4 + $0xa0] sm:$0xff] }
  0x3a   :  { %201 = vmatprep.mubr.f32.mxu0 %v9322_v0  ;;  %225 = vmatprep.mubr.f32.mxu1 %v9322_v0  ;;  %v664_v26 = vld [vmem:[#allocation4 + $0xe8] sm:$0xff]  ;;  %v663_v28 = vld [vmem:[#allocation4 + $0xe0] sm:$0xff]  ;;  %v642_v29 = vld [vmem:[#allocation4 + $0x38] sm:$0xff]  ;;  %v4779_v31 = vpack.c.bf16 %v661_v22, %v653_v20 }
  0x3b   :  { %4766 = vmatprep.subr.bf16.mxu0 %v4765_v48  ;;  %v650_v30 = vld [vmem:[#allocation4 + $0x78] sm:$0xff]  ;;  %v4785_v32 = vpack.c.bf16 %v664_v26, %v656_v25  ;;  %v4787_v33 = vpack.c.bf16 %v663_v28, %v655_v27  ;;  %v1250_v34 = vld [vmem:[#allocation6 + $0x8] sm:$0xff]  ;;  %v1249_v40 = vld [vmem:[#allocation6] sm:$0xff] }
  0x3c   :  { %v1258_v35 = vld [vmem:[#allocation6 + $0x48] sm:$0xff]  ;;  %v4789_v36 = vpack.c.bf16 %v650_v30, %v642_v29  ;;  %v1257_v41 = vld [vmem:[#allocation6 + $0x40] sm:$0xff]  ;;  %v641_v42 = vld [vmem:[#allocation4 + $0x30] sm:$0xff] }
  0x3d   :  { %4588 = vmatmul.mubr.msk.f32.gmra.mrb[6].mxu0 %vm94_vm0, %v7522_v49  ;;  %4592 = vmatmul.mubr.msk.f32.gmra.mrb[6].mxu1 %vm94_vm0, %v7527_v50  ;;  %v7613_v37 = vpack.c.bf16 %v1258_v35, %v1250_v34  ;;  %v649_v43 = vld [vmem:[#allocation4 + $0x70] sm:$0xff]  ;;  %v1266_v44 = vld [vmem:[#allocation6 + $0x88] sm:$0xff]  ;;  %v658_v48 = vld [vmem:[#allocation4 + $0xb8] sm:$0xff]  ;;  %v7652_v52 = vpack.c.bf16 %v1257_v41, %v1249_v40 }
  0x3e   :  { %296 = vmatprep.mubr.f32.mxu1 %v9322_v0  ;;  %409 = vmatprep.mubr.f32.mxu0 %v9322_v0  ;;  %v1274_v45 = vld [vmem:[#allocation6 + $0xc8] sm:$0xff]  ;;  %v666_v51 = vld [vmem:[#allocation4 + $0xf8] sm:$0xff]  ;;  %v4791_v53 = vpack.c.bf16 %v649_v43, %v641_v42  ;;  %v1265_v55 = vld [vmem:[#allocation6 + $0x80] sm:$0xff] }
  0x3f   :  { %9616 = vst [vmem:[#allocation10_spill] sm:$0xff] %v7613_v37  ;;  %9617 = vst [vmem:[#allocation11_spill] sm:$0xff] %v7652_v52  ;;  %v7654_v54 = vpack.c.bf16 %v1274_v45, %v1266_v44  ;;  %v1273_v56 = vld [vmem:[#allocation6 + $0xc0] sm:$0xff]  ;;  %v4793_v59 = vpack.c.bf16 %v666_v51, %v658_v48  ;;  %v657_v60 = vld [vmem:[#allocation4 + $0xb0] sm:$0xff] }
  0x40   :  { %v1252_v62 = vld [vmem:[#allocation6 + $0x18] sm:$0xff]  ;;  %v7661_v1 = vpack.c.bf16 %v1273_v56, %v1265_v55  ;;  %v1281_v3 = vld [vmem:[#allocation6 + $0x100] sm:$0xff]  ;;  %v1314_v13 = vld [vmem:[#allocation6 + $0x208] sm:$0xff] }
  0x41   :  { %4593 = vmatmul.mubr.msk.f32.vlgmr.msra.gmra.mrb[8].mxu1 %vm94_vm0, %v7441_v21  ;;  %4601 = vmatmul.mubr.msk.f32.vlgmr.msra.gmra.mrb[8].mxu0 %vm94_vm0, %v7441_v21  ;;  %9618 = vst [vmem:[#allocation12_spill] sm:$0xff] %v7654_v54  ;;  %v1260_v63 = vld [vmem:[#allocation6 + $0x58] sm:$0xff]  ;;  %v1289_v4 = vld [vmem:[#allocation6 + $0x140] sm:$0xff]  ;;  %v1322_v14 = vld [vmem:[#allocation6 + $0x248] sm:$0xff] }
  0x42   :  { %4760 = vmatpush1.bf16.msra.mxu1 %v4759_v57  ;;  %302 = vmatprep.mubr.f32.mxu1 %v9322_v0  ;;  %v1282_v57 = vld [vmem:[#allocation6 + $0x108] sm:$0xff]  ;;  %9619 = vst [vmem:[#allocation13_spill] sm:$0xff] %v7661_v1  ;;  %v7676_v9 = vpack.c.bf16 %v1289_v4, %v1281_v3  ;;  %v1305_v12 = vld [vmem:[#allocation6 + $0x1c0] sm:$0xff]  ;;  %v7692_v16 = vpack.c.bf16 %v1322_v14, %v1314_v13  ;;  %v1259_v55 = vld [vmem:[#allocation6 + $0x50] sm:$0xff] }
  0x43   :  { %415 = vmatprep.mubr.f32.mxu0 %v9322_v0  ;;  %4762 = vmatprep.subr.bf16.mxu1 %v4761_v58  ;;  %v1290_v58 = vld [vmem:[#allocation6 + $0x148] sm:$0xff]  ;;  %v1313_v17 = vld [vmem:[#allocation6 + $0x200] sm:$0xff]  ;;  %v1292_v13 = vld [vmem:[#allocation6 + $0x158] sm:$0xff] }
  0x44   :  { %4768 = vmatpush1.bf16.msra.mxu0 %v4767_v61  ;;  %v665_v61 = vld [vmem:[#allocation4 + $0xf0] sm:$0xff]  ;;  %v7665_v2 = vpack.c.bf16 %v1290_v58, %v1282_v57  ;;  %9622 = vst [vmem:[#allocation16_spill] sm:$0xff] %v7676_v9  ;;  %9625 = vst [vmem:[#allocation19_spill] sm:$0xff] %v7692_v16  ;;  %v1338_v20 = vld [vmem:[#allocation6 + $0x2c8] sm:$0xff] }
  0x45   :  { %4594 = vmatmul.mubr.msk.f32.gmra.mrb[10].mxu1 %vm94_vm0, %v7489_v38  ;;  %4602 = vmatmul.mubr.msk.f32.gmra.mrb[10].mxu0 %vm94_vm0, %v7489_v38  ;;  %v1329_v25 = vld [vmem:[#allocation6 + $0x280] sm:$0xff]  ;;  %v1346_v27 = vld [vmem:[#allocation6 + $0x308] sm:$0xff]  ;;  %v1268_v58 = vld [vmem:[#allocation6 + $0x98] sm:$0xff] }
  0x46   :  { %308 = vmatprep.mubr.f32.mxu1 %v9322_v0  ;;  %421 = vmatprep.mubr.f32.mxu0 %v9322_v0  ;;  %9620 = vst [vmem:[#allocation14_spill] sm:$0xff] %v7665_v2  ;;  %v1337_v26 = vld [vmem:[#allocation6 + $0x2c0] sm:$0xff]  ;;  %v1354_v28 = vld [vmem:[#allocation6 + $0x348] sm:$0xff] }
  0x47   :  { %4764 = vmatpush1.bf16.msra.mxu1 %v4763_v5  ;;  %4770 = vmatprep.subr.bf16.mxu0 %v4769_v6  ;;  %v4795_v5 = vpack.c.bf16 %v665_v61, %v657_v60  ;;  %v1298_v6 = vld [vmem:[#allocation6 + $0x188] sm:$0xff]  ;;  %v7713_v29 = vpack.c.bf16 %v1337_v26, %v1329_v25  ;;  %v7716_v30 = vpack.c.bf16 %v1354_v28, %v1346_v27  ;;  %v1361_v40 = vld [vmem:[#allocation6 + $0x380] sm:$0xff]  ;;  %v1283_v26 = vld [vmem:[#allocation6 + $0x110] sm:$0xff] }
  0x48   :  { %4772 = vmatpush1.bf16.msra.mxu0 %v4771_v7  ;;  %4774 = vmatprep.subr.bf16.mxu1 %v4773_v8  ;;  %v1306_v7 = vld [vmem:[#allocation6 + $0x1c8] sm:$0xff]  ;;  %v7667_v8 = vpack.c.bf16 %v1260_v63, %v1252_v62  ;;  %v1369_v41 = vld [vmem:[#allocation6 + $0x3c0] sm:$0xff] }
  0x49   :  { %4595 = vmatmul.mubr.msk.f32.gmra.mrb[12].mxu1 %vm94_vm0, %v7506_v46  ;;  %4603 = vmatmul.mubr.msk.f32.gmra.mrb[12].mxu0 %vm94_vm0, %v7506_v46  ;;  %v7679_v10 = vpack.c.bf16 %v1306_v7, %v1298_v6  ;;  %9628 = vst [vmem:[#allocation22_spill] sm:$0xff] %v7713_v29  ;;  %9629 = vst [vmem:[#allocation23_spill] sm:$0xff] %v7716_v30  ;;  %v1370_v34 = vld [vmem:[#allocation6 + $0x3c8] sm:$0xff]  ;;  %v7737_v44 = vpack.c.bf16 %v1369_v41, %v1361_v40  ;;  %v1377_v45 = vld [vmem:[#allocation6 + $0x400] sm:$0xff] }
  0x4a   :  { %314 = vmatprep.mubr.f32.mxu1 %v9322_v0  ;;  %427 = vmatprep.mubr.f32.mxu0 %v9322_v0  ;;  %9621 = vst [vmem:[#allocation15_spill] sm:$0xff] %v7667_v8  ;;  %v1378_v42 = vld [vmem:[#allocation6 + $0x408] sm:$0xff]  ;;  %v1385_v48 = vld [vmem:[#allocation6 + $0x440] sm:$0xff]  ;;  %v1275_v6 = vld [vmem:[#allocation6 + $0xd0] sm:$0xff] }
  0x4b   :  { %4782 = vmatprep.subr.bf16.mxu0 %v4781_v11  ;;  %9623 = vst [vmem:[#allocation17_spill] sm:$0xff] %v7679_v10  ;;  %v1297_v11 = vld [vmem:[#allocation6 + $0x180] sm:$0xff]  ;;  %v1386_v43 = vld [vmem:[#allocation6 + $0x448] sm:$0xff]  ;;  %9632 = vst [vmem:[#allocation26_spill] sm:$0xff] %v7737_v44  ;;  %v7749_v60 = vpack.c.bf16 %v1385_v48, %v1377_v45 }
  0x4c   :  { %v7689_v15 = vpack.c.bf16 %v1305_v12, %v1297_v11  ;;  %v7740_v51 = vpack.c.bf16 %v1386_v43, %v1378_v42  ;;  %v1394_v56 = vld [vmem:[#allocation6 + $0x488] sm:$0xff]  ;;  %v1393_v62 = vld [vmem:[#allocation6 + $0x480] sm:$0xff]  ;;  %v1284_v12 = vld [vmem:[#allocation6 + $0x118] sm:$0xff] }
  0x4d   :  { %4596 = vmatmul.mubr.msk.f32.gmra.mrb[14].mxu1 %vm94_vm0, %v7522_v49  ;;  %4604 = vmatmul.mubr.msk.f32.gmra.mrb[14].mxu0 %vm94_vm0, %v7522_v49  ;;  %v1402_v57 = vld [vmem:[#allocation6 + $0x4c8] sm:$0xff]  ;;  %9634 = vst [vmem:[#allocation28_spill] sm:$0xff] %v7749_v60  ;;  %v1401_v63 = vld [vmem:[#allocation6 + $0x4c0] sm:$0xff]  ;;  %v7771_v25 = vpack.c.bf16 %v1292_v13, %v1284_v12  ;;  %v1299_v45 = vld [vmem:[#allocation6 + $0x190] sm:$0xff] }
  0x4e   :  { %320 = vmatprep.mubr.f32.mxu1 %v9322_v0  ;;  %433 = vmatprep.mubr.f32.mxu0 %v9322_v0  ;;  %9624 = vst [vmem:[#allocation18_spill] sm:$0xff] %v7689_v15  ;;  %9633 = vst [vmem:[#allocation27_spill] sm:$0xff] %v7740_v51  ;;  %v7754_v3 = vpack.c.bf16 %v1402_v57, %v1394_v56  ;;  %v1410_v7 = vld [vmem:[#allocation6 + $0x508] sm:$0xff]  ;;  %v7763_v14 = vpack.c.bf16 %v1401_v63, %v1393_v62  ;;  %v1425_v40 = vld [vmem:[#allocation6 + $0x580] sm:$0xff] }
  0x4f   :  { %v1418_v11 = vld [vmem:[#allocation6 + $0x548] sm:$0xff]  ;;  %9641 = vst [vmem:[#allocation35_spill] sm:$0xff] %v7771_v25  ;;  %v1433_v41 = vld [vmem:[#allocation6 + $0x5c0] sm:$0xff]  ;;  %v1324_v56 = vld [vmem:[#allocation6 + $0x258] sm:$0xff] }
  0x50   :  { %9636 = vst [vmem:[#allocation30_spill] sm:$0xff] %v7754_v3  ;;  %9638 = vst [vmem:[#allocation32_spill] sm:$0xff] %v7763_v14  ;;  %v1426_v27 = vld [vmem:[#allocation6 + $0x588] sm:$0xff]  ;;  %v7793_v57 = vpack.c.bf16 %v1433_v41, %v1425_v40  ;;  %v1449_v62 = vld [vmem:[#allocation6 + $0x640] sm:$0xff] }
  0x51   :  { %4597 = vmatmul.mubr.msk.f32.gmra.mrb[16].mxu1 %vm94_vm0, %v7449_v23  ;;  %4605 = vmatmul.mubr.msk.f32.gmra.mrb[16].mxu0 %vm94_vm0, %v7449_v23  ;;  %v1434_v28 = vld [vmem:[#allocation6 + $0x5c8] sm:$0xff]  ;;  %v1332_v12 = vld [vmem:[#allocation6 + $0x298] sm:$0xff] }
  0x52   :  { %326 = vmatprep.mubr.f32.mxu1 %v9322_v0  ;;  %439 = vmatprep.mubr.f32.mxu0 %v9322_v0  ;;  %v7784_v42 = vpack.c.bf16 %v1434_v28, %v1426_v27  ;;  %v1442_v48 = vld [vmem:[#allocation6 + $0x608] sm:$0xff]  ;;  %9646 = vst [vmem:[#allocation40_spill] sm:$0xff] %v7793_v57  ;;  %v1340_v13 = vld [vmem:[#allocation6 + $0x2d8] sm:$0xff] }
  0x53   :  { %v7816_v28 = vpack.c.bf16 %v1340_v13, %v1332_v12  ;;  %v1482_v40 = vld [vmem:[#allocation6 + $0x748] sm:$0xff]  ;;  %v1348_v41 = vld [vmem:[#allocation6 + $0x318] sm:$0xff] }
  0x54   :  { %9644 = vst [vmem:[#allocation38_spill] sm:$0xff] %v7784_v42 }
  0x55   :  { %4598 = vmatmul.mubr.msk.f32.gmra.mrb[18].mxu1 %vm94_vm0, %v7494_v39  ;;  %4606 = vmatmul.mubr.msk.f32.gmra.mrb[18].mxu0 %vm94_vm0, %v7494_v39  ;;  %9653 = vst [vmem:[#allocation47_spill] sm:$0xff] %v7816_v28 }
  0x56   :  { %332 = vmatprep.mubr.f32.mxu1 %v9322_v0  ;;  %445 = vmatprep.mubr.f32.mxu0 %v9322_v0 }
  0x59   :  { %4599 = vmatmul.mubr.msk.f32.gmra.mrb[20].mxu1 %vm94_vm0, %v7511_v47  ;;  %4607 = vmatmul.mubr.msk.f32.gmra.mrb[20].mxu0 %vm94_vm0, %v7511_v47 }
  0x5a   :  { %338 = vmatprep.mubr.f32.mxu1 %v9322_v0  ;;  %451 = vmatprep.mubr.f32.mxu0 %v9322_v0 }
  0x5d   :  { %4600 = vmatmul.mubr.msk.f32.gmra.mrb[22].mxu1 %vm94_vm0, %v7527_v50  ;;  %4608 = vmatmul.mubr.msk.f32.gmra.mrb[22].mxu0 %vm94_vm0, %v7527_v50 }
  0x5e   :  { %522 = vmatprep.mubr.f32.mxu1 %v9322_v0  ;;  %731 = vmatprep.mubr.f32.mxu0 %v9322_v0 }
  0x61   :  { %4609 = vmatmul.mubr.msk.f32.vlgmr.msra.gmra.mrb[24].mxu1 %vm94_vm0, %v7441_v21  ;;  %4617 = vmatmul.mubr.msk.f32.vlgmr.msra.gmra.mrb[24].mxu0 %vm94_vm0, %v7441_v21 }
  0x62   :  { %4776 = vmatpush1.bf16.msra.mxu1 %v4775_v18  ;;  %528 = vmatprep.mubr.f32.mxu1 %v9322_v0  ;;  %v1321_v18 = vld [vmem:[#allocation6 + $0x240] sm:$0xff] }
  0x63   :  { %737 = vmatprep.mubr.f32.mxu0 %v9322_v0  ;;  %4778 = vmatprep.subr.bf16.mxu1 %v4777_v19  ;;  %v1330_v19 = vld [vmem:[#allocation6 + $0x288] sm:$0xff]  ;;  %v7701_v22 = vpack.c.bf16 %v1321_v18, %v1313_v17  ;;  %v1409_v18 = vld [vmem:[#allocation6 + $0x500] sm:$0xff] }
  0x64   :  { %4784 = vmatpush1.bf16.msra.mxu0 %v4783_v24  ;;  %v7704_v24 = vpack.c.bf16 %v1338_v20, %v1330_v19  ;;  %v1417_v19 = vld [vmem:[#allocation6 + $0x540] sm:$0xff]  ;;  %v7769_v20 = vpack.c.bf16 %v1418_v11, %v1410_v7  ;;  %v1458_v7 = vld [vmem:[#allocation6 + $0x688] sm:$0xff] }
  0x65   :  { %4610 = vmatmul.mubr.msk.f32.gmra.mrb[26].mxu1 %vm94_vm0, %v7489_v38  ;;  %4618 = vmatmul.mubr.msk.f32.gmra.mrb[26].mxu0 %vm94_vm0, %v7489_v38  ;;  %9626 = vst [vmem:[#allocation20_spill] sm:$0xff] %v7701_v22  ;;  %v1466_v11 = vld [vmem:[#allocation6 + $0x6c8] sm:$0xff] }
  0x66   :  { %534 = vmatprep.mubr.f32.mxu1 %v9322_v0  ;;  %743 = vmatprep.mubr.f32.mxu0 %v9322_v0  ;;  %9627 = vst [vmem:[#allocation21_spill] sm:$0xff] %v7704_v24  ;;  %9640 = vst [vmem:[#allocation34_spill] sm:$0xff] %v7769_v20  ;;  %v7814_v27 = vpack.c.bf16 %v1466_v11, %v1458_v7  ;;  %v1364_v7 = vld [vmem:[#allocation6 + $0x398] sm:$0xff] }
  0x67   :  { %4780 = vmatpush1.bf16.msra.mxu1 %v4779_v31  ;;  %4786 = vmatprep.subr.bf16.mxu0 %v4785_v32  ;;  %v1345_v31 = vld [vmem:[#allocation6 + $0x300] sm:$0xff]  ;;  %v1372_v11 = vld [vmem:[#allocation6 + $0x3d8] sm:$0xff] }
  0x68   :  { %4788 = vmatpush1.bf16.msra.mxu0 %v4787_v33  ;;  %4790 = vmatprep.subr.bf16.mxu1 %v4789_v36  ;;  %v1353_v32 = vld [vmem:[#allocation6 + $0x340] sm:$0xff]  ;;  %v1362_v33 = vld [vmem:[#allocation6 + $0x388] sm:$0xff]  ;;  %9652 = vst [vmem:[#allocation46_spill] sm:$0xff] %v7814_v27 }
  0x69   :  { %4611 = vmatmul.mubr.msk.f32.gmra.mrb[28].mxu1 %vm94_vm0, %v7506_v46  ;;  %4619 = vmatmul.mubr.msk.f32.gmra.mrb[28].mxu0 %vm94_vm0, %v7506_v46  ;;  %v7725_v35 = vpack.c.bf16 %v1353_v32, %v1345_v31  ;;  %v7728_v36 = vpack.c.bf16 %v1370_v34, %v1362_v33  ;;  %v1300_v31 = vld [vmem:[#allocation6 + $0x198] sm:$0xff]  ;;  %v7778_v33 = vpack.c.bf16 %v1417_v19, %v1409_v18 }
  0x6a   :  { %540 = vmatprep.mubr.f32.mxu1 %v9322_v0  ;;  %749 = vmatprep.mubr.f32.mxu0 %v9322_v0  ;;  %v1308_v32 = vld [vmem:[#allocation6 + $0x1d8] sm:$0xff] }
  0x6b   :  { %4798 = vmatprep.subr.bf16.mxu0 %v7613_v37  ;;  %9630 = vst [vmem:[#allocation24_spill] sm:$0xff] %v7725_v35  ;;  %9631 = vst [vmem:[#allocation25_spill] sm:$0xff] %v7728_v36  ;;  %v7786_v43 = vpack.c.bf16 %v1308_v32, %v1300_v31  ;;  %v1331_v31 = vld [vmem:[#allocation6 + $0x290] sm:$0xff]  ;;  %v1474_v32 = vld [vmem:[#allocation6 + $0x708] sm:$0xff] }
  0x6c   :  { %9642 = vst [vmem:[#allocation36_spill] sm:$0xff] %v7778_v33 }
  0x6d   :  { %4612 = vmatmul.mubr.msk.f32.gmra.mrb[30].mxu1 %vm94_vm0, %v7522_v49  ;;  %4620 = vmatmul.mubr.msk.f32.gmra.mrb[30].mxu0 %vm94_vm0, %v7522_v49  ;;  %9645 = vst [vmem:[#allocation39_spill] sm:$0xff] %v7786_v43 }
  0x6e   :  { %546 = vmatprep.mubr.f32.mxu1 %v9322_v0  ;;  %755 = vmatprep.mubr.f32.mxu0 %v9322_v0 }
  0x71   :  { %4613 = vmatmul.mubr.msk.f32.gmra.mrb[32].mxu1 %vm94_vm0, %v7449_v23  ;;  %4621 = vmatmul.mubr.msk.f32.gmra.mrb[6].mxu0 %vm94_vm0, %v7449_v23 }
  0x72   :  { %552 = vmatprep.mubr.f32.mxu1 %v9322_v0  ;;  %761 = vmatprep.mubr.f32.mxu0 %v9322_v0 }
  0x75   :  { %4614 = vmatmul.mubr.msk.f32.gmra.mrb[34].mxu1 %vm94_vm0, %v7494_v39  ;;  %4622 = vmatmul.mubr.msk.f32.gmra.mrb[4].mxu0 %vm94_vm0, %v7494_v39 }
  0x76   :  { %558 = vmatprep.mubr.f32.mxu1 %v9322_v0  ;;  %767 = vmatprep.mubr.f32.mxu0 %v9322_v0 }
  0x79   :  { %4615 = vmatmul.mubr.msk.f32.gmra.mrb[36].mxu1 %vm94_vm0, %v7511_v47  ;;  %4623 = vmatmul.mubr.msk.f32.gmra.mrb[2].mxu0 %vm94_vm0, %v7511_v47 }
  0x7a   :  { %564 = vmatprep.mubr.f32.mxu1 %v9322_v0  ;;  %773 = vmatprep.mubr.f32.mxu0 %v9322_v0 }
  0x7d   :  { %4616 = vmatmul.mubr.msk.f32.gmra.mrb[38].mxu1 %vm94_vm0, %v7527_v50  ;;  %4624 = vmatmul.mubr.msk.f32.gmra.mrb[0].mxu0 %vm94_vm0, %v7527_v50 }
  0x7e   :  { %844 = vmatprep.mubr.f32.mxu1 %v9322_v0  ;;  %957 = vmatprep.mubr.f32.mxu0 %v9322_v0 }
  0x81   :  { %4625 = vmatmul.mubr.msk.f32.vlgmr.msra.gmra.mrb[22].mxu1 %vm94_vm0, %v7441_v21  ;;  %4633 = vmatmul.mubr.msk.f32.vlgmr.msra.gmra.mrb[22].mxu0 %vm94_vm0, %v7441_v21 }
  0x82   :  { %4800 = vmatpush1.bf16.msra.mxu0 %v7652_v52  ;;  %4792 = vmatpush1.bf16.msra.mxu1 %v4791_v53  ;;  %v1251_v53 = vld [vmem:[#allocation6 + $0x10] sm:$0xff] }
  0x83   :  { %850 = vmatprep.mubr.f32.mxu1 %v9322_v0  ;;  %4802 = vmatprep.subr.bf16.mxu0 %v7654_v54  ;;  %v7751_v61 = vpack.c.bf16 %v1259_v55, %v1251_v53  ;;  %v1450_v53 = vld [vmem:[#allocation6 + $0x648] sm:$0xff]  ;;  %v1316_v55 = vld [vmem:[#allocation6 + $0x218] sm:$0xff] }
  0x84   :  { %4794 = vmatprep.subr.bf16.mxu1 %v4793_v59  ;;  %963 = vmatprep.mubr.f32.mxu0 %v9322_v0  ;;  %v1276_v59 = vld [vmem:[#allocation6 + $0xd8] sm:$0xff]  ;;  %v7799_v63 = vpack.c.bf16 %v1450_v53, %v1442_v48  ;;  %v1473_v53 = vld [vmem:[#allocation6 + $0x700] sm:$0xff] }
  0x85   :  { %4626 = vmatmul.mubr.msk.f32.gmra.mrb[20].mxu1 %vm94_vm0, %v7489_v38  ;;  %4634 = vmatmul.mubr.msk.f32.gmra.mrb[20].mxu0 %vm94_vm0, %v7489_v38  ;;  %9635 = vst [vmem:[#allocation29_spill] sm:$0xff] %v7751_v61  ;;  %v7756_v4 = vpack.c.bf16 %v1276_v59, %v1268_v58  ;;  %v1441_v59 = vld [vmem:[#allocation6 + $0x600] sm:$0xff] }
  0x86   :  { %4804 = vmatpush1.bf16.msra.mxu0 %v7661_v1  ;;  %856 = vmatprep.mubr.f32.mxu1 %v9322_v0  ;;  %9648 = vst [vmem:[#allocation42_spill] sm:$0xff] %v7799_v63  ;;  %v7808_v18 = vpack.c.bf16 %v1449_v62, %v1441_v59  ;;  %v1347_v62 = vld [vmem:[#allocation6 + $0x310] sm:$0xff] }
  0x87   :  { %4806 = vmatprep.subr.bf16.mxu0 %v7665_v2  ;;  %4796 = vmatpush1.bf16.msra.mxu1 %v4795_v5  ;;  %9637 = vst [vmem:[#allocation31_spill] sm:$0xff] %v7756_v4  ;;  %v1267_v5 = vld [vmem:[#allocation6 + $0x90] sm:$0xff] }
  0x88   :  { %4862 = vmatprep.subr.bf16.mxu1 %v7667_v8  ;;  %969 = vmatprep.mubr.f32.mxu0 %v9322_v0  ;;  %v7765_v17 = vpack.c.bf16 %v1275_v6, %v1267_v5  ;;  %v7801_v5 = vpack.c.bf16 %v1324_v56, %v1316_v55  ;;  %v1315_v6 = vld [vmem:[#allocation6 + $0x210] sm:$0xff]  ;;  %9650 = vst [vmem:[#allocation44_spill] sm:$0xff] %v7808_v18  ;;  %v1481_v55 = vld [vmem:[#allocation6 + $0x740] sm:$0xff] }
  0x89   :  { %4627 = vmatmul.mubr.msk.f32.gmra.mrb[18].mxu1 %vm94_vm0, %v7506_v46  ;;  %4635 = vmatmul.mubr.msk.f32.gmra.mrb[18].mxu0 %vm94_vm0, %v7506_v46  ;;  %v7829_v56 = vpack.c.bf16 %v1482_v40, %v1474_v32  ;;  %v7838_v12 = vpack.c.bf16 %v1481_v55, %v1473_v53  ;;  %v1363_v32 = vld [vmem:[#allocation6 + $0x390] sm:$0xff]  ;;  %v1380_v40 = vld [vmem:[#allocation6 + $0x418] sm:$0xff]  ;;  %v9662_v53 = vmov 0.0  }
  0x8a   :  { %4808 = vmatpush1.bf16.msra.mxu0 %v7676_v9  ;;  %862 = vmatprep.mubr.f32.mxu1 %v9322_v0  ;;  %9639 = vst [vmem:[#allocation33_spill] sm:$0xff] %v7765_v17  ;;  %9649 = vst [vmem:[#allocation43_spill] sm:$0xff] %v7801_v5 }
  0x8b   :  { %4810 = vmatprep.subr.bf16.mxu0 %v7679_v10  ;;  %975 = vmatprep.mubr.f32.mxu0 %v9322_v0  ;;  %9656 = vst [vmem:[#allocation50_spill] sm:$0xff] %v7829_v56  ;;  %9658 = vst [vmem:[#allocation52_spill] sm:$0xff] %v7838_v12 }
  0x8d   :  { %4628 = vmatmul.mubr.msk.f32.gmra.mrb[16].mxu1 %vm94_vm0, %v7522_v49  ;;  %4636 = vmatmul.mubr.msk.f32.gmra.mrb[16].mxu0 %vm94_vm0, %v7522_v49 }
  0x8e   :  { %4812 = vmatpush1.bf16.msra.mxu0 %v7689_v15  ;;  %868 = vmatprep.mubr.f32.mxu1 %v9322_v0 }
  0x8f   :  { %4814 = vmatprep.subr.bf16.mxu0 %v7692_v16  ;;  %981 = vmatprep.mubr.f32.mxu0 %v9322_v0 }
  0x91   :  { %4629 = vmatmul.mubr.msk.f32.gmra.mrb[14].mxu1 %vm94_vm0, %v7449_v23  ;;  %4637 = vmatmul.mubr.msk.f32.gmra.mrb[14].mxu0 %vm94_vm0, %v7449_v23 }
  0x92   :  { %4816 = vmatpush1.bf16.msra.mxu0 %v7701_v22  ;;  %874 = vmatprep.mubr.f32.mxu1 %v9322_v0 }
  0x93   :  { %4818 = vmatprep.subr.bf16.mxu0 %v7704_v24  ;;  %987 = vmatprep.mubr.f32.mxu0 %v9322_v0 }
  0x95   :  { %4630 = vmatmul.mubr.msk.f32.gmra.mrb[12].mxu1 %vm94_vm0, %v7494_v39  ;;  %4638 = vmatmul.mubr.msk.f32.gmra.mrb[12].mxu0 %vm94_vm0, %v7494_v39 }
  0x96   :  { %4820 = vmatpush1.bf16.msra.mxu0 %v7713_v29  ;;  %880 = vmatprep.mubr.f32.mxu1 %v9322_v0 }
  0x97   :  { %4822 = vmatprep.subr.bf16.mxu0 %v7716_v30  ;;  %993 = vmatprep.mubr.f32.mxu0 %v9322_v0 }
  0x99   :  { %4631 = vmatmul.mubr.msk.f32.gmra.mrb[10].mxu1 %vm94_vm0, %v7511_v47  ;;  %4639 = vmatmul.mubr.msk.f32.gmra.mrb[10].mxu0 %vm94_vm0, %v7511_v47 }
  0x9a   :  { %4824 = vmatpush1.bf16.msra.mxu0 %v7725_v35  ;;  %886 = vmatprep.mubr.f32.mxu1 %v9322_v0 }
  0x9b   :  { %4826 = vmatprep.subr.bf16.mxu0 %v7728_v36  ;;  %999 = vmatprep.mubr.f32.mxu0 %v9322_v0 }
  0x9d   :  { %4632 = vmatmul.mubr.msk.f32.gmra.mrb[8].mxu1 %vm94_vm0, %v7527_v50  ;;  %4640 = vmatmul.mubr.msk.f32.gmra.mrb[8].mxu0 %vm94_vm0, %v7527_v50 }
  0x9e   :  { %4828 = vmatpush1.bf16.msra.mxu0 %v7737_v44  ;;  %1070 = vmatprep.mubr.f32.mxu1 %v9322_v0 }
  0x9f   :  { %4830 = vmatprep.subr.bf16.mxu0 %v7740_v51  ;;  %1569 = vmatprep.mubr.f32.mxu0 %v9322_v0 }
  0xa1   :  { %4641 = vmatmul.mubr.msk.f32.vlgmr.msra.gmra.mrb[38].mxu1 %vm94_vm0, %v7441_v21  ;;  %v1291_v21 = vld [vmem:[#allocation6 + $0x150] sm:$0xff] }
  0xa2   :  { %4832 = vmatpush1.bf16.msra.mxu0 %v7749_v60  ;;  %4864 = vmatpush1.bf16.msra.mxu1 %v7751_v61  ;;  %v7780_v34 = vpack.c.bf16 %v1291_v21, %v1283_v26  ;;  %v1457_v26 = vld [vmem:[#allocation6 + $0x680] sm:$0xff] }
  0xa3   :  { %4834 = vmatprep.subr.bf16.mxu0 %v7754_v3  ;;  %4866 = vmatprep.subr.bf16.mxu1 %v7756_v4  ;;  %v1465_v21 = vld [vmem:[#allocation6 + $0x6c0] sm:$0xff] }
  0xa4   :  { %1076 = vmatprep.mubr.f32.mxu1 %v9322_v0  ;;  %9643 = vst [vmem:[#allocation37_spill] sm:$0xff] %v7780_v34 }
  0xa5   :  { %4642 = vmatmul.mubr.msk.f32.gmra.mrb[36].mxu1 %vm94_vm0, %v7489_v38  ;;  %v1307_v38 = vld [vmem:[#allocation6 + $0x1d0] sm:$0xff] }
  0xa6   :  { %4836 = vmatpush1.bf16.msra.mxu0 %v7763_v14  ;;  %4868 = vmatpush1.bf16.msra.mxu1 %v7765_v17  ;;  %v7795_v58 = vpack.c.bf16 %v1307_v38, %v1299_v45  ;;  %v1356_v45 = vld [vmem:[#allocation6 + $0x358] sm:$0xff]  ;;  %v7823_v38 = vpack.c.bf16 %v1465_v21, %v1457_v26  ;;  %v1489_v26 = vld [vmem:[#allocation6 + $0x780] sm:$0xff] }
  0xa7   :  { %4838 = vmatprep.subr.bf16.mxu0 %v7769_v20  ;;  %4870 = vmatprep.subr.bf16.mxu1 %v7771_v25  ;;  %v7831_v59 = vpack.c.bf16 %v1356_v45, %v1348_v41  ;;  %v1497_v21 = vld [vmem:[#allocation6 + $0x7c0] sm:$0xff]  ;;  %v1388_v41 = vld [vmem:[#allocation6 + $0x458] sm:$0xff]  ;;  %v1254_v45 = vld [vmem:[#allocation6 + $0x28] sm:$0xff] }
  0xa8   :  { %1082 = vmatprep.mubr.f32.mxu1 %v9322_v0  ;;  %9647 = vst [vmem:[#allocation41_spill] sm:$0xff] %v7795_v58  ;;  %9654 = vst [vmem:[#allocation48_spill] sm:$0xff] %v7823_v38  ;;  %v7853_v55 = vpack.c.bf16 %v1497_v21, %v1489_v26 }
  0xa9   :  { %4643 = vmatmul.mubr.msk.f32.gmra.mrb[34].mxu1 %vm94_vm0, %v7506_v46  ;;  %v1323_v46 = vld [vmem:[#allocation6 + $0x250] sm:$0xff]  ;;  %9657 = vst [vmem:[#allocation51_spill] sm:$0xff] %v7831_v59 }
  0xaa   :  { %4840 = vmatpush1.bf16.msra.mxu0 %v7778_v33  ;;  %4872 = vmatpush1.bf16.msra.mxu1 %v7780_v34  ;;  %v7810_v19 = vpack.c.bf16 %v1323_v46, %v1315_v6  ;;  %v1490_v6 = vld [vmem:[#allocation6 + $0x788] sm:$0xff]  ;;  %9663 = vst [vmem:[#allocation56_spill] sm:$0xff] %v7853_v55 }
  0xab   :  { %4842 = vmatprep.subr.bf16.mxu0 %v7784_v42  ;;  %4874 = vmatprep.subr.bf16.mxu1 %v7786_v43  ;;  %v1498_v46 = vld [vmem:[#allocation6 + $0x7c8] sm:$0xff] }
  0xac   :  { %1088 = vmatprep.mubr.f32.mxu1 %v9322_v0  ;;  %9651 = vst [vmem:[#allocation45_spill] sm:$0xff] %v7810_v19 }
  0xad   :  { %4644 = vmatmul.mubr.msk.f32.gmra.mrb[32].mxu1 %vm94_vm0, %v7522_v49  ;;  %v1339_v49 = vld [vmem:[#allocation6 + $0x2d0] sm:$0xff] }
  0xae   :  { %4844 = vmatpush1.bf16.msra.mxu0 %v7793_v57  ;;  %4876 = vmatpush1.bf16.msra.mxu1 %v7795_v58  ;;  %v7825_v48 = vpack.c.bf16 %v1339_v49, %v1331_v31  ;;  %v7844_v31 = vpack.c.bf16 %v1498_v46, %v1490_v6  ;;  %v7846_v49 = vpack.c.bf16 %v1372_v11, %v1364_v7  ;;  %v1387_v6 = vld [vmem:[#allocation6 + $0x450] sm:$0xff]  ;;  %v1253_v11 = vld [vmem:[#allocation6 + $0x20] sm:$0xff] }
  0xaf   :  { %4846 = vmatprep.subr.bf16.mxu0 %v7799_v63  ;;  %4878 = vmatprep.subr.bf16.mxu1 %v7801_v5  ;;  %v7859_v46 = vpack.c.bf16 %v1388_v41, %v1380_v40  ;;  %v1269_v41 = vld [vmem:[#allocation6 + $0xa0] sm:$0xff] }
  0xb0   :  { %1094 = vmatprep.mubr.f32.mxu1 %v9322_v0  ;;  %9655 = vst [vmem:[#allocation49_spill] sm:$0xff] %v7825_v48  ;;  %9660 = vst [vmem:[#allocation54_spill] sm:$0xff] %v7844_v31 }
  0xb1   :  { %4645 = vmatmul.mubr.msk.f32.gmra.mrb[30].mxu1 %vm94_vm0, %v7449_v23  ;;  %v1355_v23 = vld [vmem:[#allocation6 + $0x350] sm:$0xff]  ;;  %9661 = vst [vmem:[#allocation55_spill] sm:$0xff] %v7846_v49  ;;  %9665 = vst [vmem:[#allocation58_spill] sm:$0xff] %v7859_v46 }
  0xb2   :  { %4848 = vmatpush1.bf16.msra.mxu0 %v7808_v18  ;;  %4880 = vmatpush1.bf16.msra.mxu1 %v7810_v19  ;;  %v7840_v13 = vpack.c.bf16 %v1355_v23, %v1347_v62  ;;  %v1379_v23 = vld [vmem:[#allocation6 + $0x410] sm:$0xff] }
  0xb3   :  { %4850 = vmatprep.subr.bf16.mxu0 %v7814_v27  ;;  %4882 = vmatprep.subr.bf16.mxu1 %v7816_v28  ;;  %v7868_v26 = vpack.c.bf16 %v1387_v6, %v1379_v23 }
  0xb4   :  { %1100 = vmatprep.mubr.f32.mxu1 %v9322_v0  ;;  %9659 = vst [vmem:[#allocation53_spill] sm:$0xff] %v7840_v13  ;;  %v1262_v0 = vld [vmem:[#allocation6 + $0x68] sm:$0xff] }
  0xb5   :  { %4646 = vmatmul.mubr.msk.f32.gmra.mrb[28].mxu1 %vm94_vm0, %v7494_v39  ;;  %v1371_v39 = vld [vmem:[#allocation6 + $0x3d0] sm:$0xff]  ;;  %v7861_v7 = vpack.c.bf16 %v1262_v0, %v1254_v45  ;;  %9667 = vst [vmem:[#allocation60_spill] sm:$0xff] %v7868_v26  ;;  %v1412_v45 = vld [vmem:[#allocation6 + $0x518] sm:$0xff] }
  0xb6   :  { %4852 = vmatpush1.bf16.msra.mxu0 %v7823_v38  ;;  %4884 = vmatpush1.bf16.msra.mxu1 %v7825_v48  ;;  %v7855_v62 = vpack.c.bf16 %v1371_v39, %v1363_v32  ;;  %v1395_v0 = vld [vmem:[#allocation6 + $0x490] sm:$0xff] }
  0xb7   :  { %4854 = vmatprep.subr.bf16.mxu0 %v7829_v56  ;;  %4886 = vmatprep.subr.bf16.mxu1 %v7831_v59  ;;  %9666 = vst [vmem:[#allocation59_spill] sm:$0xff] %v7861_v7  ;;  %v1396_v56 = vld [vmem:[#allocation6 + $0x498] sm:$0xff]  ;;  %v1270_v59 = vld [vmem:[#allocation6 + $0xa8] sm:$0xff]  ;;  %v1403_v32 = vld [vmem:[#allocation6 + $0x4d0] sm:$0xff] }
  0xb8   :  { %1106 = vmatprep.mubr.f32.mxu1 %v9662_v53  ;;  %9664 = vst [vmem:[#allocation57_spill] sm:$0xff] %v7855_v62  ;;  %v7882_v23 = vpack.c.bf16 %v1403_v32, %v1395_v0 }
  0xb9   :  { %4647 = vmatmul.mubr.msk.f32.gmra.mrb[26].mxu1 %vm94_vm0, %v7511_v47  ;;  %v1261_v47 = vld [vmem:[#allocation6 + $0x60] sm:$0xff] }
  0xba   :  { %4856 = vmatpush1.bf16.msra.mxu0 %v7838_v12  ;;  %4888 = vmatpush1.bf16.msra.mxu1 %v7840_v13  ;;  %v1404_v12 = vld [vmem:[#allocation6 + $0x4d8] sm:$0xff]  ;;  %v1278_v13 = vld [vmem:[#allocation6 + $0xe8] sm:$0xff]  ;;  %v7870_v21 = vpack.c.bf16 %v1261_v47, %v1253_v11  ;;  %9671 = vst [vmem:[#allocation64_spill] sm:$0xff] %v7882_v23  ;;  %v1285_v11 = vld [vmem:[#allocation6 + $0x120] sm:$0xff] }
  0xbb   :  { %4858 = vmatprep.subr.bf16.mxu0 %v7844_v31  ;;  %4890 = vmatprep.subr.bf16.mxu1 %v7846_v49  ;;  %v7874_v39 = vpack.c.bf16 %v1404_v12, %v1396_v56  ;;  %v7876_v40 = vpack.c.bf16 %v1278_v13, %v1270_v59  ;;  %v1286_v31 = vld [vmem:[#allocation6 + $0x128] sm:$0xff]  ;;  %v1411_v59 = vld [vmem:[#allocation6 + $0x510] sm:$0xff]  ;;  %v1293_v47 = vld [vmem:[#allocation6 + $0x160] sm:$0xff] }
  0xbc   :  { %1112 = vmatprep.mubr.f32.mxu1 %v9662_v53  ;;  %9668 = vst [vmem:[#allocation61_spill] sm:$0xff] %v7870_v21  ;;  %v1419_v12 = vld [vmem:[#allocation6 + $0x550] sm:$0xff]  ;;  %v7897_v32 = vpack.c.bf16 %v1293_v47, %v1285_v11 }
  0xbd   :  { %4648 = vmatmul.mubr.msk.f32.gmra.mrb[24].mxu1 %vm94_vm0, %v7527_v50  ;;  %9669 = vst [vmem:[#allocation62_spill] sm:$0xff] %v7874_v39  ;;  %9670 = vst [vmem:[#allocation63_spill] sm:$0xff] %v7876_v40  ;;  %v1277_v50 = vld [vmem:[#allocation6 + $0xe0] sm:$0xff]  ;;  %v7895_v0 = vpack.c.bf16 %v1419_v12, %v1411_v59  ;;  %v1443_v11 = vld [vmem:[#allocation6 + $0x610] sm:$0xff] }
  0xbe   :  { %4860 = vmatpush1.bf16.msra.mxu0 %v7853_v55  ;;  %4892 = vmatpush1.bf16.msra.mxu1 %v7855_v62  ;;  %v1420_v55 = vld [vmem:[#allocation6 + $0x558] sm:$0xff]  ;;  %v1294_v62 = vld [vmem:[#allocation6 + $0x168] sm:$0xff]  ;;  %v7884_v56 = vpack.c.bf16 %v1277_v50, %v1269_v41  ;;  %9676 = vst [vmem:[#allocation69_spill] sm:$0xff] %v7897_v32  ;;  %v1435_v41 = vld [vmem:[#allocation6 + $0x5d0] sm:$0xff] }
  0xbf   :  { %4894 = vmatprep.subr.bf16.mxu1 %v7859_v46  ;;  %4926 = vmatprep.subr.bf16.mxu0 %v7861_v7  ;;  %v7888_v13 = vpack.c.bf16 %v1420_v55, %v1412_v45  ;;  %v7890_v6 = vpack.c.bf16 %v1294_v62, %v1286_v31  ;;  %v1428_v7 = vld [vmem:[#allocation6 + $0x598] sm:$0xff]  ;;  %v1302_v46 = vld [vmem:[#allocation6 + $0x1a8] sm:$0xff]  ;;  %9675 = vst [vmem:[#allocation68_spill] sm:$0xff] %v7895_v0  ;;  %v1427_v55 = vld [vmem:[#allocation6 + $0x590] sm:$0xff] }
  0xc0   :  { %1640 = vmatprep.mubr.f32.mxu1 %v9662_v53  ;;  %9672 = vst [vmem:[#allocation65_spill] sm:$0xff] %v7884_v56  ;;  %v1301_v50 = vld [vmem:[#allocation6 + $0x1a0] sm:$0xff]  ;;  %v7907_v59 = vpack.c.bf16 %v1435_v41, %v1427_v55  ;;  %v1451_v47 = vld [vmem:[#allocation6 + $0x650] sm:$0xff] }
  0xc1   :  { %1570 = vmatmul.mubr.f32.vlgmr.msra.gmra.mrb[0].mxu0 %v9662_v53  ;;  %9673 = vst [vmem:[#allocation66_spill] sm:$0xff] %v7888_v13  ;;  %9674 = vst [vmem:[#allocation67_spill] sm:$0xff] %v7890_v6  ;;  %v1309_v45 = vld [vmem:[#allocation6 + $0x1e0] sm:$0xff]  ;;  %v7919_v55 = vpack.c.bf16 %v1451_v47, %v1443_v11 }
  0xc2   :  { %4896 = vmatpush1.bf16.msra.mxu1 %v7868_v26  ;;  %4928 = vmatpush1.bf16.msra.mxu0 %v7870_v21  ;;  %v1436_v26 = vld [vmem:[#allocation6 + $0x5d8] sm:$0xff]  ;;  %v1310_v21 = vld [vmem:[#allocation6 + $0x1e8] sm:$0xff]  ;;  %9679 = vst [vmem:[#allocation72_spill] sm:$0xff] %v7907_v59  ;;  %v7909_v12 = vpack.c.bf16 %v1309_v45, %v1301_v50  ;;  %v1459_v50 = vld [vmem:[#allocation6 + $0x690] sm:$0xff] }
  0xc3   :  { %4898 = vmatprep.subr.bf16.mxu1 %v7874_v39  ;;  %4930 = vmatprep.subr.bf16.mxu0 %v7876_v40  ;;  %v7901_v31 = vpack.c.bf16 %v1436_v26, %v1428_v7  ;;  %v7903_v62 = vpack.c.bf16 %v1310_v21, %v1302_v46  ;;  %v1444_v40 = vld [vmem:[#allocation6 + $0x618] sm:$0xff]  ;;  %v1318_v39 = vld [vmem:[#allocation6 + $0x228] sm:$0xff]  ;;  %v1317_v26 = vld [vmem:[#allocation6 + $0x220] sm:$0xff]  ;;  %9683 = vst [vmem:[#allocation76_spill] sm:$0xff] %v7919_v55 }
  0xc4   :  { %1711 = vmatprep.mubr.f32.mxu0 %v9662_v53  ;;  %9680 = vst [vmem:[#allocation73_spill] sm:$0xff] %v7909_v12  ;;  %v1325_v21 = vld [vmem:[#allocation6 + $0x260] sm:$0xff]  ;;  %v1467_v45 = vld [vmem:[#allocation6 + $0x6d0] sm:$0xff] }
  0xc5   :  { %9677 = vst [vmem:[#allocation70_spill] sm:$0xff] %v7901_v31  ;;  %9678 = vst [vmem:[#allocation71_spill] sm:$0xff] %v7903_v62  ;;  %v7921_v41 = vpack.c.bf16 %v1325_v21, %v1317_v26  ;;  %v7931_v11 = vpack.c.bf16 %v1467_v45, %v1459_v50  ;;  %v1475_v26 = vld [vmem:[#allocation6 + $0x710] sm:$0xff] }
  0xc6   :  { %4900 = vmatpush1.bf16.msra.mxu1 %v7882_v23  ;;  %4932 = vmatpush1.bf16.msra.mxu0 %v7884_v56  ;;  %v1452_v23 = vld [vmem:[#allocation6 + $0x658] sm:$0xff]  ;;  %v1326_v56 = vld [vmem:[#allocation6 + $0x268] sm:$0xff]  ;;  %v1483_v21 = vld [vmem:[#allocation6 + $0x750] sm:$0xff] }
  0xc7   :  { %4902 = vmatprep.subr.bf16.mxu1 %v7888_v13  ;;  %4934 = vmatprep.subr.bf16.mxu0 %v7890_v6  ;;  %v7913_v46 = vpack.c.bf16 %v1452_v23, %v1444_v40  ;;  %v7915_v7 = vpack.c.bf16 %v1326_v56, %v1318_v39  ;;  %v1460_v6 = vld [vmem:[#allocation6 + $0x698] sm:$0xff]  ;;  %v1334_v13 = vld [vmem:[#allocation6 + $0x2a8] sm:$0xff]  ;;  %9684 = vst [vmem:[#allocation77_spill] sm:$0xff] %v7921_v41  ;;  %v1333_v23 = vld [vmem:[#allocation6 + $0x2a0] sm:$0xff] }
  0xc8   :  { %v1341_v56 = vld [vmem:[#allocation6 + $0x2e0] sm:$0xff]  ;;  %9687 = vst [vmem:[#allocation80_spill] sm:$0xff] %v7931_v11  ;;  %v7943_v50 = vpack.c.bf16 %v1483_v21, %v1475_v26 }
  0xc9   :  { %9681 = vst [vmem:[#allocation74_spill] sm:$0xff] %v7913_v46  ;;  %9682 = vst [vmem:[#allocation75_spill] sm:$0xff] %v7915_v7  ;;  %v7933_v47 = vpack.c.bf16 %v1341_v56, %v1333_v23  ;;  %v1491_v23 = vld [vmem:[#allocation6 + $0x790] sm:$0xff] }
  0xca   :  { %4904 = vmatpush1.bf16.msra.mxu1 %v7895_v0  ;;  %4936 = vmatpush1.bf16.msra.mxu0 %v7897_v32  ;;  %v1468_v0 = vld [vmem:[#allocation6 + $0x6d8] sm:$0xff]  ;;  %v1342_v32 = vld [vmem:[#allocation6 + $0x2e8] sm:$0xff]  ;;  %9691 = vst [vmem:[#allocation84_spill] sm:$0xff] %v7943_v50  ;;  %v1499_v56 = vld [vmem:[#allocation6 + $0x7d0] sm:$0xff] }
  0xcb   :  { %4906 = vmatprep.subr.bf16.mxu1 %v7901_v31  ;;  %4938 = vmatprep.subr.bf16.mxu0 %v7903_v62  ;;  %v7925_v39 = vpack.c.bf16 %v1468_v0, %v1460_v6  ;;  %v7927_v40 = vpack.c.bf16 %v1342_v32, %v1334_v13  ;;  %v1476_v62 = vld [vmem:[#allocation6 + $0x718] sm:$0xff]  ;;  %v1350_v31 = vld [vmem:[#allocation6 + $0x328] sm:$0xff]  ;;  %9688 = vst [vmem:[#allocation81_spill] sm:$0xff] %v7933_v47  ;;  %v1349_v0 = vld [vmem:[#allocation6 + $0x320] sm:$0xff] }
  0xcc   :  { %v1357_v32 = vld [vmem:[#allocation6 + $0x360] sm:$0xff]  ;;  %v7955_v26 = vpack.c.bf16 %v1499_v56, %v1491_v23 }
  0xcd   :  { %9685 = vst [vmem:[#allocation78_spill] sm:$0xff] %v7925_v39  ;;  %9686 = vst [vmem:[#allocation79_spill] sm:$0xff] %v7927_v40  ;;  %v7945_v45 = vpack.c.bf16 %v1357_v32, %v1349_v0  ;;  %v1381_v0 = vld [vmem:[#allocation6 + $0x420] sm:$0xff] }
  0xce   :  { %4908 = vmatpush1.bf16.msra.mxu1 %v7907_v59  ;;  %4940 = vmatpush1.bf16.msra.mxu0 %v7909_v12  ;;  %v1484_v59 = vld [vmem:[#allocation6 + $0x758] sm:$0xff]  ;;  %v1358_v12 = vld [vmem:[#allocation6 + $0x368] sm:$0xff]  ;;  %9695 = vst [vmem:[#allocation88_spill] sm:$0xff] %v7955_v26  ;;  %v1389_v32 = vld [vmem:[#allocation6 + $0x460] sm:$0xff] }
  0xcf   :  { %4910 = vmatprep.subr.bf16.mxu1 %v7913_v46  ;;  %4942 = vmatprep.subr.bf16.mxu0 %v7915_v7  ;;  %v7937_v13 = vpack.c.bf16 %v1484_v59, %v1476_v62  ;;  %v7939_v6 = vpack.c.bf16 %v1358_v12, %v1350_v31  ;;  %v1492_v7 = vld [vmem:[#allocation6 + $0x798] sm:$0xff]  ;;  %v1366_v46 = vld [vmem:[#allocation6 + $0x3a8] sm:$0xff]  ;;  %9692 = vst [vmem:[#allocation85_spill] sm:$0xff] %v7945_v45  ;;  %v1365_v59 = vld [vmem:[#allocation6 + $0x3a0] sm:$0xff] }
  0xd0   :  { %v1373_v12 = vld [vmem:[#allocation6 + $0x3e0] sm:$0xff]  ;;  %v7967_v23 = vpack.c.bf16 %v1389_v32, %v1381_v0 }
  0xd1   :  { %9689 = vst [vmem:[#allocation82_spill] sm:$0xff] %v7937_v13  ;;  %9690 = vst [vmem:[#allocation83_spill] sm:$0xff] %v7939_v6  ;;  %v7957_v21 = vpack.c.bf16 %v1373_v12, %v1365_v59  ;;  %v1397_v59 = vld [vmem:[#allocation6 + $0x4a0] sm:$0xff] }
  0xd2   :  { %4912 = vmatpush1.bf16.msra.mxu1 %v7919_v55  ;;  %4944 = vmatpush1.bf16.msra.mxu0 %v7921_v41  ;;  %v1500_v55 = vld [vmem:[#allocation6 + $0x7d8] sm:$0xff]  ;;  %v1374_v41 = vld [vmem:[#allocation6 + $0x3e8] sm:$0xff]  ;;  %9699 = vst [vmem:[#allocation92_spill] sm:$0xff] %v7967_v23  ;;  %v1405_v12 = vld [vmem:[#allocation6 + $0x4e0] sm:$0xff] }
  0xd3   :  { %4914 = vmatprep.subr.bf16.mxu1 %v7925_v39  ;;  %4946 = vmatprep.subr.bf16.mxu0 %v7927_v40  ;;  %v7949_v31 = vpack.c.bf16 %v1500_v55, %v1492_v7  ;;  %v7951_v62 = vpack.c.bf16 %v1374_v41, %v1366_v46  ;;  %v1382_v40 = vld [vmem:[#allocation6 + $0x428] sm:$0xff]  ;;  %v1256_v39 = vld [vmem:[#allocation6 + $0x38] sm:$0xff]  ;;  %9696 = vst [vmem:[#allocation89_spill] sm:$0xff] %v7957_v21  ;;  %v1255_v55 = vld [vmem:[#allocation6 + $0x30] sm:$0xff] }
  0xd4   :  { %v1263_v41 = vld [vmem:[#allocation6 + $0x70] sm:$0xff]  ;;  %v7980_v0 = vpack.c.bf16 %v1405_v12, %v1397_v59 }
  0xd5   :  { %9693 = vst [vmem:[#allocation86_spill] sm:$0xff] %v7949_v31  ;;  %9694 = vst [vmem:[#allocation87_spill] sm:$0xff] %v7951_v62  ;;  %v7969_v56 = vpack.c.bf16 %v1263_v41, %v1255_v55  ;;  %v1287_v55 = vld [vmem:[#allocation6 + $0x130] sm:$0xff] }
  0xd6   :  { %4916 = vmatpush1.bf16.msra.mxu1 %v7931_v11  ;;  %4948 = vmatpush1.bf16.msra.mxu0 %v7933_v47  ;;  %v1390_v11 = vld [vmem:[#allocation6 + $0x468] sm:$0xff]  ;;  %v1264_v47 = vld [vmem:[#allocation6 + $0x78] sm:$0xff]  ;;  %9703 = vst [vmem:[#allocation96_spill] sm:$0xff] %v7980_v0  ;;  %v1295_v41 = vld [vmem:[#allocation6 + $0x170] sm:$0xff] }
  0xd7   :  { %4918 = vmatprep.subr.bf16.mxu1 %v7937_v13  ;;  %4950 = vmatprep.subr.bf16.mxu0 %v7939_v6  ;;  %v7961_v46 = vpack.c.bf16 %v1390_v11, %v1382_v40  ;;  %v7963_v7 = vpack.c.bf16 %v1264_v47, %v1256_v39  ;;  %v1398_v6 = vld [vmem:[#allocation6 + $0x4a8] sm:$0xff]  ;;  %v1272_v13 = vld [vmem:[#allocation6 + $0xb8] sm:$0xff]  ;;  %9700 = vst [vmem:[#allocation93_spill] sm:$0xff] %v7969_v56  ;;  %v1271_v11 = vld [vmem:[#allocation6 + $0xb0] sm:$0xff] }
  0xd8   :  { %v1279_v47 = vld [vmem:[#allocation6 + $0xf0] sm:$0xff]  ;;  %v7995_v12 = vpack.c.bf16 %v1295_v41, %v1287_v55  ;;  %v1445_v55 = vld [vmem:[#allocation6 + $0x620] sm:$0xff] }
  0xd9   :  { %9697 = vst [vmem:[#allocation90_spill] sm:$0xff] %v7961_v46  ;;  %9698 = vst [vmem:[#allocation91_spill] sm:$0xff] %v7963_v7  ;;  %v7982_v32 = vpack.c.bf16 %v1279_v47, %v1271_v11  ;;  %v1303_v11 = vld [vmem:[#allocation6 + $0x1b0] sm:$0xff]  ;;  %v1453_v41 = vld [vmem:[#allocation6 + $0x660] sm:$0xff] }
  0xda   :  { %4920 = vmatpush1.bf16.msra.mxu1 %v7943_v50  ;;  %4952 = vmatpush1.bf16.msra.mxu0 %v7945_v45  ;;  %v1406_v50 = vld [vmem:[#allocation6 + $0x4e8] sm:$0xff]  ;;  %v1280_v45 = vld [vmem:[#allocation6 + $0xf8] sm:$0xff]  ;;  %9708 = vst [vmem:[#allocation101_spill] sm:$0xff] %v7995_v12  ;;  %v1311_v47 = vld [vmem:[#allocation6 + $0x1f0] sm:$0xff] }
  0xdb   :  { %4922 = vmatprep.subr.bf16.mxu1 %v7949_v31  ;;  %4954 = vmatprep.subr.bf16.mxu0 %v7951_v62  ;;  %v7973_v39 = vpack.c.bf16 %v1406_v50, %v1398_v6  ;;  %v7975_v40 = vpack.c.bf16 %v1280_v45, %v1272_v13  ;;  %v1414_v62 = vld [vmem:[#allocation6 + $0x528] sm:$0xff]  ;;  %v1288_v31 = vld [vmem:[#allocation6 + $0x138] sm:$0xff]  ;;  %9704 = vst [vmem:[#allocation97_spill] sm:$0xff] %v7982_v32  ;;  %v1413_v6 = vld [vmem:[#allocation6 + $0x520] sm:$0xff] }
  0xdc   :  { %v1421_v50 = vld [vmem:[#allocation6 + $0x560] sm:$0xff] }
  0xdd   :  { %9701 = vst [vmem:[#allocation94_spill] sm:$0xff] %v7973_v39  ;;  %9702 = vst [vmem:[#allocation95_spill] sm:$0xff] %v7975_v40  ;;  %v7993_v59 = vpack.c.bf16 %v1421_v50, %v1413_v6  ;;  %v8007_v50 = vpack.c.bf16 %v1311_v47, %v1303_v11  ;;  %v1461_v11 = vld [vmem:[#allocation6 + $0x6a0] sm:$0xff] }
  0xde   :  { %4924 = vmatpush1.bf16.msra.mxu1 %v7955_v26  ;;  %4956 = vmatpush1.bf16.msra.mxu0 %v7957_v21  ;;  %v1422_v26 = vld [vmem:[#allocation6 + $0x568] sm:$0xff]  ;;  %v1296_v21 = vld [vmem:[#allocation6 + $0x178] sm:$0xff]  ;;  %v1469_v47 = vld [vmem:[#allocation6 + $0x6e0] sm:$0xff] }
  0xdf   :  { %4958 = vmatprep.subr.bf16.mxu0 %v7961_v46  ;;  %4990 = vmatprep.subr.bf16.mxu1 %v7963_v7  ;;  %v7986_v13 = vpack.c.bf16 %v1422_v26, %v1414_v62  ;;  %v7988_v45 = vpack.c.bf16 %v1296_v21, %v1288_v31  ;;  %v1430_v46 = vld [vmem:[#allocation6 + $0x5a8] sm:$0xff]  ;;  %v1304_v7 = vld [vmem:[#allocation6 + $0x1b8] sm:$0xff]  ;;  %9707 = vst [vmem:[#allocation100_spill] sm:$0xff] %v7993_v59  ;;  %v1429_v62 = vld [vmem:[#allocation6 + $0x5a0] sm:$0xff] }
  0xe0   :  { %v1437_v26 = vld [vmem:[#allocation6 + $0x5e0] sm:$0xff]  ;;  %9712 = vst [vmem:[#allocation105_spill] sm:$0xff] %v8007_v50 }
  0xe1   :  { %1641 = vmatmul.mubr.f32.vlgmr.msra.gmra.mrb[8].mxu1 %v9662_v53  ;;  %9705 = vst [vmem:[#allocation98_spill] sm:$0xff] %v7986_v13  ;;  %9706 = vst [vmem:[#allocation99_spill] sm:$0xff] %v7988_v45  ;;  %v8005_v6 = vpack.c.bf16 %v1437_v26, %v1429_v62  ;;  %v8017_v62 = vpack.c.bf16 %v1453_v41, %v1445_v55  ;;  %v8029_v55 = vpack.c.bf16 %v1469_v47, %v1461_v11 }
  0xe2   :  { %4960 = vmatpush1.bf16.msra.mxu0 %v7967_v23  ;;  %4992 = vmatpush1.bf16.msra.mxu1 %v7969_v56  ;;  %v1438_v23 = vld [vmem:[#allocation6 + $0x5e8] sm:$0xff]  ;;  %v1312_v56 = vld [vmem:[#allocation6 + $0x1f8] sm:$0xff] }
  0xe3   :  { %4962 = vmatprep.subr.bf16.mxu0 %v7973_v39  ;;  %4994 = vmatprep.subr.bf16.mxu1 %v7975_v40  ;;  %v7999_v31 = vpack.c.bf16 %v1438_v23, %v1430_v46  ;;  %v8001_v21 = vpack.c.bf16 %v1312_v56, %v1304_v7  ;;  %v1446_v39 = vld [vmem:[#allocation6 + $0x628] sm:$0xff]  ;;  %v1320_v40 = vld [vmem:[#allocation6 + $0x238] sm:$0xff]  ;;  %9711 = vst [vmem:[#allocation104_spill] sm:$0xff] %v8005_v6  ;;  %v1319_v23 = vld [vmem:[#allocation6 + $0x230] sm:$0xff] }
  0xe4   :  { %1782 = vmatprep.mubr.f32.mxu1 %v9662_v53  ;;  %v1327_v56 = vld [vmem:[#allocation6 + $0x270] sm:$0xff]  ;;  %9715 = vst [vmem:[#allocation108_spill] sm:$0xff] %v8017_v62  ;;  %9719 = vst [vmem:[#allocation112_spill] sm:$0xff] %v8029_v55 }
  0xe5   :  { %9709 = vst [vmem:[#allocation102_spill] sm:$0xff] %v7999_v31  ;;  %9710 = vst [vmem:[#allocation103_spill] sm:$0xff] %v8001_v21  ;;  %v8019_v26 = vpack.c.bf16 %v1327_v56, %v1319_v23  ;;  %v1477_v23 = vld [vmem:[#allocation6 + $0x720] sm:$0xff] }
  0xe6   :  { %4964 = vmatpush1.bf16.msra.mxu0 %v7980_v0  ;;  %4996 = vmatpush1.bf16.msra.mxu1 %v7982_v32  ;;  %v1454_v0 = vld [vmem:[#allocation6 + $0x668] sm:$0xff]  ;;  %v1328_v32 = vld [vmem:[#allocation6 + $0x278] sm:$0xff]  ;;  %v1485_v56 = vld [vmem:[#allocation6 + $0x760] sm:$0xff] }
  0xe7   :  { %4966 = vmatprep.subr.bf16.mxu0 %v7986_v13  ;;  %4998 = vmatprep.subr.bf16.mxu1 %v7988_v45  ;;  %v8011_v46 = vpack.c.bf16 %v1454_v0, %v1446_v39  ;;  %v8013_v7 = vpack.c.bf16 %v1328_v32, %v1320_v40  ;;  %v1462_v13 = vld [vmem:[#allocation6 + $0x6a8] sm:$0xff]  ;;  %v1336_v45 = vld [vmem:[#allocation6 + $0x2b8] sm:$0xff]  ;;  %9716 = vst [vmem:[#allocation109_spill] sm:$0xff] %v8019_v26  ;;  %v1335_v0 = vld [vmem:[#allocation6 + $0x2b0] sm:$0xff] }
  0xe8   :  { %v1343_v32 = vld [vmem:[#allocation6 + $0x2f0] sm:$0xff]  ;;  %v8041_v11 = vpack.c.bf16 %v1485_v56, %v1477_v23 }
  0xe9   :  { %9713 = vst [vmem:[#allocation106_spill] sm:$0xff] %v8011_v46  ;;  %9714 = vst [vmem:[#allocation107_spill] sm:$0xff] %v8013_v7  ;;  %v8031_v41 = vpack.c.bf16 %v1343_v32, %v1335_v0  ;;  %v1493_v0 = vld [vmem:[#allocation6 + $0x7a0] sm:$0xff]  ;;  %v1375_v32 = vld [vmem:[#allocation6 + $0x3f0] sm:$0xff] }
  0xea   :  { %4968 = vmatpush1.bf16.msra.mxu0 %v7993_v59  ;;  %5000 = vmatpush1.bf16.msra.mxu1 %v7995_v12  ;;  %v1470_v59 = vld [vmem:[#allocation6 + $0x6e8] sm:$0xff]  ;;  %v1344_v12 = vld [vmem:[#allocation6 + $0x2f8] sm:$0xff]  ;;  %9723 = vst [vmem:[#allocation116_spill] sm:$0xff] %v8041_v11 }
  0xeb   :  { %4970 = vmatprep.subr.bf16.mxu0 %v7999_v31  ;;  %5002 = vmatprep.subr.bf16.mxu1 %v8001_v21  ;;  %v8023_v39 = vpack.c.bf16 %v1470_v59, %v1462_v13  ;;  %v8025_v40 = vpack.c.bf16 %v1344_v12, %v1336_v45  ;;  %v1478_v31 = vld [vmem:[#allocation6 + $0x728] sm:$0xff]  ;;  %v1352_v21 = vld [vmem:[#allocation6 + $0x338] sm:$0xff]  ;;  %9720 = vst [vmem:[#allocation113_spill] sm:$0xff] %v8031_v41  ;;  %v1351_v59 = vld [vmem:[#allocation6 + $0x330] sm:$0xff] }
  0xec   :  { %v1359_v12 = vld [vmem:[#allocation6 + $0x370] sm:$0xff] }
  0xed   :  { %9717 = vst [vmem:[#allocation110_spill] sm:$0xff] %v8023_v39  ;;  %9718 = vst [vmem:[#allocation111_spill] sm:$0xff] %v8025_v40  ;;  %v8043_v47 = vpack.c.bf16 %v1359_v12, %v1351_v59  ;;  %v1408_v59 = vld [vmem:[#allocation6 + $0x4f8] sm:$0xff] }
  0xee   :  { %4972 = vmatpush1.bf16.msra.mxu0 %v8005_v6  ;;  %5004 = vmatpush1.bf16.msra.mxu1 %v8007_v50  ;;  %v1486_v6 = vld [vmem:[#allocation6 + $0x768] sm:$0xff]  ;;  %v1360_v50 = vld [vmem:[#allocation6 + $0x378] sm:$0xff] }
  0xef   :  { %4974 = vmatprep.subr.bf16.mxu0 %v8011_v46  ;;  %5006 = vmatprep.subr.bf16.mxu1 %v8013_v7  ;;  %v8035_v13 = vpack.c.bf16 %v1486_v6, %v1478_v31  ;;  %v8037_v45 = vpack.c.bf16 %v1360_v50, %v1352_v21  ;;  %v1494_v46 = vld [vmem:[#allocation6 + $0x7a8] sm:$0xff]  ;;  %v1368_v7 = vld [vmem:[#allocation6 + $0x3b8] sm:$0xff]  ;;  %9724 = vst [vmem:[#allocation117_spill] sm:$0xff] %v8043_v47  ;;  %v1501_v6 = vld [vmem:[#allocation6 + $0x7e0] sm:$0xff] }
  0xf0   :  { %v1367_v50 = vld [vmem:[#allocation6 + $0x3b0] sm:$0xff]  ;;  %v8053_v23 = vpack.c.bf16 %v1501_v6, %v1493_v0 }
  0xf1   :  { %9721 = vst [vmem:[#allocation114_spill] sm:$0xff] %v8035_v13  ;;  %9722 = vst [vmem:[#allocation115_spill] sm:$0xff] %v8037_v45  ;;  %v8055_v56 = vpack.c.bf16 %v1375_v32, %v1367_v50  ;;  %v1399_v6 = vld [vmem:[#allocation6 + $0x4b0] sm:$0xff] }
  0xf2   :  { %4976 = vmatpush1.bf16.msra.mxu0 %v8017_v62  ;;  %5008 = vmatpush1.bf16.msra.mxu1 %v8019_v26  ;;  %v1502_v62 = vld [vmem:[#allocation6 + $0x7e8] sm:$0xff]  ;;  %v1376_v26 = vld [vmem:[#allocation6 + $0x3f8] sm:$0xff]  ;;  %9727 = vst [vmem:[#allocation120_spill] sm:$0xff] %v8053_v23  ;;  %v1407_v50 = vld [vmem:[#allocation6 + $0x4f0] sm:$0xff] }
  0xf3   :  { %4978 = vmatprep.subr.bf16.mxu0 %v8023_v39  ;;  %5010 = vmatprep.subr.bf16.mxu1 %v8025_v40  ;;  %v8047_v31 = vpack.c.bf16 %v1502_v62, %v1494_v46  ;;  %v8049_v21 = vpack.c.bf16 %v1376_v26, %v1368_v7  ;;  %v1384_v39 = vld [vmem:[#allocation6 + $0x438] sm:$0xff]  ;;  %9728 = vst [vmem:[#allocation121_spill] sm:$0xff] %v8055_v56  ;;  %v1383_v7 = vld [vmem:[#allocation6 + $0x430] sm:$0xff] }
  0xf4   :  { %v1391_v62 = vld [vmem:[#allocation6 + $0x470] sm:$0xff]  ;;  %v1400_v26 = vld [vmem:[#allocation6 + $0x4b8] sm:$0xff]  ;;  %v8071_v32 = vpack.c.bf16 %v1407_v50, %v1399_v6 }
  0xf5   :  { %9725 = vst [vmem:[#allocation118_spill] sm:$0xff] %v8047_v31  ;;  %9726 = vst [vmem:[#allocation119_spill] sm:$0xff] %v8049_v21  ;;  %v8063_v12 = vpack.c.bf16 %v1391_v62, %v1383_v7  ;;  %v8066_v0 = vpack.c.bf16 %v1408_v59, %v1400_v26  ;;  %v1415_v62 = vld [vmem:[#allocation6 + $0x530] sm:$0xff] }
  0xf6   :  { %4980 = vmatpush1.bf16.msra.mxu0 %v8029_v55  ;;  %5012 = vmatpush1.bf16.msra.mxu1 %v8031_v41  ;;  %v1392_v55 = vld [vmem:[#allocation6 + $0x478] sm:$0xff]  ;;  %9732 = vst [vmem:[#allocation125_spill] sm:$0xff] %v8071_v32  ;;  %v1423_v26 = vld [vmem:[#allocation6 + $0x570] sm:$0xff] }
  0xf7   :  { %4982 = vmatprep.subr.bf16.mxu0 %v8035_v13  ;;  %5014 = vmatprep.subr.bf16.mxu1 %v8037_v45  ;;  %v8059_v46 = vpack.c.bf16 %v1392_v55, %v1384_v39  ;;  %9730 = vst [vmem:[#allocation123_spill] sm:$0xff] %v8063_v12  ;;  %9731 = vst [vmem:[#allocation124_spill] sm:$0xff] %v8066_v0  ;;  %v1416_v39 = vld [vmem:[#allocation6 + $0x538] sm:$0xff]  ;;  %v8083_v6 = vpack.c.bf16 %v1423_v26, %v1415_v62  ;;  %v1455_v26 = vld [vmem:[#allocation6 + $0x670] sm:$0xff] }
  0xf8   :  { %v1424_v55 = vld [vmem:[#allocation6 + $0x578] sm:$0xff] }
  0xf9   :  { %9729 = vst [vmem:[#allocation122_spill] sm:$0xff] %v8059_v46  ;;  %v8075_v7 = vpack.c.bf16 %v1424_v55, %v1416_v39  ;;  %9736 = vst [vmem:[#allocation129_spill] sm:$0xff] %v8083_v6  ;;  %v1431_v39 = vld [vmem:[#allocation6 + $0x5b0] sm:$0xff] }
  0xfa   :  { %4984 = vmatpush1.bf16.msra.mxu0 %v8041_v11  ;;  %5016 = vmatpush1.bf16.msra.mxu1 %v8043_v47  ;;  %v1439_v55 = vld [vmem:[#allocation6 + $0x5f0] sm:$0xff] }
  0xfb   :  { %4986 = vmatprep.subr.bf16.mxu0 %v8047_v31  ;;  %5018 = vmatprep.subr.bf16.mxu1 %v8049_v21  ;;  %9733 = vst [vmem:[#allocation126_spill] sm:$0xff] %v8075_v7  ;;  %v8095_v62 = vpack.c.bf16 %v1439_v55, %v1431_v39  ;;  %v1471_v55 = vld [vmem:[#allocation6 + $0x6f0] sm:$0xff] }
  0xfd   :  { %9740 = vst [vmem:[#allocation133_spill] sm:$0xff] %v8095_v62 }
  0xfe   :  { %4988 = vmatpush1.bf16.msra.mxu0 %v8053_v23  ;;  %5020 = vmatpush1.bf16.msra.mxu1 %v8055_v56  ;;  %v1440_v23 = vld [vmem:[#allocation6 + $0x5f8] sm:$0xff] }
  0xff   :  { %5022 = vmatprep.subr.bf16.mxu1 %v8059_v46  ;;  %5054 = vmatprep.subr.bf16.mxu0 %v7613_v37  ;;  %v1432_v37 = vld [vmem:[#allocation6 + $0x5b8] sm:$0xff] }
 0x100   :  { %v8087_v50 = vpack.c.bf16 %v1440_v23, %v1432_v37  ;;  %v1447_v23 = vld [vmem:[#allocation6 + $0x630] sm:$0xff] }
 0x101   :  { %1712 = vmatmul.mubr.f32.vlgmr.msra.gmra.mrb[8].mxu0 %v9662_v53  ;;  %v8107_v39 = vpack.c.bf16 %v1455_v26, %v1447_v23  ;;  %v1487_v26 = vld [vmem:[#allocation6 + $0x770] sm:$0xff] }
 0x102   :  { %5024 = vmatpush1.bf16.msra.mxu1 %v8063_v12  ;;  %5056 = vmatpush1.bf16.msra.mxu0 %v7652_v52  ;;  %9737 = vst [vmem:[#allocation130_spill] sm:$0xff] %v8087_v50  ;;  %v1456_v52 = vld [vmem:[#allocation6 + $0x678] sm:$0xff] }
 0x103   :  { %5026 = vmatprep.subr.bf16.mxu1 %v8066_v0  ;;  %5058 = vmatprep.subr.bf16.mxu0 %v7654_v54  ;;  %9744 = vst [vmem:[#allocation137_spill] sm:$0xff] %v8107_v39 }
 0x104   :  { %v8078_v59 = vpop.f32.mrb[0].mxu1 }
 0x105   :  { %9734 = vst [vmem:[#allocation127_spill] sm:$0xff] %v8078_v59  ;;  %v8080_v31 = vpop.f32.mrb[1].mxu1  ;;  %v1448_v59 = vld [vmem:[#allocation6 + $0x638] sm:$0xff] }
 0x106   :  { %9735 = vst [vmem:[#allocation128_spill] sm:$0xff] %v8080_v31  ;;  %5028 = vmatpush1.bf16.msra.mxu1 %v8071_v32  ;;  %5060 = vmatpush1.bf16.msra.mxu0 %v7661_v1  ;;  %v8099_v37 = vpack.c.bf16 %v1456_v52, %v1448_v59  ;;  %v1463_v59 = vld [vmem:[#allocation6 + $0x6b0] sm:$0xff] }
 0x107   :  { %5030 = vmatprep.subr.bf16.mxu1 %v8075_v7  ;;  %5062 = vmatprep.subr.bf16.mxu0 %v7665_v2  ;;  %v1472_v2 = vld [vmem:[#allocation6 + $0x6f8] sm:$0xff]  ;;  %v8119_v23 = vpack.c.bf16 %v1471_v55, %v1463_v59  ;;  %v1495_v55 = vld [vmem:[#allocation6 + $0x7b0] sm:$0xff] }
 0x108   :  { %v8090_v54 = vpop.f32.mrb[2].mxu1  ;;  %9741 = vst [vmem:[#allocation134_spill] sm:$0xff] %v8099_v37 }
 0x109   :  { %9738 = vst [vmem:[#allocation131_spill] sm:$0xff] %v8090_v54  ;;  %v8092_v11 = vpop.f32.mrb[3].mxu1  ;;  %v1464_v54 = vld [vmem:[#allocation6 + $0x6b8] sm:$0xff]  ;;  %9748 = vst [vmem:[#allocation141_spill] sm:$0xff] %v8119_v23 }
 0x10a   :  { %9739 = vst [vmem:[#allocation132_spill] sm:$0xff] %v8092_v11  ;;  %5032 = vmatpush1.bf16.msra.mxu1 %v8083_v6  ;;  %5064 = vmatpush1.bf16.msra.mxu0 %v7676_v9  ;;  %v8111_v52 = vpack.c.bf16 %v1472_v2, %v1464_v54  ;;  %v1479_v2 = vld [vmem:[#allocation6 + $0x730] sm:$0xff] }
 0x10b   :  { %5034 = vmatprep.subr.bf16.mxu1 %v8087_v50  ;;  %5066 = vmatprep.subr.bf16.mxu0 %v7679_v10  ;;  %v1488_v10 = vld [vmem:[#allocation6 + $0x778] sm:$0xff] }
 0x10c   :  { %v8102_v31 = vpop.f32.mrb[4].mxu1  ;;  %9745 = vst [vmem:[#allocation138_spill] sm:$0xff] %v8111_v52 }
 0x10d   :  { %9742 = vst [vmem:[#allocation135_spill] sm:$0xff] %v8102_v31  ;;  %v8104_v1 = vpop.f32.mrb[5].mxu1  ;;  %v1480_v31 = vld [vmem:[#allocation6 + $0x738] sm:$0xff] }
 0x10e   :  { %9743 = vst [vmem:[#allocation136_spill] sm:$0xff] %v8104_v1  ;;  %5036 = vmatpush1.bf16.msra.mxu1 %v8095_v62  ;;  %5068 = vmatpush1.bf16.msra.mxu0 %v7689_v15  ;;  %v8123_v54 = vpack.c.bf16 %v1488_v10, %v1480_v31  ;;  %v1496_v1 = vld [vmem:[#allocation6 + $0x7b8] sm:$0xff]  ;;  %v9757_v31 = vld [vmem:[#allocation54_spill] sm:$0xff] }
 0x10f   :  { %5038 = vmatprep.subr.bf16.mxu1 %v8099_v37  ;;  %5070 = vmatprep.subr.bf16.mxu0 %v7692_v16  ;;  %v8127_v16 = vpack.c.bf16 %v1487_v26, %v1479_v2  ;;  %v9758_v2 = vld [vmem:[#allocation57_spill] sm:$0xff]  ;;  %v9759_v26 = vld [vmem:[#allocation56_spill] sm:$0xff] }
 0x110   :  { %v8114_v11 = vpop.f32.mrb[6].mxu1  ;;  %9749 = vst [vmem:[#allocation142_spill] sm:$0xff] %v8123_v54 }
 0x111   :  { %9746 = vst [vmem:[#allocation139_spill] sm:$0xff] %v8114_v11  ;;  %v8116_v9 = vpop.f32.mrb[7].mxu1  ;;  %v1504_v11 = vld [vmem:[#allocation6 + $0x7f8] sm:$0xff]  ;;  %9750 = vst [vmem:[#allocation143_spill] sm:$0xff] %v8127_v16 }
 0x112   :  { %9747 = vst [vmem:[#allocation140_spill] sm:$0xff] %v8116_v9  ;;  %5040 = vmatpush1.bf16.msra.mxu1 %v8107_v39  ;;  %5072 = vmatpush1.bf16.msra.mxu0 %v7701_v22  ;;  %v8131_v59 = vpack.c.bf16 %v1504_v11, %v1496_v1  ;;  %v1503_v9 = vld [vmem:[#allocation6 + $0x7f0] sm:$0xff]  ;;  %v9753_v1 = vld [vmem:[#allocation51_spill] sm:$0xff] }
 0x113   :  { %5042 = vmatprep.subr.bf16.mxu1 %v8111_v52  ;;  %5074 = vmatprep.subr.bf16.mxu0 %v7704_v24  ;;  %v8135_v10 = vpack.c.bf16 %v1503_v9, %v1495_v55  ;;  %v9754_v9 = vld [vmem:[#allocation50_spill] sm:$0xff]  ;;  %v9756_v11 = vld [vmem:[#allocation52_spill] sm:$0xff] }
 0x114   :  { %9751 = vst [vmem:[#allocation144_spill] sm:$0xff] %v8131_v59  ;;  %v9760_v55 = vld [vmem:[#allocation58_spill] sm:$0xff] }
 0x115   :  { %9752 = vst [vmem:[#allocation145_spill] sm:$0xff] %v8135_v10 }
 0x116   :  { %5044 = vmatpush1.bf16.msra.mxu1 %v8119_v23  ;;  %5076 = vmatpush1.bf16.msra.mxu0 %v7713_v29 }
 0x117   :  { %5046 = vmatprep.subr.bf16.mxu1 %v8123_v54  ;;  %5078 = vmatprep.subr.bf16.mxu0 %v7716_v30 }
 0x11a   :  { %5048 = vmatpush1.bf16.msra.mxu1 %v8127_v16  ;;  %5080 = vmatpush1.bf16.msra.mxu0 %v7725_v35 }
 0x11b   :  { %5050 = vmatprep.subr.bf16.mxu1 %v8131_v59  ;;  %5082 = vmatprep.subr.bf16.mxu0 %v7728_v36 }
 0x11e   :  { %5052 = vmatpush1.bf16.msra.mxu1 %v8135_v10  ;;  %5084 = vmatpush1.bf16.msra.mxu0 %v7737_v44 }
 0x11f   :  { %5118 = vmatprep.subr.bf16.mxu1 %v7667_v8  ;;  %5086 = vmatprep.subr.bf16.mxu0 %v7740_v51 }
 0x121   :  { %1783 = vmatmul.mubr.f32.vlgmr.msra.gmra.mrb[24].mxu1 %v9662_v53  ;;  %v9755_v53 = vld [vmem:[#allocation53_spill] sm:$0xff] }
 0x122   :  { %5120 = vmatpush1.bf16.msra.mxu1 %v7751_v61  ;;  %5088 = vmatpush1.bf16.msra.mxu0 %v7749_v60 }
 0x123   :  { %5122 = vmatprep.subr.bf16.mxu1 %v7756_v4  ;;  %5090 = vmatprep.subr.bf16.mxu0 %v7754_v3 }
 0x126   :  { %5124 = vmatpush1.bf16.msra.mxu1 %v7765_v17  ;;  %5092 = vmatpush1.bf16.msra.mxu0 %v7763_v14  ;;  %v9774_v14 = vld [vmem:[#allocation84_spill] sm:$0xff] }
 0x127   :  { %5126 = vmatprep.subr.bf16.mxu1 %v7771_v25  ;;  %5094 = vmatprep.subr.bf16.mxu0 %v7769_v20  ;;  %v9773_v20 = vld [vmem:[#allocation82_spill] sm:$0xff] }
 0x12a   :  { %5128 = vmatpush1.bf16.msra.mxu1 %v7780_v34  ;;  %5096 = vmatpush1.bf16.msra.mxu0 %v7778_v33  ;;  %v9771_v33 = vld [vmem:[#allocation78_spill] sm:$0xff] }
 0x12b   :  { %5130 = vmatprep.subr.bf16.mxu1 %v7786_v43  ;;  %5098 = vmatprep.subr.bf16.mxu0 %v7784_v42  ;;  %v9769_v42 = vld [vmem:[#allocation74_spill] sm:$0xff] }
 0x12e   :  { %5132 = vmatpush1.bf16.msra.mxu1 %v7795_v58  ;;  %5100 = vmatpush1.bf16.msra.mxu0 %v7793_v57  ;;  %v9767_v57 = vld [vmem:[#allocation70_spill] sm:$0xff] }
 0x12f   :  { %5134 = vmatprep.subr.bf16.mxu1 %v7801_v5  ;;  %5102 = vmatprep.subr.bf16.mxu0 %v7799_v63  ;;  %v9765_v63 = vld [vmem:[#allocation66_spill] sm:$0xff] }
 0x132   :  { %5136 = vmatpush1.bf16.msra.mxu1 %v7810_v19  ;;  %5104 = vmatpush1.bf16.msra.mxu0 %v7808_v18  ;;  %v9763_v18 = vld [vmem:[#allocation62_spill] sm:$0xff] }
 0x133   :  { %5138 = vmatprep.subr.bf16.mxu1 %v7816_v28  ;;  %5106 = vmatprep.subr.bf16.mxu0 %v7814_v27  ;;  %v9761_v27 = vld [vmem:[#allocation59_spill] sm:$0xff] }
 0x136   :  { %5140 = vmatpush1.bf16.msra.mxu1 %v7825_v48  ;;  %5108 = vmatpush1.bf16.msra.mxu0 %v7823_v38  ;;  %v9762_v38 = vld [vmem:[#allocation60_spill] sm:$0xff] }
 0x137   :  { %5142 = vmatprep.subr.bf16.mxu1 %v9753_v1  ;;  %5110 = vmatprep.subr.bf16.mxu0 %v9754_v9  ;;  %v9764_v9 = vld [vmem:[#allocation64_spill] sm:$0xff] }
 0x13a   :  { %5144 = vmatpush1.bf16.msra.mxu1 %v9755_v53  ;;  %5112 = vmatpush1.bf16.msra.mxu0 %v9756_v11  ;;  %v9766_v11 = vld [vmem:[#allocation68_spill] sm:$0xff] }
 0x13b   :  { %5146 = vmatprep.subr.bf16.mxu1 %v7846_v49  ;;  %5114 = vmatprep.subr.bf16.mxu0 %v9757_v31  ;;  %v9768_v31 = vld [vmem:[#allocation72_spill] sm:$0xff] }
 0x13e   :  { %5148 = vmatpush1.bf16.msra.mxu1 %v9758_v2  ;;  %5116 = vmatpush1.bf16.msra.mxu0 %v9759_v26  ;;  %v9770_v26 = vld [vmem:[#allocation76_spill] sm:$0xff] }
 0x13f   :  { %5150 = vmatprep.subr.bf16.mxu1 %v9760_v55  ;;  %5182 = vmatprep.subr.bf16.mxu0 %v9761_v27  ;;  %v9772_v27 = vld [vmem:[#allocation80_spill] sm:$0xff] }
 0x142   :  { %5152 = vmatpush1.bf16.msra.mxu1 %v9762_v38 }
 0x143   :  { %5154 = vmatprep.subr.bf16.mxu1 %v9763_v18  ;;  %v1185_v18 = vlaneseq }
 0x146   :  { %5156 = vmatpush1.bf16.msra.mxu1 %v9764_v9  ;;  %v9775_v9 = vld [vmem:[#allocation86_spill] sm:$0xff] }
 0x147   :  { %5158 = vmatprep.subr.bf16.mxu1 %v9765_v63  ;;  %v9776_v63 = vld [vmem:[#allocation88_spill] sm:$0xff] }
 0x14a   :  { %5160 = vmatpush1.bf16.msra.mxu1 %v9766_v11  ;;  %v9777_v11 = vld [vmem:[#allocation91_spill] sm:$0xff] }
 0x14b   :  { %5162 = vmatprep.subr.bf16.mxu1 %v9767_v57 }
 0x14e   :  { %5164 = vmatpush1.bf16.msra.mxu1 %v9768_v31 }
 0x14f   :  { %5166 = vmatprep.subr.bf16.mxu1 %v9769_v42  ;;  %v1186_v42 = vshrl.u32 %v1185_v18, 7 }
 0x151   :  { %v1187_v3 = vsub.s32 0, %v1186_v42  ;;  %v1199_v38 = vsub.s32 3, %v1186_v42  ;;  %v1207_v35 = vsub.s32 5, %v1186_v42 }
 0x152   :  { %5168 = vmatpush1.bf16.msra.mxu1 %v9770_v26  ;;  %v1195_v26 = vsub.s32 2, %v1186_v42 }
 0x153   :  { %5170 = vmatprep.subr.bf16.mxu1 %v9771_v33  ;;  %v1183_v33 = vld [vmem:[%s9318_s4] sm:$0xff] }
 0x154   :  { %v8196_v60 = vrot.slane %v1183_v33, %v1187_v3 }
 0x156   :  { %5172 = vmatpush1.bf16.msra.mxu1 %v9772_v27  ;;  %v1191_v27 = vsub.s32 1, %v1186_v42  ;;  %9778 = vst [vmem:[#allocation146_spill] sm:$0xff] %v8196_v60 }
 0x157   :  { %5174 = vmatprep.subr.bf16.mxu1 %v9773_v20 }
 0x15a   :  { %5176 = vmatpush1.bf16.msra.mxu1 %v9774_v14 }
 0x15b   :  { %5178 = vmatprep.subr.bf16.mxu1 %v9775_v9  ;;  %v8198_v9 = vrot.slane %v1183_v33, %v1191_v27 }
 0x15d   :  { %9779 = vst [vmem:[#allocation147_spill] sm:$0xff] %v8198_v9 }
 0x15e   :  { %5180 = vmatpush1.bf16.msra.mxu1 %v9776_v63  ;;  %v8200_v63 = vrot.slane %v1183_v33, %v1195_v26 }
 0x15f   :  { %5246 = vmatprep.subr.bf16.mxu1 %v9777_v11  ;;  %v8202_v11 = vrot.slane %v1183_v33, %v1199_v38  ;;  %v1203_v38 = vsub.s32 4, %v1186_v42 }
 0x160   :  { %9780 = vst [vmem:[#allocation148_spill] sm:$0xff] %v8200_v63 }
 0x161   :  { %9781 = vst [vmem:[#allocation149_spill] sm:$0xff] %v8202_v11 }
 0x194   :  { %v1571_v57 = vpop.f32.mrb[0].mxu0 }
 0x195   :  { %v1573_v31 = vpop.f32.mrb[1].mxu0  ;;  %v1797_v18 = vadd.f32 %v1571_v57, %v8196_v60 }
 0x196   :  { %v1798_v55 = vadd.f32 %v1573_v31, %v8198_v9 }
 0x197   :  { %v4649_v44 = vmul.f32 -1.442695, %v1797_v18  ;;  %v8210_v18 = vrot.slane %v1183_v33, %v1207_v35 }
 0x198   :  { %v4650_v49 = vmul.f32 -1.442695, %v1798_v55 }
 0x199   :  { %7014 = vpow2.f32 %v4649_v44  ;;  %9783 = vst [vmem:[#allocation151_spill] sm:$0xff] %v8210_v18 }
 0x19a   :  { %7016 = vpow2.f32 %v4650_v49 }
 0x1a3   :  { %v7015_v3 = vpop.eup %7014 }
 0x1a4   :  { %v7017_v27 = vpop.eup %7016  ;;  %v1811_v60 = vadd.f32 1.0, %v7015_v3 }
 0x1a5   :  { %v1812_v31 = vadd.f32 1.0, %v7017_v27 }
 0x1b4   :  { %v1642_v20 = vpop.f32.mrb[8].mxu1 }
 0x1b5   :  { %v1644_v14 = vpop.f32.mrb[9].mxu1  ;;  %v1799_v51 = vadd.f32 %v1642_v20, %v8200_v63  ;;  %v8208_v20 = vrot.slane %v1183_v33, %v1203_v38 }
 0x1b6   :  { %v1800_v2 = vadd.f32 %v1644_v14, %v8202_v11 }
 0x1b7   :  { %v4651_v36 = vmul.f32 -1.442695, %v1799_v51  ;;  %9782 = vst [vmem:[#allocation150_spill] sm:$0xff] %v8208_v20 }
 0x1b8   :  { %v4652_v53 = vmul.f32 -1.442695, %v1800_v2 }
 0x1b9   :  { %7018 = vpow2.f32 %v4651_v36 }
 0x1ba   :  { %7020 = vpow2.f32 %v4652_v53 }
 0x1bb   :  { %7022 = vrcp.f32 %v1811_v60 }
 0x1bc   :  { %7024 = vrcp.f32 %v1812_v31 }
 0x1c3   :  { %v7019_v26 = vpop.eup %7018 }
 0x1c4   :  { %v7021_v57 = vpop.eup %7020  ;;  %v1823_v9 = vadd.f32 1.0, %v7019_v26 }
 0x1c5   :  { %v1824_v14 = vadd.f32 1.0, %v7021_v57  ;;  %v7023_v53 = vpop.eup %7022 }
 0x1c6   :  { %7026 = vrcp.f32 %v1823_v9  ;;  %v7025_v2 = vpop.eup %7024 }
 0x1c7   :  { %7028 = vrcp.f32 %v1824_v14  ;;  %v1215_v14 = vsub.s32 7, %v1186_v42 }
 0x1d0   :  { %v7027_v55 = vpop.eup %7026 }
 0x1d1   :  { %v7029_v3 = vpop.eup %7028  ;;  %v1843_v35 = vmul.f32 0.0, %v7027_v55 }
 0x1d2   :  { %v1844_v60 = vmul.f32 0.0, %v7029_v3 }
 0x1d4   :  { %v1713_v44 = vpop.f32.mrb[8].mxu0 }
 0x1d5   :  { %v1801_v36 = vadd.f32 %v1713_v44, %v8208_v20  ;;  %v1715_v51 = vpop.f32.mrb[9].mxu0  ;;  %v1211_v44 = vsub.s32 6, %v1186_v42 }
 0x1d6   :  { %v1802_v49 = vadd.f32 %v1715_v51, %v8210_v18 }
 0x1d7   :  { %7030 = vtanh.f32 %v1801_v36  ;;  %v8218_v20 = vrot.slane %v1183_v33, %v1211_v44  ;;  %v8220_v36 = vrot.slane %v1183_v33, %v1215_v14  ;;  %v9787_v44 = vld [vmem:[#allocation63_spill] sm:$0xff] }
 0x1d8   :  { %7032 = vtanh.f32 %v1802_v49  ;;  %v9788_v14 = vld [vmem:[#allocation95_spill] sm:$0xff] }
 0x1d9   :  { %9784 = vst [vmem:[#allocation152_spill] sm:$0xff] %v8218_v20 }
 0x1e1   :  { %v7031_v27 = vpop.eup %7030 }
 0x1e2   :  { %v7033_v38 = vpop.eup %7032  ;;  %v1845_v26 = vmul.f32 %v7031_v27, %v7023_v53 }
 0x1e3   :  { %v1846_v57 = vmul.f32 %v7033_v38, %v7025_v2 }
 0x1e4   :  { %v8214_v31 = vadd.f32 %v1845_v26, %v1843_v35 }
 0x1e5   :  { %v8216_v9 = vadd.f32 %v1846_v57, %v1844_v60  ;;  %v9786_v57 = vld [vmem:[#allocation93_spill] sm:$0xff] }
 0x1f4   :  { %v1784_v51 = vpop.f32.mrb[24].mxu1 }
 0x1f5   :  { %v1803_v49 = vadd.f32 %v1784_v51, %v8218_v20  ;;  %v1786_v18 = vpop.f32.mrb[25].mxu1  ;;  %v9789_v51 = vld [vmem:[#allocation65_spill] sm:$0xff] }
 0x1f6   :  { %v1804_v11 = vadd.f32 %v1786_v18, %v8220_v36 }
 0x1f7   :  { %v4653_v55 = vmul.f32 -1.442695, %v1803_v49  ;;  %v9790_v49 = vld [vmem:[#allocation97_spill] sm:$0xff] }
 0x1f8   :  { %v4654_v53 = vmul.f32 -1.442695, %v1804_v11  ;;  %v9785_v11 = vld [vmem:[#allocation61_spill] sm:$0xff] }
 0x1f9   :  { %7034 = vpow2.f32 %v4653_v55  ;;  %v9791_v55 = vld [vmem:[#allocation67_spill] sm:$0xff] }
 0x1fa   :  { %7036 = vpow2.f32 %v4654_v53  ;;  %v9792_v53 = vld [vmem:[#allocation99_spill] sm:$0xff] }
 0x1fb   :  { %7038 = vtanh.f32 %v8216_v9 }
 0x203   :  { %v7035_v2 = vpop.eup %7034 }
 0x204   :  { %v7037_v3 = vpop.eup %7036  ;;  %v1837_v27 = vadd.f32 1.0, %v7035_v2  ;;  %v9793_v2 = vld [vmem:[#allocation69_spill] sm:$0xff] }
 0x205   :  { %v1838_v42 = vadd.f32 1.0, %v7037_v3  ;;  %v7039_v33 = vpop.eup %7038  ;;  %v9794_v3 = vld [vmem:[#allocation101_spill] sm:$0xff] }
 0x206   :  { %7040 = vrcp.f32 %v1837_v27  ;;  %v9795_v27 = vld [vmem:[#allocation71_spill] sm:$0xff] }
 0x207   :  { %7042 = vrcp.f32 %v1838_v42  ;;  %v9796_v42 = vld [vmem:[#allocation103_spill] sm:$0xff] }
 0x208   :  { %7044 = vtanh.f32 %v8214_v31 }
 0x210   :  { %v7041_v38 = vpop.eup %7040 }
 0x211   :  { %v7043_v35 = vpop.eup %7042 }
 0x212   :  { %v7045_v26 = vpop.eup %7044  ;;  %v1852_v60 = vmul.f32 %v7043_v35, %v7039_v33  ;;  %v9797_v33 = vld [vmem:[#allocation73_spill] sm:$0xff]  ;;  %v9799_v35 = vld [vmem:[#allocation75_spill] sm:$0xff] }
 0x213   :  { %v8226_v18 = vmul.f32 %v7045_v26, %v7041_v38  ;;  %v9798_v38 = vld [vmem:[#allocation105_spill] sm:$0xff]  ;;  %v9800_v26 = vld [vmem:[#allocation107_spill] sm:$0xff] }
 0x214   :  { %1941 = vmatprep.mubr.f32.mxu0 %v1852_v60  ;;  %2012 = vmatprep.mubr.f32.mxu1 %v1852_v60 }
 0x215   :  { %1942 = vmatmul.mubr.f32.vlgmr.msra.gmra.mrb[2].mxu0 %v8226_v18  ;;  %2013 = vmatmul.mubr.f32.vlgmr.msra.gmra.mrb[10].mxu1 %v8226_v18 }
 0x216   :  { %5184 = vmatpush1.bf16.msra.mxu0 %v9785_v11  ;;  %5248 = vmatpush1.bf16.msra.mxu1 %v9786_v57 }
 0x217   :  { %2083 = vmatprep.mubr.f32.mxu0 %v1852_v60  ;;  %2154 = vmatprep.mubr.f32.mxu1 %v1852_v60  ;;  %v9801_v60 = vld [vmem:[#allocation77_spill] sm:$0xff] }
 0x218   :  { %5186 = vmatprep.subr.bf16.mxu0 %v9787_v44  ;;  %5250 = vmatprep.subr.bf16.mxu1 %v9788_v14 }
 0x21a   :  { %5188 = vmatpush1.bf16.msra.mxu0 %v9789_v51  ;;  %5252 = vmatpush1.bf16.msra.mxu1 %v9790_v49 }
 0x21b   :  { %5190 = vmatprep.subr.bf16.mxu0 %v9791_v55  ;;  %5254 = vmatprep.subr.bf16.mxu1 %v9792_v53  ;;  %v9802_v55 = vld [vmem:[#allocation109_spill] sm:$0xff]  ;;  %v9803_v53 = vld [vmem:[#allocation79_spill] sm:$0xff] }
 0x21e   :  { %5192 = vmatpush1.bf16.msra.mxu0 %v9793_v2  ;;  %5256 = vmatpush1.bf16.msra.mxu1 %v9794_v3  ;;  %v9804_v3 = vld [vmem:[#allocation81_spill] sm:$0xff] }
 0x21f   :  { %5194 = vmatprep.subr.bf16.mxu0 %v9795_v27  ;;  %5258 = vmatprep.subr.bf16.mxu1 %v9796_v42  ;;  %v9805_v42 = vld [vmem:[#allocation83_spill] sm:$0xff] }
 0x222   :  { %5196 = vmatpush1.bf16.msra.mxu0 %v9797_v33  ;;  %5260 = vmatpush1.bf16.msra.mxu1 %v9798_v38  ;;  %v9806_v38 = vld [vmem:[#allocation85_spill] sm:$0xff] }
 0x223   :  { %5198 = vmatprep.subr.bf16.mxu0 %v9799_v35  ;;  %5262 = vmatprep.subr.bf16.mxu1 %v9800_v26  ;;  %v9807_v26 = vld [vmem:[#allocation87_spill] sm:$0xff] }
 0x226   :  { %5200 = vmatpush1.bf16.msra.mxu0 %v9801_v60  ;;  %5264 = vmatpush1.bf16.msra.mxu1 %v9802_v55  ;;  %v9808_v55 = vld [vmem:[#allocation89_spill] sm:$0xff] }
 0x227   :  { %5202 = vmatprep.subr.bf16.mxu0 %v9803_v53  ;;  %5266 = vmatprep.subr.bf16.mxu1 %v8025_v40  ;;  %v9809_v40 = vld [vmem:[#allocation90_spill] sm:$0xff] }
 0x22a   :  { %5204 = vmatpush1.bf16.msra.mxu0 %v9804_v3  ;;  %5268 = vmatpush1.bf16.msra.mxu1 %v8031_v41  ;;  %v9810_v41 = vld [vmem:[#allocation92_spill] sm:$0xff] }
 0x22b   :  { %5206 = vmatprep.subr.bf16.mxu0 %v9805_v42  ;;  %5270 = vmatprep.subr.bf16.mxu1 %v8037_v45  ;;  %v9811_v45 = vld [vmem:[#allocation94_spill] sm:$0xff] }
 0x22e   :  { %5208 = vmatpush1.bf16.msra.mxu0 %v9806_v38  ;;  %5272 = vmatpush1.bf16.msra.mxu1 %v8043_v47  ;;  %v9812_v47 = vld [vmem:[#allocation96_spill] sm:$0xff] }
 0x22f   :  { %5210 = vmatprep.subr.bf16.mxu0 %v9807_v26  ;;  %5274 = vmatprep.subr.bf16.mxu1 %v8049_v21  ;;  %v9813_v21 = vld [vmem:[#allocation98_spill] sm:$0xff] }
 0x232   :  { %5212 = vmatpush1.bf16.msra.mxu0 %v9808_v55  ;;  %5276 = vmatpush1.bf16.msra.mxu1 %v8055_v56  ;;  %v9814_v56 = vld [vmem:[#allocation100_spill] sm:$0xff] }
 0x233   :  { %5214 = vmatprep.subr.bf16.mxu0 %v9809_v40  ;;  %5278 = vmatprep.subr.bf16.mxu1 %v8059_v46  ;;  %v9815_v46 = vld [vmem:[#allocation102_spill] sm:$0xff] }
 0x236   :  { %5216 = vmatpush1.bf16.msra.mxu0 %v9810_v41  ;;  %5280 = vmatpush1.bf16.msra.mxu1 %v8063_v12  ;;  %v9816_v12 = vld [vmem:[#allocation104_spill] sm:$0xff] }
 0x237   :  { %5218 = vmatprep.subr.bf16.mxu0 %v9811_v45  ;;  %5282 = vmatprep.subr.bf16.mxu1 %v8066_v0  ;;  %v9817_v0 = vld [vmem:[#allocation106_spill] sm:$0xff] }
 0x23a   :  { %5220 = vmatpush1.bf16.msra.mxu0 %v9812_v47  ;;  %5284 = vmatpush1.bf16.msra.mxu1 %v8071_v32  ;;  %v9818_v32 = vld [vmem:[#allocation108_spill] sm:$0xff] }
 0x23b   :  { %5222 = vmatprep.subr.bf16.mxu0 %v9813_v21  ;;  %5286 = vmatprep.subr.bf16.mxu1 %v8075_v7  ;;  %v9819_v7 = vld [vmem:[#allocation110_spill] sm:$0xff] }
 0x23e   :  { %5224 = vmatpush1.bf16.msra.mxu0 %v9814_v56  ;;  %5288 = vmatpush1.bf16.msra.mxu1 %v8083_v6  ;;  %v9820_v6 = vld [vmem:[#allocation112_spill] sm:$0xff] }
 0x23f   :  { %5226 = vmatprep.subr.bf16.mxu0 %v9815_v46  ;;  %5290 = vmatprep.subr.bf16.mxu1 %v8087_v50 }
 0x242   :  { %5228 = vmatpush1.bf16.msra.mxu0 %v9816_v12  ;;  %5292 = vmatpush1.bf16.msra.mxu1 %v8095_v62  ;;  %v9821_v62 = vld [vmem:[#allocation116_spill] sm:$0xff] }
 0x243   :  { %5230 = vmatprep.subr.bf16.mxu0 %v9817_v0  ;;  %5294 = vmatprep.subr.bf16.mxu1 %v8099_v37  ;;  %v9822_v37 = vld [vmem:[#allocation118_spill] sm:$0xff] }
 0x246   :  { %5232 = vmatpush1.bf16.msra.mxu0 %v9818_v32  ;;  %5296 = vmatpush1.bf16.msra.mxu1 %v8107_v39  ;;  %v9823_v39 = vld [vmem:[#allocation120_spill] sm:$0xff] }
 0x247   :  { %5234 = vmatprep.subr.bf16.mxu0 %v9819_v7  ;;  %5298 = vmatprep.subr.bf16.mxu1 %v8111_v52  ;;  %v9824_v52 = vld [vmem:[#allocation10_spill] sm:$0xff] }
 0x24a   :  { %5236 = vmatpush1.bf16.msra.mxu0 %v9820_v6  ;;  %5300 = vmatpush1.bf16.msra.mxu1 %v8119_v23 }
 0x24b   :  { %5238 = vmatprep.subr.bf16.mxu0 %v8035_v13  ;;  %5302 = vmatprep.subr.bf16.mxu1 %v8123_v54  ;;  %v9825_v54 = vld [vmem:[#allocation11_spill] sm:$0xff] }
 0x24e   :  { %5240 = vmatpush1.bf16.msra.mxu0 %v9821_v62  ;;  %5304 = vmatpush1.bf16.msra.mxu1 %v8127_v16  ;;  %v9826_v16 = vld [vmem:[#allocation12_spill] sm:$0xff] }
 0x24f   :  { %5242 = vmatprep.subr.bf16.mxu0 %v9822_v37  ;;  %5306 = vmatprep.subr.bf16.mxu1 %v8131_v59  ;;  %v9827_v59 = vld [vmem:[#allocation13_spill] sm:$0xff] }
 0x252   :  { %5244 = vmatpush1.bf16.msra.mxu0 %v9823_v39  ;;  %5308 = vmatpush1.bf16.msra.mxu1 %v8135_v10  ;;  %v9828_v10 = vld [vmem:[#allocation14_spill] sm:$0xff] }
 0x253   :  { %5310 = vmatprep.subr.bf16.mxu0 %v9824_v52  ;;  %5374 = vmatprep.subr.bf16.mxu1 %v7667_v8  ;;  %v9829_v8 = vld [vmem:[#allocation16_spill] sm:$0xff] }
 0x255   :  { %2084 = vmatmul.mubr.f32.vlgmr.msra.gmra.mrb[10].mxu0 %v8226_v18  ;;  %2155 = vmatmul.mubr.f32.vlgmr.msra.gmra.mrb[26].mxu1 %v8226_v18  ;;  %v9830_v18 = vld [vmem:[#allocation17_spill] sm:$0xff] }
 0x256   :  { %5312 = vmatpush1.bf16.msra.mxu0 %v9825_v54  ;;  %5376 = vmatpush1.bf16.msra.mxu1 %v7751_v61 }
 0x257   :  { %5314 = vmatprep.subr.bf16.mxu0 %v9826_v16  ;;  %5378 = vmatprep.subr.bf16.mxu1 %v7756_v4  ;;  %v9831_v4 = vld [vmem:[#allocation19_spill] sm:$0xff] }
 0x25a   :  { %5316 = vmatpush1.bf16.msra.mxu0 %v9827_v59  ;;  %5380 = vmatpush1.bf16.msra.mxu1 %v7765_v17 }
 0x25b   :  { %5318 = vmatprep.subr.bf16.mxu0 %v9828_v10  ;;  %5382 = vmatprep.subr.bf16.mxu1 %v7771_v25 }
 0x25e   :  { %5320 = vmatpush1.bf16.msra.mxu0 %v9829_v8  ;;  %5384 = vmatpush1.bf16.msra.mxu1 %v7780_v34  ;;  %v9874_v34 = vld [vmem:[#allocation149_spill] sm:$0xff] }
 0x25f   :  { %5322 = vmatprep.subr.bf16.mxu0 %v9830_v18  ;;  %5386 = vmatprep.subr.bf16.mxu1 %v7786_v43  ;;  %v9872_v43 = vld [vmem:[#allocation146_spill] sm:$0xff]  ;;  %v9873_v18 = vld [vmem:[#allocation147_spill] sm:$0xff] }
 0x262   :  { %5324 = vmatpush1.bf16.msra.mxu0 %v7689_v15  ;;  %5388 = vmatpush1.bf16.msra.mxu1 %v7795_v58  ;;  %v9832_v58 = vld [vmem:[#allocation24_spill] sm:$0xff] }
 0x263   :  { %5326 = vmatprep.subr.bf16.mxu0 %v9831_v4  ;;  %5390 = vmatprep.subr.bf16.mxu1 %v7801_v5  ;;  %v9833_v4 = vld [vmem:[#allocation53_spill] sm:$0xff] }
 0x264   :  { %v9834_v5 = vld [vmem:[#allocation25_spill] sm:$0xff] }
 0x266   :  { %5328 = vmatpush1.bf16.msra.mxu0 %v7701_v22  ;;  %5392 = vmatpush1.bf16.msra.mxu1 %v7810_v19  ;;  %v9835_v22 = vld [vmem:[#allocation55_spill] sm:$0xff]  ;;  %v9836_v19 = vld [vmem:[#allocation26_spill] sm:$0xff] }
 0x267   :  { %5330 = vmatprep.subr.bf16.mxu0 %v7704_v24  ;;  %5394 = vmatprep.subr.bf16.mxu1 %v7816_v28  ;;  %v9837_v24 = vld [vmem:[#allocation57_spill] sm:$0xff]  ;;  %v9838_v28 = vld [vmem:[#allocation27_spill] sm:$0xff] }
 0x26a   :  { %5332 = vmatpush1.bf16.msra.mxu0 %v7713_v29  ;;  %5396 = vmatpush1.bf16.msra.mxu1 %v7825_v48  ;;  %v9839_v29 = vld [vmem:[#allocation58_spill] sm:$0xff]  ;;  %v9840_v48 = vld [vmem:[#allocation28_spill] sm:$0xff] }
 0x26b   :  { %5334 = vmatprep.subr.bf16.mxu0 %v7716_v30  ;;  %5398 = vmatprep.subr.bf16.mxu1 %v9753_v1  ;;  %v9841_v30 = vld [vmem:[#allocation60_spill] sm:$0xff]  ;;  %v9842_v1 = vld [vmem:[#allocation30_spill] sm:$0xff] }
 0x26e   :  { %5336 = vmatpush1.bf16.msra.mxu0 %v9832_v58  ;;  %5400 = vmatpush1.bf16.msra.mxu1 %v9833_v4  ;;  %v9843_v58 = vld [vmem:[#allocation62_spill] sm:$0xff]  ;;  %v9844_v4 = vld [vmem:[#allocation32_spill] sm:$0xff] }
 0x26f   :  { %5338 = vmatprep.subr.bf16.mxu0 %v9834_v5  ;;  %5402 = vmatprep.subr.bf16.mxu1 %v9835_v22  ;;  %v9845_v5 = vld [vmem:[#allocation64_spill] sm:$0xff]  ;;  %v9846_v22 = vld [vmem:[#allocation34_spill] sm:$0xff] }
 0x272   :  { %5340 = vmatpush1.bf16.msra.mxu0 %v9836_v19  ;;  %5404 = vmatpush1.bf16.msra.mxu1 %v9837_v24  ;;  %v9847_v19 = vld [vmem:[#allocation66_spill] sm:$0xff]  ;;  %v9848_v24 = vld [vmem:[#allocation36_spill] sm:$0xff] }
 0x273   :  { %5342 = vmatprep.subr.bf16.mxu0 %v9838_v28  ;;  %5406 = vmatprep.subr.bf16.mxu1 %v9839_v29  ;;  %v9849_v28 = vld [vmem:[#allocation68_spill] sm:$0xff]  ;;  %v9850_v29 = vld [vmem:[#allocation38_spill] sm:$0xff] }
 0x276   :  { %5344 = vmatpush1.bf16.msra.mxu0 %v9840_v48  ;;  %5408 = vmatpush1.bf16.msra.mxu1 %v9841_v30  ;;  %v9851_v48 = vld [vmem:[#allocation70_spill] sm:$0xff]  ;;  %v9852_v30 = vld [vmem:[#allocation40_spill] sm:$0xff] }
 0x277   :  { %5346 = vmatprep.subr.bf16.mxu0 %v9842_v1  ;;  %5410 = vmatprep.subr.bf16.mxu1 %v9843_v58  ;;  %v9853_v1 = vld [vmem:[#allocation72_spill] sm:$0xff]  ;;  %v9854_v58 = vld [vmem:[#allocation42_spill] sm:$0xff] }
 0x27a   :  { %5348 = vmatpush1.bf16.msra.mxu0 %v9844_v4  ;;  %5412 = vmatpush1.bf16.msra.mxu1 %v9845_v5  ;;  %v9855_v4 = vld [vmem:[#allocation74_spill] sm:$0xff]  ;;  %v9856_v5 = vld [vmem:[#allocation44_spill] sm:$0xff] }
 0x27b   :  { %5350 = vmatprep.subr.bf16.mxu0 %v9846_v22  ;;  %5414 = vmatprep.subr.bf16.mxu1 %v9847_v19  ;;  %v9857_v22 = vld [vmem:[#allocation76_spill] sm:$0xff]  ;;  %v9858_v19 = vld [vmem:[#allocation46_spill] sm:$0xff] }
 0x27e   :  { %5352 = vmatpush1.bf16.msra.mxu0 %v9848_v24  ;;  %5416 = vmatpush1.bf16.msra.mxu1 %v9849_v28  ;;  %v9859_v24 = vld [vmem:[#allocation78_spill] sm:$0xff]  ;;  %v9860_v28 = vld [vmem:[#allocation48_spill] sm:$0xff] }
 0x27f   :  { %5354 = vmatprep.subr.bf16.mxu0 %v9850_v29  ;;  %5418 = vmatprep.subr.bf16.mxu1 %v9851_v48  ;;  %v9861_v29 = vld [vmem:[#allocation80_spill] sm:$0xff]  ;;  %v9862_v48 = vld [vmem:[#allocation50_spill] sm:$0xff] }
 0x282   :  { %5356 = vmatpush1.bf16.msra.mxu0 %v9852_v30  ;;  %5420 = vmatpush1.bf16.msra.mxu1 %v9853_v1  ;;  %v9863_v30 = vld [vmem:[#allocation82_spill] sm:$0xff]  ;;  %v9864_v1 = vld [vmem:[#allocation52_spill] sm:$0xff] }
 0x283   :  { %5358 = vmatprep.subr.bf16.mxu0 %v9854_v58  ;;  %5422 = vmatprep.subr.bf16.mxu1 %v9855_v4  ;;  %v9865_v58 = vld [vmem:[#allocation84_spill] sm:$0xff]  ;;  %v9866_v4 = vld [vmem:[#allocation54_spill] sm:$0xff] }
 0x286   :  { %5360 = vmatpush1.bf16.msra.mxu0 %v9856_v5  ;;  %5424 = vmatpush1.bf16.msra.mxu1 %v9857_v22  ;;  %v9867_v5 = vld [vmem:[#allocation86_spill] sm:$0xff]  ;;  %v9868_v22 = vld [vmem:[#allocation56_spill] sm:$0xff] }
 0x287   :  { %5362 = vmatprep.subr.bf16.mxu0 %v9858_v19  ;;  %5426 = vmatprep.subr.bf16.mxu1 %v9859_v24  ;;  %v9869_v19 = vld [vmem:[#allocation88_spill] sm:$0xff]  ;;  %v9870_v24 = vld [vmem:[#allocation59_spill] sm:$0xff] }
 0x28a   :  { %5364 = vmatpush1.bf16.msra.mxu0 %v9860_v28  ;;  %5428 = vmatpush1.bf16.msra.mxu1 %v9861_v29  ;;  %v9871_v28 = vld [vmem:[#allocation91_spill] sm:$0xff] }
 0x28b   :  { %5366 = vmatprep.subr.bf16.mxu0 %v9862_v48  ;;  %5430 = vmatprep.subr.bf16.mxu1 %v9863_v30 }
 0x28e   :  { %5368 = vmatpush1.bf16.msra.mxu0 %v9864_v1  ;;  %5432 = vmatpush1.bf16.msra.mxu1 %v9865_v58 }
 0x28f   :  { %5370 = vmatprep.subr.bf16.mxu0 %v9866_v4  ;;  %5434 = vmatprep.subr.bf16.mxu1 %v9867_v5 }
 0x292   :  { %5372 = vmatpush1.bf16.msra.mxu0 %v9868_v22  ;;  %5436 = vmatpush1.bf16.msra.mxu1 %v9869_v19 }
 0x293   :  { %5438 = vmatprep.subr.bf16.mxu0 %v9870_v24  ;;  %5502 = vmatprep.subr.bf16.mxu1 %v9871_v28 }
 0x2e8   :  { %v1943_v29 = vpop.f32.mrb[2].mxu0  ;;  %v2014_v48 = vpop.f32.mrb[10].mxu1 }
 0x2e9   :  { %v1945_v15 = vpop.f32.mrb[3].mxu0  ;;  %v2016_v30 = vpop.f32.mrb[11].mxu1  ;;  %v2169_v1 = vadd.f32 %v1943_v29, %v9872_v43  ;;  %v2171_v58 = vadd.f32 %v2014_v48, %v8200_v63 }
 0x2ea   :  { %v2170_v4 = vadd.f32 %v1945_v15, %v9873_v18  ;;  %v2172_v5 = vadd.f32 %v2016_v30, %v9874_v34 }
 0x2eb   :  { %v4655_v8 = vmul.f32 -1.442695, %v2169_v1  ;;  %v4657_v22 = vmul.f32 -1.442695, %v2171_v58  ;;  %v9875_v58 = vld [vmem:[#allocation150_spill] sm:$0xff] }
 0x2ec   :  { %v4656_v25 = vmul.f32 -1.442695, %v2170_v4  ;;  %v4658_v19 = vmul.f32 -1.442695, %v2172_v5  ;;  %v9876_v5 = vld [vmem:[#allocation151_spill] sm:$0xff] }
 0x2ed   :  { %7046 = vpow2.f32 %v4655_v8 }
 0x2ee   :  { %7048 = vpow2.f32 %v4657_v22 }
 0x2ef   :  { %7050 = vpow2.f32 %v4656_v25 }
 0x2f0   :  { %7052 = vpow2.f32 %v4658_v19 }
 0x2f7   :  { %v7047_v28 = vpop.eup %7046 }
 0x2f8   :  { %v7049_v24 = vpop.eup %7048  ;;  %v2183_v59 = vadd.f32 1.0, %v7047_v28 }
 0x2f9   :  { %v7051_v10 = vpop.eup %7050  ;;  %v2195_v29 = vadd.f32 1.0, %v7049_v24 }
 0x2fa   :  { %v7053_v17 = vpop.eup %7052  ;;  %v2184_v43 = vadd.f32 1.0, %v7051_v10  ;;  %7054 = vrcp.f32 %v2183_v59 }
 0x2fb   :  { %v2196_v48 = vadd.f32 1.0, %v7053_v17  ;;  %7056 = vrcp.f32 %v2195_v29 }
 0x2fc   :  { %7058 = vrcp.f32 %v2184_v43 }
 0x2fd   :  { %7060 = vrcp.f32 %v2196_v48 }
 0x304   :  { %v7055_v28 = vpop.eup %7054 }
 0x305   :  { %v7057_v59 = vpop.eup %7056 }
 0x306   :  { %v7059_v43 = vpop.eup %7058 }
 0x307   :  { %v7061_v10 = vpop.eup %7060 }
 0x328   :  { %v2085_v15 = vpop.f32.mrb[10].mxu0  ;;  %v2156_v30 = vpop.f32.mrb[26].mxu1 }
 0x329   :  { %v2173_v4 = vadd.f32 %v2085_v15, %v9875_v58  ;;  %v2175_v8 = vadd.f32 %v2156_v30, %v8218_v20  ;;  %v2087_v22 = vpop.f32.mrb[11].mxu0  ;;  %v2158_v25 = vpop.f32.mrb[27].mxu1  ;;  %v2215_v30 = vmul.f32 %v7057_v59, %v8214_v31 }
 0x32a   :  { %v2174_v19 = vadd.f32 %v2087_v22, %v9876_v5  ;;  %v2176_v1 = vadd.f32 %v2158_v25, %v8220_v36  ;;  %v2216_v22 = vmul.f32 %v7061_v10, %v8216_v9  ;;  %v9880_v10 = vld [vmem:[#allocation103_spill] sm:$0xff] }
 0x32b   :  { %7062 = vtanh.f32 %v2173_v4  ;;  %v4659_v24 = vmul.f32 -1.442695, %v2175_v8 }
 0x32c   :  { %7064 = vtanh.f32 %v2174_v19  ;;  %v4660_v17 = vmul.f32 -1.442695, %v2176_v1 }
 0x32d   :  { %7066 = vpow2.f32 %v4659_v24 }
 0x32e   :  { %7068 = vpow2.f32 %v4660_v17 }
 0x335   :  { %v7063_v29 = vpop.eup %7062 }
 0x336   :  { %v7065_v15 = vpop.eup %7064  ;;  %v2217_v20 = vmul.f32 %v7063_v29, %v7055_v28  ;;  %v9881_v29 = vld [vmem:[#allocation105_spill] sm:$0xff] }
 0x337   :  { %v7067_v48 = vpop.eup %7066  ;;  %v2218_v5 = vmul.f32 %v7065_v15, %v7059_v43  ;;  %v9879_v43 = vld [vmem:[#allocation101_spill] sm:$0xff]  ;;  %v9882_v15 = vld [vmem:[#allocation107_spill] sm:$0xff] }
 0x338   :  { %v7069_v25 = vpop.eup %7068  ;;  %v8370_v4 = vadd.f32 %v2217_v20, %v2215_v30  ;;  %v2209_v8 = vadd.f32 1.0, %v7067_v48  ;;  %v9877_v20 = vld [vmem:[#allocation67_spill] sm:$0xff]  ;;  %v9883_v30 = vld [vmem:[#allocation109_spill] sm:$0xff] }
 0x339   :  { %v8372_v19 = vadd.f32 %v2218_v5, %v2216_v22  ;;  %v2210_v1 = vadd.f32 1.0, %v7069_v25  ;;  %v9878_v5 = vld [vmem:[#allocation99_spill] sm:$0xff]  ;;  %v9885_v22 = vld [vmem:[#allocation113_spill] sm:$0xff] }
 0x33a   :  { %7070 = vtanh.f32 %v8370_v4  ;;  %v9884_v48 = vld [vmem:[#allocation111_spill] sm:$0xff] }
 0x33b   :  { %7072 = vrcp.f32 %v2209_v8  ;;  %v9886_v25 = vld [vmem:[#allocation115_spill] sm:$0xff]  ;;  %v9887_v8 = vld [vmem:[#allocation117_spill] sm:$0xff] }
 0x33c   :  { %7074 = vtanh.f32 %v8372_v19 }
 0x33d   :  { %7076 = vrcp.f32 %v2210_v1  ;;  %v9888_v1 = vld [vmem:[#allocation119_spill] sm:$0xff] }
 0x344   :  { %v7071_v24 = vpop.eup %7070 }
 0x345   :  { %v7073_v31 = vpop.eup %7072 }
 0x346   :  { %v7075_v17 = vpop.eup %7074  ;;  %v8376_v9 = vmul.f32 %v7073_v31, %v7071_v24  ;;  %v9889_v24 = vld [vmem:[#allocation121_spill] sm:$0xff]  ;;  %v9890_v31 = vld [vmem:[#allocation122_spill] sm:$0xff] }
 0x347   :  { %v7077_v28 = vpop.eup %7076 }
 0x348   :  { %v2224_v59 = vmul.f32 %v7077_v28, %v7075_v17  ;;  %v9891_v17 = vld [vmem:[#allocation123_spill] sm:$0xff]  ;;  %v9892_v28 = vld [vmem:[#allocation124_spill] sm:$0xff] }
 0x34a   :  { %2313 = vmatprep.mubr.f32.mxu0 %v2224_v59  ;;  %2384 = vmatprep.mubr.f32.mxu1 %v2224_v59 }
 0x34b   :  { %2314 = vmatmul.mubr.f32.vlgmr.msra.gmra.mrb[4].mxu0 %v8376_v9  ;;  %2385 = vmatmul.mubr.f32.vlgmr.msra.gmra.mrb[12].mxu1 %v8376_v9 }
 0x34c   :  { %5440 = vmatpush1.bf16.msra.mxu0 %v9785_v11  ;;  %5504 = vmatpush1.bf16.msra.mxu1 %v9786_v57 }
 0x34d   :  { %2455 = vmatprep.mubr.f32.mxu0 %v2224_v59  ;;  %2526 = vmatprep.mubr.f32.mxu1 %v2224_v59  ;;  %v9893_v59 = vld [vmem:[#allocation125_spill] sm:$0xff] }
 0x34e   :  { %5442 = vmatprep.subr.bf16.mxu0 %v9787_v44  ;;  %5506 = vmatprep.subr.bf16.mxu1 %v9788_v14 }
 0x350   :  { %5444 = vmatpush1.bf16.msra.mxu0 %v9789_v51  ;;  %5508 = vmatpush1.bf16.msra.mxu1 %v9790_v49 }
 0x351   :  { %5446 = vmatprep.subr.bf16.mxu0 %v9877_v20  ;;  %5510 = vmatprep.subr.bf16.mxu1 %v9878_v5 }
 0x354   :  { %5448 = vmatpush1.bf16.msra.mxu0 %v9793_v2  ;;  %5512 = vmatpush1.bf16.msra.mxu1 %v9879_v43 }
 0x355   :  { %5450 = vmatprep.subr.bf16.mxu0 %v9795_v27  ;;  %5514 = vmatprep.subr.bf16.mxu1 %v9880_v10 }
 0x358   :  { %5452 = vmatpush1.bf16.msra.mxu0 %v9797_v33  ;;  %5516 = vmatpush1.bf16.msra.mxu1 %v9881_v29 }
 0x359   :  { %5454 = vmatprep.subr.bf16.mxu0 %v9799_v35  ;;  %5518 = vmatprep.subr.bf16.mxu1 %v9882_v15 }
 0x35c   :  { %5456 = vmatpush1.bf16.msra.mxu0 %v9801_v60  ;;  %5520 = vmatpush1.bf16.msra.mxu1 %v9883_v30 }
 0x35d   :  { %5458 = vmatprep.subr.bf16.mxu0 %v9803_v53  ;;  %5522 = vmatprep.subr.bf16.mxu1 %v9884_v48 }
 0x360   :  { %5460 = vmatpush1.bf16.msra.mxu0 %v9804_v3  ;;  %5524 = vmatpush1.bf16.msra.mxu1 %v9885_v22 }
 0x361   :  { %5462 = vmatprep.subr.bf16.mxu0 %v9805_v42  ;;  %5526 = vmatprep.subr.bf16.mxu1 %v9886_v25 }
 0x364   :  { %5464 = vmatpush1.bf16.msra.mxu0 %v9806_v38  ;;  %5528 = vmatpush1.bf16.msra.mxu1 %v9887_v8 }
 0x365   :  { %5466 = vmatprep.subr.bf16.mxu0 %v9807_v26  ;;  %5530 = vmatprep.subr.bf16.mxu1 %v9888_v1 }
 0x368   :  { %5468 = vmatpush1.bf16.msra.mxu0 %v9808_v55  ;;  %5532 = vmatpush1.bf16.msra.mxu1 %v9889_v24  ;;  %v9894_v55 = vld [vmem:[#allocation126_spill] sm:$0xff] }
 0x369   :  { %5470 = vmatprep.subr.bf16.mxu0 %v9809_v40  ;;  %5534 = vmatprep.subr.bf16.mxu1 %v9890_v31  ;;  %v9895_v40 = vld [vmem:[#allocation129_spill] sm:$0xff] }
 0x36c   :  { %5472 = vmatpush1.bf16.msra.mxu0 %v9810_v41  ;;  %5536 = vmatpush1.bf16.msra.mxu1 %v9891_v17 }
 0x36d   :  { %5474 = vmatprep.subr.bf16.mxu0 %v9811_v45  ;;  %5538 = vmatprep.subr.bf16.mxu1 %v9892_v28  ;;  %v9896_v45 = vld [vmem:[#allocation133_spill] sm:$0xff] }
 0x370   :  { %5476 = vmatpush1.bf16.msra.mxu0 %v9812_v47  ;;  %5540 = vmatpush1.bf16.msra.mxu1 %v9893_v59  ;;  %v9897_v47 = vld [vmem:[#allocation134_spill] sm:$0xff] }
 0x371   :  { %5478 = vmatprep.subr.bf16.mxu0 %v9813_v21  ;;  %5542 = vmatprep.subr.bf16.mxu1 %v9894_v55  ;;  %v9898_v21 = vld [vmem:[#allocation137_spill] sm:$0xff] }
 0x374   :  { %5480 = vmatpush1.bf16.msra.mxu0 %v9814_v56  ;;  %5544 = vmatpush1.bf16.msra.mxu1 %v9895_v40  ;;  %v9899_v56 = vld [vmem:[#allocation138_spill] sm:$0xff] }
 0x375   :  { %5482 = vmatprep.subr.bf16.mxu0 %v9815_v46  ;;  %5546 = vmatprep.subr.bf16.mxu1 %v8087_v50 }
 0x378   :  { %5484 = vmatpush1.bf16.msra.mxu0 %v9816_v12  ;;  %5548 = vmatpush1.bf16.msra.mxu1 %v9896_v45  ;;  %v9900_v12 = vld [vmem:[#allocation142_spill] sm:$0xff] }
 0x379   :  { %5486 = vmatprep.subr.bf16.mxu0 %v9817_v0  ;;  %5550 = vmatprep.subr.bf16.mxu1 %v9897_v47  ;;  %v9901_v0 = vld [vmem:[#allocation143_spill] sm:$0xff] }
 0x37c   :  { %5488 = vmatpush1.bf16.msra.mxu0 %v9818_v32  ;;  %5552 = vmatpush1.bf16.msra.mxu1 %v9898_v21  ;;  %v9902_v32 = vld [vmem:[#allocation144_spill] sm:$0xff] }
 0x37d   :  { %5490 = vmatprep.subr.bf16.mxu0 %v9819_v7  ;;  %5554 = vmatprep.subr.bf16.mxu1 %v9899_v56  ;;  %v9903_v7 = vld [vmem:[#allocation145_spill] sm:$0xff] }
 0x380   :  { %5492 = vmatpush1.bf16.msra.mxu0 %v9820_v6  ;;  %5556 = vmatpush1.bf16.msra.mxu1 %v8119_v23  ;;  %v9904_v6 = vld [vmem:[#allocation15_spill] sm:$0xff] }
 0x381   :  { %5494 = vmatprep.subr.bf16.mxu0 %v8035_v13  ;;  %5558 = vmatprep.subr.bf16.mxu1 %v9900_v12  ;;  %v9966_v12 = vld [vmem:[#allocation146_spill] sm:$0xff] }
 0x384   :  { %5496 = vmatpush1.bf16.msra.mxu0 %v9821_v62  ;;  %5560 = vmatpush1.bf16.msra.mxu1 %v9901_v0  ;;  %v9911_v0 = vld [vmem:[#allocation37_spill] sm:$0xff] }
 0x385   :  { %5498 = vmatprep.subr.bf16.mxu0 %v9822_v37  ;;  %5562 = vmatprep.subr.bf16.mxu1 %v9902_v32  ;;  %v9905_v37 = vld [vmem:[#allocation31_spill] sm:$0xff]  ;;  %v9906_v32 = vld [vmem:[#allocation13_spill] sm:$0xff] }
 0x388   :  { %5500 = vmatpush1.bf16.msra.mxu0 %v9823_v39  ;;  %5564 = vmatpush1.bf16.msra.mxu1 %v9903_v7  ;;  %v9907_v39 = vld [vmem:[#allocation33_spill] sm:$0xff]  ;;  %v9908_v7 = vld [vmem:[#allocation14_spill] sm:$0xff] }
 0x389   :  { %5566 = vmatprep.subr.bf16.mxu0 %v9824_v52  ;;  %5630 = vmatprep.subr.bf16.mxu1 %v9904_v6  ;;  %v9909_v52 = vld [vmem:[#allocation35_spill] sm:$0xff]  ;;  %v9910_v6 = vld [vmem:[#allocation16_spill] sm:$0xff] }
 0x38b   :  { %2456 = vmatmul.mubr.f32.vlgmr.msra.gmra.mrb[12].mxu0 %v8376_v9  ;;  %2527 = vmatmul.mubr.f32.vlgmr.msra.gmra.mrb[28].mxu1 %v8376_v9  ;;  %v9912_v9 = vld [vmem:[#allocation17_spill] sm:$0xff] }
 0x38c   :  { %5568 = vmatpush1.bf16.msra.mxu0 %v9825_v54  ;;  %5632 = vmatpush1.bf16.msra.mxu1 %v7751_v61  ;;  %v9913_v54 = vld [vmem:[#allocation39_spill] sm:$0xff]  ;;  %v9914_v61 = vld [vmem:[#allocation18_spill] sm:$0xff] }
 0x38d   :  { %5570 = vmatprep.subr.bf16.mxu0 %v9826_v16  ;;  %5634 = vmatprep.subr.bf16.mxu1 %v9905_v37  ;;  %v9915_v16 = vld [vmem:[#allocation41_spill] sm:$0xff]  ;;  %v9916_v37 = vld [vmem:[#allocation19_spill] sm:$0xff] }
 0x390   :  { %5572 = vmatpush1.bf16.msra.mxu0 %v9906_v32  ;;  %5636 = vmatpush1.bf16.msra.mxu1 %v9907_v39  ;;  %v9917_v32 = vld [vmem:[#allocation43_spill] sm:$0xff]  ;;  %v9918_v39 = vld [vmem:[#allocation20_spill] sm:$0xff] }
 0x391   :  { %5574 = vmatprep.subr.bf16.mxu0 %v9908_v7  ;;  %5638 = vmatprep.subr.bf16.mxu1 %v9909_v52  ;;  %v9919_v7 = vld [vmem:[#allocation45_spill] sm:$0xff] }
 0x392   :  { %v9920_v52 = vld [vmem:[#allocation21_spill] sm:$0xff] }
 0x394   :  { %5576 = vmatpush1.bf16.msra.mxu0 %v9910_v6  ;;  %5640 = vmatpush1.bf16.msra.mxu1 %v9911_v0  ;;  %v9921_v6 = vld [vmem:[#allocation47_spill] sm:$0xff]  ;;  %v9922_v0 = vld [vmem:[#allocation22_spill] sm:$0xff] }
 0x395   :  { %5578 = vmatprep.subr.bf16.mxu0 %v9912_v9  ;;  %5642 = vmatprep.subr.bf16.mxu1 %v9913_v54  ;;  %v9923_v9 = vld [vmem:[#allocation49_spill] sm:$0xff]  ;;  %v9924_v54 = vld [vmem:[#allocation23_spill] sm:$0xff] }
 0x398   :  { %5580 = vmatpush1.bf16.msra.mxu0 %v9914_v61  ;;  %5644 = vmatpush1.bf16.msra.mxu1 %v9915_v16  ;;  %v9925_v61 = vld [vmem:[#allocation51_spill] sm:$0xff]  ;;  %v9926_v16 = vld [vmem:[#allocation24_spill] sm:$0xff] }
 0x399   :  { %5582 = vmatprep.subr.bf16.mxu0 %v9916_v37  ;;  %5646 = vmatprep.subr.bf16.mxu1 %v9917_v32  ;;  %v9927_v37 = vld [vmem:[#allocation53_spill] sm:$0xff] }
 0x39a   :  { %v9928_v32 = vld [vmem:[#allocation25_spill] sm:$0xff] }
 0x39c   :  { %5584 = vmatpush1.bf16.msra.mxu0 %v9918_v39  ;;  %5648 = vmatpush1.bf16.msra.mxu1 %v9919_v7  ;;  %v9929_v39 = vld [vmem:[#allocation55_spill] sm:$0xff]  ;;  %v9930_v7 = vld [vmem:[#allocation26_spill] sm:$0xff] }
 0x39d   :  { %5586 = vmatprep.subr.bf16.mxu0 %v9920_v52  ;;  %5650 = vmatprep.subr.bf16.mxu1 %v9921_v6  ;;  %v9931_v52 = vld [vmem:[#allocation57_spill] sm:$0xff]  ;;  %v9932_v6 = vld [vmem:[#allocation27_spill] sm:$0xff] }
 0x3a0   :  { %5588 = vmatpush1.bf16.msra.mxu0 %v9922_v0  ;;  %5652 = vmatpush1.bf16.msra.mxu1 %v9923_v9  ;;  %v9933_v0 = vld [vmem:[#allocation58_spill] sm:$0xff]  ;;  %v9934_v9 = vld [vmem:[#allocation28_spill] sm:$0xff] }
 0x3a1   :  { %5590 = vmatprep.subr.bf16.mxu0 %v9924_v54  ;;  %5654 = vmatprep.subr.bf16.mxu1 %v9925_v61  ;;  %v9935_v54 = vld [vmem:[#allocation60_spill] sm:$0xff]  ;;  %v9936_v61 = vld [vmem:[#allocation30_spill] sm:$0xff] }
 0x3a4   :  { %5592 = vmatpush1.bf16.msra.mxu0 %v9926_v16  ;;  %5656 = vmatpush1.bf16.msra.mxu1 %v9927_v37  ;;  %v9937_v16 = vld [vmem:[#allocation62_spill] sm:$0xff]  ;;  %v9938_v37 = vld [vmem:[#allocation32_spill] sm:$0xff] }
 0x3a5   :  { %5594 = vmatprep.subr.bf16.mxu0 %v9928_v32  ;;  %5658 = vmatprep.subr.bf16.mxu1 %v9929_v39  ;;  %v9939_v32 = vld [vmem:[#allocation64_spill] sm:$0xff]  ;;  %v9940_v39 = vld [vmem:[#allocation34_spill] sm:$0xff] }
 0x3a8   :  { %5596 = vmatpush1.bf16.msra.mxu0 %v9930_v7  ;;  %5660 = vmatpush1.bf16.msra.mxu1 %v9931_v52  ;;  %v9941_v7 = vld [vmem:[#allocation66_spill] sm:$0xff]  ;;  %v9942_v52 = vld [vmem:[#allocation36_spill] sm:$0xff] }
 0x3a9   :  { %5598 = vmatprep.subr.bf16.mxu0 %v9932_v6  ;;  %5662 = vmatprep.subr.bf16.mxu1 %v9933_v0  ;;  %v9943_v6 = vld [vmem:[#allocation68_spill] sm:$0xff]  ;;  %v9944_v0 = vld [vmem:[#allocation38_spill] sm:$0xff] }
 0x3ac   :  { %5600 = vmatpush1.bf16.msra.mxu0 %v9934_v9  ;;  %5664 = vmatpush1.bf16.msra.mxu1 %v9935_v54  ;;  %v9945_v9 = vld [vmem:[#allocation70_spill] sm:$0xff]  ;;  %v9946_v54 = vld [vmem:[#allocation40_spill] sm:$0xff] }
 0x3ad   :  { %5602 = vmatprep.subr.bf16.mxu0 %v9936_v61  ;;  %5666 = vmatprep.subr.bf16.mxu1 %v9937_v16  ;;  %v9947_v61 = vld [vmem:[#allocation72_spill] sm:$0xff]  ;;  %v9948_v16 = vld [vmem:[#allocation42_spill] sm:$0xff] }
 0x3b0   :  { %5604 = vmatpush1.bf16.msra.mxu0 %v9938_v37  ;;  %5668 = vmatpush1.bf16.msra.mxu1 %v9939_v32  ;;  %v9949_v37 = vld [vmem:[#allocation74_spill] sm:$0xff]  ;;  %v9950_v32 = vld [vmem:[#allocation44_spill] sm:$0xff] }
 0x3b1   :  { %5606 = vmatprep.subr.bf16.mxu0 %v9940_v39  ;;  %5670 = vmatprep.subr.bf16.mxu1 %v9941_v7  ;;  %v9951_v39 = vld [vmem:[#allocation76_spill] sm:$0xff]  ;;  %v9952_v7 = vld [vmem:[#allocation46_spill] sm:$0xff] }
 0x3b4   :  { %5608 = vmatpush1.bf16.msra.mxu0 %v9942_v52  ;;  %5672 = vmatpush1.bf16.msra.mxu1 %v9943_v6  ;;  %v9953_v52 = vld [vmem:[#allocation78_spill] sm:$0xff]  ;;  %v9954_v6 = vld [vmem:[#allocation48_spill] sm:$0xff] }
 0x3b5   :  { %5610 = vmatprep.subr.bf16.mxu0 %v9944_v0  ;;  %5674 = vmatprep.subr.bf16.mxu1 %v9945_v9  ;;  %v9955_v0 = vld [vmem:[#allocation80_spill] sm:$0xff]  ;;  %v9956_v9 = vld [vmem:[#allocation50_spill] sm:$0xff] }
 0x3b8   :  { %5612 = vmatpush1.bf16.msra.mxu0 %v9946_v54  ;;  %5676 = vmatpush1.bf16.msra.mxu1 %v9947_v61  ;;  %v9957_v54 = vld [vmem:[#allocation82_spill] sm:$0xff]  ;;  %v9958_v61 = vld [vmem:[#allocation52_spill] sm:$0xff] }
 0x3b9   :  { %5614 = vmatprep.subr.bf16.mxu0 %v9948_v16  ;;  %5678 = vmatprep.subr.bf16.mxu1 %v9949_v37  ;;  %v9959_v16 = vld [vmem:[#allocation84_spill] sm:$0xff]  ;;  %v9960_v37 = vld [vmem:[#allocation54_spill] sm:$0xff] }
 0x3bc   :  { %5616 = vmatpush1.bf16.msra.mxu0 %v9950_v32  ;;  %5680 = vmatpush1.bf16.msra.mxu1 %v9951_v39  ;;  %v9961_v32 = vld [vmem:[#allocation86_spill] sm:$0xff]  ;;  %v9962_v39 = vld [vmem:[#allocation56_spill] sm:$0xff] }
 0x3bd   :  { %5618 = vmatprep.subr.bf16.mxu0 %v9952_v7  ;;  %5682 = vmatprep.subr.bf16.mxu1 %v9953_v52  ;;  %v9963_v7 = vld [vmem:[#allocation88_spill] sm:$0xff]  ;;  %v9964_v52 = vld [vmem:[#allocation59_spill] sm:$0xff] }
 0x3c0   :  { %5620 = vmatpush1.bf16.msra.mxu0 %v9954_v6  ;;  %5684 = vmatpush1.bf16.msra.mxu1 %v9955_v0  ;;  %v9965_v6 = vld [vmem:[#allocation91_spill] sm:$0xff] }
 0x3c1   :  { %5622 = vmatprep.subr.bf16.mxu0 %v9956_v9  ;;  %5686 = vmatprep.subr.bf16.mxu1 %v9957_v54 }
 0x3c4   :  { %5624 = vmatpush1.bf16.msra.mxu0 %v9958_v61  ;;  %5688 = vmatpush1.bf16.msra.mxu1 %v9959_v16 }
 0x3c5   :  { %5626 = vmatprep.subr.bf16.mxu0 %v9960_v37  ;;  %5690 = vmatprep.subr.bf16.mxu1 %v9961_v32 }
 0x3c8   :  { %5628 = vmatpush1.bf16.msra.mxu0 %v9962_v39  ;;  %5692 = vmatpush1.bf16.msra.mxu1 %v9963_v7 }
 0x3c9   :  { %5694 = vmatprep.subr.bf16.mxu0 %v9964_v52  ;;  %5758 = vmatprep.subr.bf16.mxu1 %v9965_v6 }
 0x41e   :  { %v2315_v0 = vpop.f32.mrb[4].mxu0  ;;  %v2386_v9 = vpop.f32.mrb[12].mxu1 }
 0x41f   :  { %v2317_v62 = vpop.f32.mrb[5].mxu0  ;;  %v2388_v54 = vpop.f32.mrb[13].mxu1  ;;  %v2541_v61 = vadd.f32 %v2315_v0, %v9966_v12  ;;  %v2543_v16 = vadd.f32 %v2386_v9, %v8200_v63 }
 0x420   :  { %v2542_v37 = vadd.f32 %v2317_v62, %v9873_v18  ;;  %v2544_v32 = vadd.f32 %v2388_v54, %v9874_v34 }
 0x421   :  { %v4661_v13 = vmul.f32 -1.442695, %v2541_v61  ;;  %v4663_v39 = vmul.f32 -1.442695, %v2543_v16  ;;  %v9967_v61 = vld [vmem:[#allocation152_spill] sm:$0xff] }
 0x422   :  { %v4662_v23 = vmul.f32 -1.442695, %v2542_v37  ;;  %v4664_v7 = vmul.f32 -1.442695, %v2544_v32 }
 0x423   :  { %7078 = vpow2.f32 %v4661_v13 }
 0x424   :  { %7080 = vpow2.f32 %v4663_v39 }
 0x425   :  { %7082 = vpow2.f32 %v4662_v23 }
 0x426   :  { %7084 = vpow2.f32 %v4664_v7  ;;  %v9968_v7 = vld [vmem:[#allocation151_spill] sm:$0xff] }
 0x42d   :  { %v7079_v6 = vpop.eup %7078 }
 0x42e   :  { %v7081_v52 = vpop.eup %7080  ;;  %v2555_v47 = vadd.f32 1.0, %v7079_v6 }
 0x42f   :  { %v7083_v56 = vpop.eup %7082  ;;  %v2567_v0 = vadd.f32 1.0, %v7081_v52 }
 0x430   :  { %v7085_v21 = vpop.eup %7084  ;;  %v2556_v12 = vadd.f32 1.0, %v7083_v56  ;;  %7086 = vrcp.f32 %v2555_v47 }
 0x431   :  { %v2568_v9 = vadd.f32 1.0, %v7085_v21  ;;  %7088 = vrcp.f32 %v2567_v0 }
 0x432   :  { %7090 = vrcp.f32 %v2556_v12 }
 0x433   :  { %7092 = vrcp.f32 %v2568_v9 }
 0x43a   :  { %v7087_v47 = vpop.eup %7086 }
 0x43b   :  { %v7089_v56 = vpop.eup %7088 }
 0x43c   :  { %v7091_v12 = vpop.eup %7090 }
 0x43d   :  { %v7093_v52 = vpop.eup %7092 }
 0x45e   :  { %v2457_v62 = vpop.f32.mrb[12].mxu0  ;;  %v2528_v54 = vpop.f32.mrb[28].mxu1 }
 0x45f   :  { %v2545_v16 = vadd.f32 %v2457_v62, %v9875_v58  ;;  %v2547_v13 = vadd.f32 %v2528_v54, %v9967_v61  ;;  %v2459_v32 = vpop.f32.mrb[13].mxu0  ;;  %v2530_v37 = vpop.f32.mrb[29].mxu1  ;;  %v2587_v54 = vmul.f32 %v7089_v56, %v8370_v4 }
 0x460   :  { %v2546_v39 = vadd.f32 %v2459_v32, %v9968_v7  ;;  %v2548_v23 = vadd.f32 %v2530_v37, %v8220_v36  ;;  %v2588_v32 = vmul.f32 %v7093_v52, %v8372_v19  ;;  %v9972_v52 = vld [vmem:[#allocation96_spill] sm:$0xff] }
 0x461   :  { %7094 = vtanh.f32 %v2545_v16  ;;  %v4665_v6 = vmul.f32 -1.442695, %v2547_v13 }
 0x462   :  { %7096 = vtanh.f32 %v2546_v39  ;;  %v4666_v21 = vmul.f32 -1.442695, %v2548_v23 }
 0x463   :  { %7098 = vpow2.f32 %v4665_v6 }
 0x464   :  { %7100 = vpow2.f32 %v4666_v21 }
 0x46b   :  { %v7095_v0 = vpop.eup %7094 }
 0x46c   :  { %v7097_v62 = vpop.eup %7096  ;;  %v2589_v61 = vmul.f32 %v7095_v0, %v7087_v47  ;;  %v9973_v0 = vld [vmem:[#allocation98_spill] sm:$0xff] }
 0x46d   :  { %v7099_v9 = vpop.eup %7098  ;;  %v2590_v7 = vmul.f32 %v7097_v62, %v7091_v12  ;;  %v9971_v12 = vld [vmem:[#allocation94_spill] sm:$0xff]  ;;  %v9974_v62 = vld [vmem:[#allocation100_spill] sm:$0xff] }
 0x46e   :  { %v7101_v37 = vpop.eup %7100  ;;  %v8520_v16 = vadd.f32 %v2589_v61, %v2587_v54  ;;  %v2581_v13 = vadd.f32 1.0, %v7099_v9  ;;  %v9969_v61 = vld [vmem:[#allocation89_spill] sm:$0xff]  ;;  %v9975_v54 = vld [vmem:[#allocation104_spill] sm:$0xff]  ;;  %v9976_v9 = vld [vmem:[#allocation106_spill] sm:$0xff] }
 0x46f   :  { %v8522_v39 = vadd.f32 %v2590_v7, %v2588_v32  ;;  %v2582_v23 = vadd.f32 1.0, %v7101_v37  ;;  %v9970_v7 = vld [vmem:[#allocation90_spill] sm:$0xff]  ;;  %v9978_v37 = vld [vmem:[#allocation108_spill] sm:$0xff] }
 0x470   :  { %7102 = vtanh.f32 %v8520_v16  ;;  %v9977_v32 = vld [vmem:[#allocation134_spill] sm:$0xff] }
 0x471   :  { %7104 = vrcp.f32 %v2581_v13  ;;  %v9979_v13 = vld [vmem:[#allocation137_spill] sm:$0xff] }
 0x472   :  { %7106 = vtanh.f32 %v8522_v39 }
 0x473   :  { %7108 = vrcp.f32 %v2582_v23  ;;  %v9980_v23 = vld [vmem:[#allocation110_spill] sm:$0xff] }
 0x47a   :  { %v7103_v6 = vpop.eup %7102 }
 0x47b   :  { %v7105_v4 = vpop.eup %7104 }
 0x47c   :  { %v7107_v21 = vpop.eup %7106  ;;  %v8526_v19 = vmul.f32 %v7105_v4, %v7103_v6  ;;  %v9981_v6 = vld [vmem:[#allocation138_spill] sm:$0xff]  ;;  %v9982_v4 = vld [vmem:[#allocation112_spill] sm:$0xff] }
 0x47d   :  { %v7109_v47 = vpop.eup %7108 }
 0x47e   :  { %v2596_v56 = vmul.f32 %v7109_v47, %v7107_v21  ;;  %v9983_v21 = vld [vmem:[#allocation141_spill] sm:$0xff]  ;;  %v9984_v47 = vld [vmem:[#allocation114_spill] sm:$0xff] }
 0x480   :  { %2685 = vmatprep.mubr.f32.mxu0 %v2596_v56  ;;  %2756 = vmatprep.mubr.f32.mxu1 %v2596_v56 }
 0x481   :  { %2686 = vmatmul.mubr.f32.vlgmr.msra.gmra.mrb[6].mxu0 %v8526_v19  ;;  %2757 = vmatmul.mubr.f32.vlgmr.msra.gmra.mrb[14].mxu1 %v8526_v19 }
 0x482   :  { %5696 = vmatpush1.bf16.msra.mxu0 %v9785_v11  ;;  %5760 = vmatpush1.bf16.msra.mxu1 %v9786_v57 }
 0x483   :  { %2827 = vmatprep.mubr.f32.mxu0 %v2596_v56  ;;  %2898 = vmatprep.mubr.f32.mxu1 %v2596_v56  ;;  %v9985_v56 = vld [vmem:[#allocation142_spill] sm:$0xff] }
 0x484   :  { %5698 = vmatprep.subr.bf16.mxu0 %v9787_v44  ;;  %5762 = vmatprep.subr.bf16.mxu1 %v9788_v14 }
 0x486   :  { %5700 = vmatpush1.bf16.msra.mxu0 %v9789_v51  ;;  %5764 = vmatpush1.bf16.msra.mxu1 %v9790_v49 }
 0x487   :  { %5702 = vmatprep.subr.bf16.mxu0 %v9877_v20  ;;  %5766 = vmatprep.subr.bf16.mxu1 %v9878_v5 }
 0x48a   :  { %5704 = vmatpush1.bf16.msra.mxu0 %v9793_v2  ;;  %5768 = vmatpush1.bf16.msra.mxu1 %v9879_v43 }
 0x48b   :  { %5706 = vmatprep.subr.bf16.mxu0 %v9795_v27  ;;  %5770 = vmatprep.subr.bf16.mxu1 %v9880_v10 }
 0x48e   :  { %5708 = vmatpush1.bf16.msra.mxu0 %v9797_v33  ;;  %5772 = vmatpush1.bf16.msra.mxu1 %v9881_v29 }
 0x48f   :  { %5710 = vmatprep.subr.bf16.mxu0 %v9799_v35  ;;  %5774 = vmatprep.subr.bf16.mxu1 %v9882_v15 }
 0x492   :  { %5712 = vmatpush1.bf16.msra.mxu0 %v9801_v60  ;;  %5776 = vmatpush1.bf16.msra.mxu1 %v9883_v30 }
 0x493   :  { %5714 = vmatprep.subr.bf16.mxu0 %v9803_v53  ;;  %5778 = vmatprep.subr.bf16.mxu1 %v9884_v48 }
 0x496   :  { %5716 = vmatpush1.bf16.msra.mxu0 %v9804_v3  ;;  %5780 = vmatpush1.bf16.msra.mxu1 %v9885_v22 }
 0x497   :  { %5718 = vmatprep.subr.bf16.mxu0 %v9805_v42  ;;  %5782 = vmatprep.subr.bf16.mxu1 %v9886_v25 }
 0x49a   :  { %5720 = vmatpush1.bf16.msra.mxu0 %v9806_v38  ;;  %5784 = vmatpush1.bf16.msra.mxu1 %v9887_v8 }
 0x49b   :  { %5722 = vmatprep.subr.bf16.mxu0 %v9807_v26  ;;  %5786 = vmatprep.subr.bf16.mxu1 %v9888_v1 }
 0x49e   :  { %5724 = vmatpush1.bf16.msra.mxu0 %v9969_v61  ;;  %5788 = vmatpush1.bf16.msra.mxu1 %v9889_v24 }
 0x49f   :  { %5726 = vmatprep.subr.bf16.mxu0 %v9970_v7  ;;  %5790 = vmatprep.subr.bf16.mxu1 %v9890_v31 }
 0x4a2   :  { %5728 = vmatpush1.bf16.msra.mxu0 %v9810_v41  ;;  %5792 = vmatpush1.bf16.msra.mxu1 %v9891_v17 }
 0x4a3   :  { %5730 = vmatprep.subr.bf16.mxu0 %v9971_v12  ;;  %5794 = vmatprep.subr.bf16.mxu1 %v9892_v28 }
 0x4a6   :  { %5732 = vmatpush1.bf16.msra.mxu0 %v9972_v52  ;;  %5796 = vmatpush1.bf16.msra.mxu1 %v9893_v59 }
 0x4a7   :  { %5734 = vmatprep.subr.bf16.mxu0 %v9973_v0  ;;  %5798 = vmatprep.subr.bf16.mxu1 %v9894_v55 }
 0x4aa   :  { %5736 = vmatpush1.bf16.msra.mxu0 %v9974_v62  ;;  %5800 = vmatpush1.bf16.msra.mxu1 %v9895_v40 }
 0x4ab   :  { %5738 = vmatprep.subr.bf16.mxu0 %v9815_v46  ;;  %5802 = vmatprep.subr.bf16.mxu1 %v8087_v50 }
 0x4ae   :  { %5740 = vmatpush1.bf16.msra.mxu0 %v9975_v54  ;;  %5804 = vmatpush1.bf16.msra.mxu1 %v9896_v45  ;;  %v9986_v45 = vld [vmem:[#allocation116_spill] sm:$0xff]  ;;  %v10058_v54 = vld [vmem:[#allocation146_spill] sm:$0xff] }
 0x4af   :  { %5742 = vmatprep.subr.bf16.mxu0 %v9976_v9  ;;  %5806 = vmatprep.subr.bf16.mxu1 %v9977_v32  ;;  %v9987_v9 = vld [vmem:[#allocation143_spill] sm:$0xff]  ;;  %v9988_v32 = vld [vmem:[#allocation118_spill] sm:$0xff] }
 0x4b2   :  { %5744 = vmatpush1.bf16.msra.mxu0 %v9978_v37  ;;  %5808 = vmatpush1.bf16.msra.mxu1 %v9979_v13  ;;  %v9989_v37 = vld [vmem:[#allocation144_spill] sm:$0xff] }
 0x4b3   :  { %5746 = vmatprep.subr.bf16.mxu0 %v9980_v23  ;;  %5810 = vmatprep.subr.bf16.mxu1 %v9981_v6  ;;  %v9990_v13 = vld [vmem:[#allocation120_spill] sm:$0xff]  ;;  %v9991_v23 = vld [vmem:[#allocation145_spill] sm:$0xff]  ;;  %v9992_v6 = vld [vmem:[#allocation10_spill] sm:$0xff] }
 0x4b6   :  { %5748 = vmatpush1.bf16.msra.mxu0 %v9982_v4  ;;  %5812 = vmatpush1.bf16.msra.mxu1 %v9983_v21  ;;  %v9993_v4 = vld [vmem:[#allocation15_spill] sm:$0xff] }
 0x4b7   :  { %5750 = vmatprep.subr.bf16.mxu0 %v9984_v47  ;;  %5814 = vmatprep.subr.bf16.mxu1 %v9985_v56  ;;  %v9994_v56 = vld [vmem:[#allocation11_spill] sm:$0xff]  ;;  %v10003_v47 = vld [vmem:[#allocation37_spill] sm:$0xff] }
 0x4ba   :  { %5752 = vmatpush1.bf16.msra.mxu0 %v9986_v45  ;;  %5816 = vmatpush1.bf16.msra.mxu1 %v9987_v9  ;;  %v9995_v45 = vld [vmem:[#allocation29_spill] sm:$0xff]  ;;  %v9996_v9 = vld [vmem:[#allocation12_spill] sm:$0xff] }
 0x4bb   :  { %5754 = vmatprep.subr.bf16.mxu0 %v9988_v32  ;;  %5818 = vmatprep.subr.bf16.mxu1 %v9989_v37  ;;  %v9997_v32 = vld [vmem:[#allocation31_spill] sm:$0xff]  ;;  %v9998_v37 = vld [vmem:[#allocation13_spill] sm:$0xff] }
 0x4be   :  { %5756 = vmatpush1.bf16.msra.mxu0 %v9990_v13  ;;  %5820 = vmatpush1.bf16.msra.mxu1 %v9991_v23  ;;  %v9999_v13 = vld [vmem:[#allocation33_spill] sm:$0xff]  ;;  %v10000_v23 = vld [vmem:[#allocation14_spill] sm:$0xff] }
 0x4bf   :  { %5822 = vmatprep.subr.bf16.mxu0 %v9992_v6  ;;  %5886 = vmatprep.subr.bf16.mxu1 %v9993_v4  ;;  %v10001_v6 = vld [vmem:[#allocation35_spill] sm:$0xff]  ;;  %v10002_v4 = vld [vmem:[#allocation16_spill] sm:$0xff] }
 0x4c1   :  { %2828 = vmatmul.mubr.f32.vlgmr.msra.gmra.mrb[14].mxu0 %v8526_v19  ;;  %2899 = vmatmul.mubr.f32.vlgmr.msra.gmra.mrb[30].mxu1 %v8526_v19  ;;  %v10004_v19 = vld [vmem:[#allocation17_spill] sm:$0xff] }
 0x4c2   :  { %5824 = vmatpush1.bf16.msra.mxu0 %v9994_v56  ;;  %5888 = vmatpush1.bf16.msra.mxu1 %v9995_v45  ;;  %v10005_v56 = vld [vmem:[#allocation39_spill] sm:$0xff]  ;;  %v10006_v45 = vld [vmem:[#allocation18_spill] sm:$0xff] }
 0x4c3   :  { %5826 = vmatprep.subr.bf16.mxu0 %v9996_v9  ;;  %5890 = vmatprep.subr.bf16.mxu1 %v9997_v32  ;;  %v10007_v9 = vld [vmem:[#allocation41_spill] sm:$0xff]  ;;  %v10008_v32 = vld [vmem:[#allocation19_spill] sm:$0xff] }
 0x4c6   :  { %5828 = vmatpush1.bf16.msra.mxu0 %v9998_v37  ;;  %5892 = vmatpush1.bf16.msra.mxu1 %v9999_v13  ;;  %v10009_v37 = vld [vmem:[#allocation43_spill] sm:$0xff]  ;;  %v10010_v13 = vld [vmem:[#allocation20_spill] sm:$0xff] }
 0x4c7   :  { %5830 = vmatprep.subr.bf16.mxu0 %v10000_v23  ;;  %5894 = vmatprep.subr.bf16.mxu1 %v10001_v6  ;;  %v10011_v23 = vld [vmem:[#allocation45_spill] sm:$0xff] }
 0x4c8   :  { %v10012_v6 = vld [vmem:[#allocation21_spill] sm:$0xff] }
 0x4ca   :  { %5832 = vmatpush1.bf16.msra.mxu0 %v10002_v4  ;;  %5896 = vmatpush1.bf16.msra.mxu1 %v10003_v47  ;;  %v10013_v4 = vld [vmem:[#allocation47_spill] sm:$0xff]  ;;  %v10014_v47 = vld [vmem:[#allocation22_spill] sm:$0xff] }
 0x4cb   :  { %5834 = vmatprep.subr.bf16.mxu0 %v10004_v19  ;;  %5898 = vmatprep.subr.bf16.mxu1 %v10005_v56  ;;  %v10015_v19 = vld [vmem:[#allocation49_spill] sm:$0xff]  ;;  %v10016_v56 = vld [vmem:[#allocation23_spill] sm:$0xff] }
 0x4ce   :  { %5836 = vmatpush1.bf16.msra.mxu0 %v10006_v45  ;;  %5900 = vmatpush1.bf16.msra.mxu1 %v10007_v9  ;;  %v10017_v45 = vld [vmem:[#allocation51_spill] sm:$0xff]  ;;  %v10018_v9 = vld [vmem:[#allocation24_spill] sm:$0xff] }
 0x4cf   :  { %5838 = vmatprep.subr.bf16.mxu0 %v10008_v32  ;;  %5902 = vmatprep.subr.bf16.mxu1 %v10009_v37  ;;  %v10019_v32 = vld [vmem:[#allocation53_spill] sm:$0xff] }
 0x4d0   :  { %v10020_v37 = vld [vmem:[#allocation25_spill] sm:$0xff] }
 0x4d2   :  { %5840 = vmatpush1.bf16.msra.mxu0 %v10010_v13  ;;  %5904 = vmatpush1.bf16.msra.mxu1 %v10011_v23  ;;  %v10021_v13 = vld [vmem:[#allocation55_spill] sm:$0xff]  ;;  %v10022_v23 = vld [vmem:[#allocation26_spill] sm:$0xff] }
 0x4d3   :  { %5842 = vmatprep.subr.bf16.mxu0 %v10012_v6  ;;  %5906 = vmatprep.subr.bf16.mxu1 %v10013_v4  ;;  %v10023_v6 = vld [vmem:[#allocation57_spill] sm:$0xff]  ;;  %v10024_v4 = vld [vmem:[#allocation27_spill] sm:$0xff] }
 0x4d6   :  { %5844 = vmatpush1.bf16.msra.mxu0 %v10014_v47  ;;  %5908 = vmatpush1.bf16.msra.mxu1 %v10015_v19  ;;  %v10025_v47 = vld [vmem:[#allocation58_spill] sm:$0xff]  ;;  %v10026_v19 = vld [vmem:[#allocation28_spill] sm:$0xff] }
 0x4d7   :  { %5846 = vmatprep.subr.bf16.mxu0 %v10016_v56  ;;  %5910 = vmatprep.subr.bf16.mxu1 %v10017_v45  ;;  %v10027_v56 = vld [vmem:[#allocation60_spill] sm:$0xff]  ;;  %v10028_v45 = vld [vmem:[#allocation30_spill] sm:$0xff] }
 0x4da   :  { %5848 = vmatpush1.bf16.msra.mxu0 %v10018_v9  ;;  %5912 = vmatpush1.bf16.msra.mxu1 %v10019_v32  ;;  %v10029_v9 = vld [vmem:[#allocation62_spill] sm:$0xff]  ;;  %v10030_v32 = vld [vmem:[#allocation32_spill] sm:$0xff] }
 0x4db   :  { %5850 = vmatprep.subr.bf16.mxu0 %v10020_v37  ;;  %5914 = vmatprep.subr.bf16.mxu1 %v10021_v13  ;;  %v10031_v37 = vld [vmem:[#allocation64_spill] sm:$0xff]  ;;  %v10032_v13 = vld [vmem:[#allocation34_spill] sm:$0xff] }
 0x4de   :  { %5852 = vmatpush1.bf16.msra.mxu0 %v10022_v23  ;;  %5916 = vmatpush1.bf16.msra.mxu1 %v10023_v6  ;;  %v10033_v23 = vld [vmem:[#allocation66_spill] sm:$0xff]  ;;  %v10034_v6 = vld [vmem:[#allocation36_spill] sm:$0xff] }
 0x4df   :  { %5854 = vmatprep.subr.bf16.mxu0 %v10024_v4  ;;  %5918 = vmatprep.subr.bf16.mxu1 %v10025_v47  ;;  %v10035_v4 = vld [vmem:[#allocation68_spill] sm:$0xff]  ;;  %v10036_v47 = vld [vmem:[#allocation38_spill] sm:$0xff] }
 0x4e2   :  { %5856 = vmatpush1.bf16.msra.mxu0 %v10026_v19  ;;  %5920 = vmatpush1.bf16.msra.mxu1 %v10027_v56  ;;  %v10037_v19 = vld [vmem:[#allocation70_spill] sm:$0xff]  ;;  %v10038_v56 = vld [vmem:[#allocation40_spill] sm:$0xff] }
 0x4e3   :  { %5858 = vmatprep.subr.bf16.mxu0 %v10028_v45  ;;  %5922 = vmatprep.subr.bf16.mxu1 %v10029_v9  ;;  %v10039_v45 = vld [vmem:[#allocation72_spill] sm:$0xff]  ;;  %v10040_v9 = vld [vmem:[#allocation42_spill] sm:$0xff] }
 0x4e6   :  { %5860 = vmatpush1.bf16.msra.mxu0 %v10030_v32  ;;  %5924 = vmatpush1.bf16.msra.mxu1 %v10031_v37  ;;  %v10041_v32 = vld [vmem:[#allocation74_spill] sm:$0xff]  ;;  %v10042_v37 = vld [vmem:[#allocation44_spill] sm:$0xff] }
 0x4e7   :  { %5862 = vmatprep.subr.bf16.mxu0 %v10032_v13  ;;  %5926 = vmatprep.subr.bf16.mxu1 %v10033_v23  ;;  %v10043_v13 = vld [vmem:[#allocation76_spill] sm:$0xff]  ;;  %v10044_v23 = vld [vmem:[#allocation46_spill] sm:$0xff] }
 0x4ea   :  { %5864 = vmatpush1.bf16.msra.mxu0 %v10034_v6  ;;  %5928 = vmatpush1.bf16.msra.mxu1 %v10035_v4  ;;  %v10045_v6 = vld [vmem:[#allocation78_spill] sm:$0xff]  ;;  %v10046_v4 = vld [vmem:[#allocation48_spill] sm:$0xff] }
 0x4eb   :  { %5866 = vmatprep.subr.bf16.mxu0 %v10036_v47  ;;  %5930 = vmatprep.subr.bf16.mxu1 %v10037_v19  ;;  %v10047_v47 = vld [vmem:[#allocation80_spill] sm:$0xff]  ;;  %v10048_v19 = vld [vmem:[#allocation50_spill] sm:$0xff] }
 0x4ee   :  { %5868 = vmatpush1.bf16.msra.mxu0 %v10038_v56  ;;  %5932 = vmatpush1.bf16.msra.mxu1 %v10039_v45  ;;  %v10049_v56 = vld [vmem:[#allocation82_spill] sm:$0xff]  ;;  %v10050_v45 = vld [vmem:[#allocation52_spill] sm:$0xff] }
 0x4ef   :  { %5870 = vmatprep.subr.bf16.mxu0 %v10040_v9  ;;  %5934 = vmatprep.subr.bf16.mxu1 %v10041_v32  ;;  %v10051_v9 = vld [vmem:[#allocation84_spill] sm:$0xff]  ;;  %v10052_v32 = vld [vmem:[#allocation54_spill] sm:$0xff] }
 0x4f2   :  { %5872 = vmatpush1.bf16.msra.mxu0 %v10042_v37  ;;  %5936 = vmatpush1.bf16.msra.mxu1 %v10043_v13  ;;  %v10053_v37 = vld [vmem:[#allocation86_spill] sm:$0xff]  ;;  %v10054_v13 = vld [vmem:[#allocation56_spill] sm:$0xff] }
 0x4f3   :  { %5874 = vmatprep.subr.bf16.mxu0 %v10044_v23  ;;  %5938 = vmatprep.subr.bf16.mxu1 %v10045_v6  ;;  %v10055_v23 = vld [vmem:[#allocation88_spill] sm:$0xff]  ;;  %v10056_v6 = vld [vmem:[#allocation59_spill] sm:$0xff] }
 0x4f6   :  { %5876 = vmatpush1.bf16.msra.mxu0 %v10046_v4  ;;  %5940 = vmatpush1.bf16.msra.mxu1 %v10047_v47  ;;  %v10057_v4 = vld [vmem:[#allocation91_spill] sm:$0xff] }
 0x4f7   :  { %5878 = vmatprep.subr.bf16.mxu0 %v10048_v19  ;;  %5942 = vmatprep.subr.bf16.mxu1 %v10049_v56 }
 0x4fa   :  { %5880 = vmatpush1.bf16.msra.mxu0 %v10050_v45  ;;  %5944 = vmatpush1.bf16.msra.mxu1 %v10051_v9 }
 0x4fb   :  { %5882 = vmatprep.subr.bf16.mxu0 %v10052_v32  ;;  %5946 = vmatprep.subr.bf16.mxu1 %v10053_v37 }
 0x4fe   :  { %5884 = vmatpush1.bf16.msra.mxu0 %v10054_v13  ;;  %5948 = vmatpush1.bf16.msra.mxu1 %v10055_v23 }
 0x4ff   :  { %5950 = vmatprep.subr.bf16.mxu0 %v10056_v6  ;;  %6014 = vmatprep.subr.bf16.mxu1 %v10057_v4 }
 0x554   :  { %v2687_v47 = vpop.f32.mrb[6].mxu0  ;;  %v2758_v19 = vpop.f32.mrb[14].mxu1 }
 0x555   :  { %v2689_v21 = vpop.f32.mrb[7].mxu0  ;;  %v2760_v56 = vpop.f32.mrb[15].mxu1  ;;  %v2913_v45 = vadd.f32 %v2687_v47, %v10058_v54  ;;  %v2915_v9 = vadd.f32 %v2758_v19, %v8200_v63 }
 0x556   :  { %v2914_v32 = vadd.f32 %v2689_v21, %v9873_v18  ;;  %v2916_v37 = vadd.f32 %v2760_v56, %v9874_v34 }
 0x557   :  { %v4667_v50 = vmul.f32 -1.442695, %v2913_v45  ;;  %v4669_v13 = vmul.f32 -1.442695, %v2915_v9  ;;  %v10059_v9 = vld [vmem:[#allocation152_spill] sm:$0xff] }
 0x558   :  { %v4668_v46 = vmul.f32 -1.442695, %v2914_v32  ;;  %v4670_v23 = vmul.f32 -1.442695, %v2916_v37  ;;  %v10060_v37 = vld [vmem:[#allocation151_spill] sm:$0xff] }
 0x559   :  { %7110 = vpow2.f32 %v4667_v50 }
 0x55a   :  { %7112 = vpow2.f32 %v4669_v13 }
 0x55b   :  { %7114 = vpow2.f32 %v4668_v46 }
 0x55c   :  { %7116 = vpow2.f32 %v4670_v23 }
 0x563   :  { %v7111_v4 = vpop.eup %7110 }
 0x564   :  { %v7113_v6 = vpop.eup %7112  ;;  %v2927_v55 = vadd.f32 1.0, %v7111_v4 }
 0x565   :  { %v7115_v40 = vpop.eup %7114  ;;  %v2939_v47 = vadd.f32 1.0, %v7113_v6 }
 0x566   :  { %v7117_v62 = vpop.eup %7116  ;;  %v2928_v54 = vadd.f32 1.0, %v7115_v40  ;;  %7118 = vrcp.f32 %v2927_v55 }
 0x567   :  { %v2940_v19 = vadd.f32 1.0, %v7117_v62  ;;  %7120 = vrcp.f32 %v2939_v47 }
 0x568   :  { %7122 = vrcp.f32 %v2928_v54 }
 0x569   :  { %7124 = vrcp.f32 %v2940_v19 }
 0x570   :  { %v7119_v55 = vpop.eup %7118 }
 0x571   :  { %v7121_v62 = vpop.eup %7120 }
 0x572   :  { %v7123_v54 = vpop.eup %7122 }
 0x573   :  { %v7125_v4 = vpop.eup %7124 }
 0x594   :  { %v2829_v21 = vpop.f32.mrb[14].mxu0  ;;  %v2900_v56 = vpop.f32.mrb[30].mxu1 }
 0x595   :  { %v2917_v45 = vadd.f32 %v2829_v21, %v9875_v58  ;;  %v2919_v50 = vadd.f32 %v2900_v56, %v10059_v9  ;;  %v2831_v32 = vpop.f32.mrb[15].mxu0  ;;  %v2902_v46 = vpop.f32.mrb[31].mxu1  ;;  %v2959_v56 = vmul.f32 %v7121_v62, %v8520_v16 }
 0x596   :  { %v2918_v13 = vadd.f32 %v2831_v32, %v10060_v37  ;;  %v2920_v23 = vadd.f32 %v2902_v46, %v8220_v36  ;;  %v2960_v32 = vmul.f32 %v7125_v4, %v8522_v39  ;;  %v10064_v4 = vld [vmem:[#allocation102_spill] sm:$0xff] }
 0x597   :  { %7126 = vtanh.f32 %v2917_v45  ;;  %v4671_v6 = vmul.f32 -1.442695, %v2919_v50 }
 0x598   :  { %7128 = vtanh.f32 %v2918_v13  ;;  %v4672_v40 = vmul.f32 -1.442695, %v2920_v23 }
 0x599   :  { %7130 = vpow2.f32 %v4671_v6 }
 0x59a   :  { %7132 = vpow2.f32 %v4672_v40 }
 0x5a1   :  { %v7127_v47 = vpop.eup %7126 }
 0x5a2   :  { %v7129_v21 = vpop.eup %7128  ;;  %v2961_v9 = vmul.f32 %v7127_v47, %v7119_v55  ;;  %v10065_v47 = vld [vmem:[#allocation130_spill] sm:$0xff] }
 0x5a3   :  { %v7131_v19 = vpop.eup %7130  ;;  %v2962_v37 = vmul.f32 %v7129_v21, %v7123_v54  ;;  %v10063_v54 = vld [vmem:[#allocation129_spill] sm:$0xff]  ;;  %v10066_v21 = vld [vmem:[#allocation104_spill] sm:$0xff] }
 0x5a4   :  { %v7133_v46 = vpop.eup %7132  ;;  %v8670_v45 = vadd.f32 %v2961_v9, %v2959_v56  ;;  %v2953_v50 = vadd.f32 1.0, %v7131_v19  ;;  %v10061_v9 = vld [vmem:[#allocation126_spill] sm:$0xff]  ;;  %v10067_v56 = vld [vmem:[#allocation133_spill] sm:$0xff] }
 0x5a5   :  { %v8672_v13 = vadd.f32 %v2962_v37, %v2960_v32  ;;  %v2954_v23 = vadd.f32 1.0, %v7133_v46  ;;  %v10062_v37 = vld [vmem:[#allocation100_spill] sm:$0xff]  ;;  %v10068_v19 = vld [vmem:[#allocation106_spill] sm:$0xff] }
 0x5a6   :  { %7134 = vtanh.f32 %v8670_v45  ;;  %v10069_v32 = vld [vmem:[#allocation134_spill] sm:$0xff]  ;;  %v10070_v46 = vld [vmem:[#allocation108_spill] sm:$0xff] }
 0x5a7   :  { %7136 = vrcp.f32 %v2953_v50  ;;  %v10071_v50 = vld [vmem:[#allocation137_spill] sm:$0xff] }
 0x5a8   :  { %7138 = vtanh.f32 %v8672_v13 }
 0x5a9   :  { %7140 = vrcp.f32 %v2954_v23  ;;  %v10072_v23 = vld [vmem:[#allocation110_spill] sm:$0xff] }
 0x5b0   :  { %v7135_v6 = vpop.eup %7134 }
 0x5b1   :  { %v7137_v16 = vpop.eup %7136 }
 0x5b2   :  { %v7139_v40 = vpop.eup %7138  ;;  %v8676_v39 = vmul.f32 %v7137_v16, %v7135_v6  ;;  %v10073_v6 = vld [vmem:[#allocation138_spill] sm:$0xff]  ;;  %v10074_v16 = vld [vmem:[#allocation112_spill] sm:$0xff] }
 0x5b3   :  { %v7141_v55 = vpop.eup %7140 }
 0x5b4   :  { %v2968_v62 = vmul.f32 %v7141_v55, %v7139_v40  ;;  %v10075_v40 = vld [vmem:[#allocation141_spill] sm:$0xff]  ;;  %v10076_v55 = vld [vmem:[#allocation114_spill] sm:$0xff] }
 0x5b6   :  { %3057 = vmatprep.mubr.f32.mxu0 %v2968_v62  ;;  %3128 = vmatprep.mubr.f32.mxu1 %v2968_v62 }
 0x5b7   :  { %3058 = vmatmul.mubr.f32.vlgmr.msra.gmra.mrb[30].mxu0 %v8676_v39  ;;  %3129 = vmatmul.mubr.f32.vlgmr.msra.gmra.mrb[16].mxu1 %v8676_v39 }
 0x5b8   :  { %5952 = vmatpush1.bf16.msra.mxu0 %v9785_v11  ;;  %6016 = vmatpush1.bf16.msra.mxu1 %v9786_v57 }
 0x5b9   :  { %3199 = vmatprep.mubr.f32.mxu0 %v2968_v62  ;;  %3270 = vmatprep.mubr.f32.mxu1 %v2968_v62  ;;  %v10077_v62 = vld [vmem:[#allocation142_spill] sm:$0xff] }
 0x5ba   :  { %5954 = vmatprep.subr.bf16.mxu0 %v9787_v44  ;;  %6018 = vmatprep.subr.bf16.mxu1 %v9788_v14 }
 0x5bc   :  { %5956 = vmatpush1.bf16.msra.mxu0 %v9789_v51  ;;  %6020 = vmatpush1.bf16.msra.mxu1 %v9790_v49 }
 0x5bd   :  { %5958 = vmatprep.subr.bf16.mxu0 %v9877_v20  ;;  %6022 = vmatprep.subr.bf16.mxu1 %v9878_v5 }
 0x5c0   :  { %5960 = vmatpush1.bf16.msra.mxu0 %v9793_v2  ;;  %6024 = vmatpush1.bf16.msra.mxu1 %v9879_v43 }
 0x5c1   :  { %5962 = vmatprep.subr.bf16.mxu0 %v9795_v27  ;;  %6026 = vmatprep.subr.bf16.mxu1 %v9880_v10 }
 0x5c4   :  { %5964 = vmatpush1.bf16.msra.mxu0 %v9797_v33  ;;  %6028 = vmatpush1.bf16.msra.mxu1 %v9881_v29 }
 0x5c5   :  { %5966 = vmatprep.subr.bf16.mxu0 %v9799_v35  ;;  %6030 = vmatprep.subr.bf16.mxu1 %v9882_v15 }
 0x5c8   :  { %5968 = vmatpush1.bf16.msra.mxu0 %v9801_v60  ;;  %6032 = vmatpush1.bf16.msra.mxu1 %v9883_v30 }
 0x5c9   :  { %5970 = vmatprep.subr.bf16.mxu0 %v9803_v53  ;;  %6034 = vmatprep.subr.bf16.mxu1 %v9884_v48 }
 0x5cc   :  { %5972 = vmatpush1.bf16.msra.mxu0 %v9804_v3  ;;  %6036 = vmatpush1.bf16.msra.mxu1 %v9885_v22 }
 0x5cd   :  { %5974 = vmatprep.subr.bf16.mxu0 %v9805_v42  ;;  %6038 = vmatprep.subr.bf16.mxu1 %v9886_v25 }
 0x5d0   :  { %5976 = vmatpush1.bf16.msra.mxu0 %v9806_v38  ;;  %6040 = vmatpush1.bf16.msra.mxu1 %v9887_v8 }
 0x5d1   :  { %5978 = vmatprep.subr.bf16.mxu0 %v9807_v26  ;;  %6042 = vmatprep.subr.bf16.mxu1 %v9888_v1 }
 0x5d4   :  { %5980 = vmatpush1.bf16.msra.mxu0 %v9969_v61  ;;  %6044 = vmatpush1.bf16.msra.mxu1 %v9889_v24 }
 0x5d5   :  { %5982 = vmatprep.subr.bf16.mxu0 %v9970_v7  ;;  %6046 = vmatprep.subr.bf16.mxu1 %v9890_v31 }
 0x5d8   :  { %5984 = vmatpush1.bf16.msra.mxu0 %v9810_v41  ;;  %6048 = vmatpush1.bf16.msra.mxu1 %v9891_v17 }
 0x5d9   :  { %5986 = vmatprep.subr.bf16.mxu0 %v9971_v12  ;;  %6050 = vmatprep.subr.bf16.mxu1 %v9892_v28 }
 0x5dc   :  { %5988 = vmatpush1.bf16.msra.mxu0 %v9972_v52  ;;  %6052 = vmatpush1.bf16.msra.mxu1 %v9893_v59 }
 0x5dd   :  { %5990 = vmatprep.subr.bf16.mxu0 %v9973_v0  ;;  %6054 = vmatprep.subr.bf16.mxu1 %v10061_v9 }
 0x5e0   :  { %5992 = vmatpush1.bf16.msra.mxu0 %v10062_v37  ;;  %6056 = vmatpush1.bf16.msra.mxu1 %v10063_v54 }
 0x5e1   :  { %5994 = vmatprep.subr.bf16.mxu0 %v10064_v4  ;;  %6058 = vmatprep.subr.bf16.mxu1 %v10065_v47  ;;  %v10151_v47 = vld [vmem:[#allocation128_spill] sm:$0xff]  ;;  %v10152_v4 = vld [vmem:[#allocation146_spill] sm:$0xff] }
 0x5e4   :  { %5996 = vmatpush1.bf16.msra.mxu0 %v10066_v21  ;;  %6060 = vmatpush1.bf16.msra.mxu1 %v10067_v56  ;;  %v10078_v56 = vld [vmem:[#allocation116_spill] sm:$0xff] }
 0x5e5   :  { %5998 = vmatprep.subr.bf16.mxu0 %v10068_v19  ;;  %6062 = vmatprep.subr.bf16.mxu1 %v10069_v32  ;;  %v10079_v19 = vld [vmem:[#allocation143_spill] sm:$0xff]  ;;  %v10080_v32 = vld [vmem:[#allocation118_spill] sm:$0xff] }
 0x5e8   :  { %6000 = vmatpush1.bf16.msra.mxu0 %v10070_v46  ;;  %6064 = vmatpush1.bf16.msra.mxu1 %v10071_v50  ;;  %v10081_v46 = vld [vmem:[#allocation144_spill] sm:$0xff] }
 0x5e9   :  { %6002 = vmatprep.subr.bf16.mxu0 %v10072_v23  ;;  %6066 = vmatprep.subr.bf16.mxu1 %v10073_v6  ;;  %v10082_v50 = vld [vmem:[#allocation120_spill] sm:$0xff]  ;;  %v10083_v23 = vld [vmem:[#allocation145_spill] sm:$0xff]  ;;  %v10084_v6 = vld [vmem:[#allocation10_spill] sm:$0xff] }
 0x5ec   :  { %6004 = vmatpush1.bf16.msra.mxu0 %v10074_v16  ;;  %6068 = vmatpush1.bf16.msra.mxu1 %v10075_v40  ;;  %v10085_v16 = vld [vmem:[#allocation15_spill] sm:$0xff] }
 0x5ed   :  { %6006 = vmatprep.subr.bf16.mxu0 %v10076_v55  ;;  %6070 = vmatprep.subr.bf16.mxu1 %v10077_v62  ;;  %v10086_v62 = vld [vmem:[#allocation11_spill] sm:$0xff]  ;;  %v10095_v55 = vld [vmem:[#allocation37_spill] sm:$0xff] }
 0x5ee   :  { %v10150_v40 = vld [vmem:[#allocation127_spill] sm:$0xff] }
 0x5f0   :  { %6008 = vmatpush1.bf16.msra.mxu0 %v10078_v56  ;;  %6072 = vmatpush1.bf16.msra.mxu1 %v10079_v19  ;;  %v10087_v56 = vld [vmem:[#allocation29_spill] sm:$0xff]  ;;  %v10088_v19 = vld [vmem:[#allocation12_spill] sm:$0xff] }
 0x5f1   :  { %6010 = vmatprep.subr.bf16.mxu0 %v10080_v32  ;;  %6074 = vmatprep.subr.bf16.mxu1 %v10081_v46  ;;  %v10089_v32 = vld [vmem:[#allocation31_spill] sm:$0xff]  ;;  %v10090_v46 = vld [vmem:[#allocation13_spill] sm:$0xff] }
 0x5f4   :  { %6012 = vmatpush1.bf16.msra.mxu0 %v10082_v50  ;;  %6076 = vmatpush1.bf16.msra.mxu1 %v10083_v23  ;;  %v10091_v50 = vld [vmem:[#allocation33_spill] sm:$0xff]  ;;  %v10092_v23 = vld [vmem:[#allocation14_spill] sm:$0xff] }
 0x5f5   :  { %6078 = vmatprep.subr.bf16.mxu0 %v10084_v6  ;;  %6142 = vmatprep.subr.bf16.mxu1 %v10085_v16  ;;  %v10093_v6 = vld [vmem:[#allocation35_spill] sm:$0xff]  ;;  %v10094_v16 = vld [vmem:[#allocation16_spill] sm:$0xff] }
 0x5f7   :  { %3200 = vmatmul.mubr.f32.vlgmr.msra.gmra.mrb[16].mxu0 %v8676_v39  ;;  %3271 = vmatmul.mubr.f32.vlgmr.msra.gmra.mrb[32].mxu1 %v8676_v39  ;;  %v10096_v39 = vld [vmem:[#allocation17_spill] sm:$0xff] }
 0x5f8   :  { %6080 = vmatpush1.bf16.msra.mxu0 %v10086_v62  ;;  %6144 = vmatpush1.bf16.msra.mxu1 %v10087_v56  ;;  %v10097_v62 = vld [vmem:[#allocation39_spill] sm:$0xff]  ;;  %v10098_v56 = vld [vmem:[#allocation18_spill] sm:$0xff] }
 0x5f9   :  { %6082 = vmatprep.subr.bf16.mxu0 %v10088_v19  ;;  %6146 = vmatprep.subr.bf16.mxu1 %v10089_v32  ;;  %v10099_v19 = vld [vmem:[#allocation41_spill] sm:$0xff]  ;;  %v10100_v32 = vld [vmem:[#allocation19_spill] sm:$0xff] }
 0x5fc   :  { %6084 = vmatpush1.bf16.msra.mxu0 %v10090_v46  ;;  %6148 = vmatpush1.bf16.msra.mxu1 %v10091_v50  ;;  %v10101_v46 = vld [vmem:[#allocation43_spill] sm:$0xff]  ;;  %v10102_v50 = vld [vmem:[#allocation20_spill] sm:$0xff] }
 0x5fd   :  { %6086 = vmatprep.subr.bf16.mxu0 %v10092_v23  ;;  %6150 = vmatprep.subr.bf16.mxu1 %v10093_v6  ;;  %v10103_v23 = vld [vmem:[#allocation45_spill] sm:$0xff] }
 0x5fe   :  { %v10104_v6 = vld [vmem:[#allocation21_spill] sm:$0xff] }
 0x600   :  { %6088 = vmatpush1.bf16.msra.mxu0 %v10094_v16  ;;  %6152 = vmatpush1.bf16.msra.mxu1 %v10095_v55  ;;  %v10105_v16 = vld [vmem:[#allocation47_spill] sm:$0xff]  ;;  %v10106_v55 = vld [vmem:[#allocation22_spill] sm:$0xff] }
 0x601   :  { %6090 = vmatprep.subr.bf16.mxu0 %v10096_v39  ;;  %6154 = vmatprep.subr.bf16.mxu1 %v10097_v62  ;;  %v10107_v39 = vld [vmem:[#allocation49_spill] sm:$0xff]  ;;  %v10108_v62 = vld [vmem:[#allocation23_spill] sm:$0xff] }
 0x604   :  { %6092 = vmatpush1.bf16.msra.mxu0 %v10098_v56  ;;  %6156 = vmatpush1.bf16.msra.mxu1 %v10099_v19  ;;  %v10109_v56 = vld [vmem:[#allocation51_spill] sm:$0xff]  ;;  %v10110_v19 = vld [vmem:[#allocation24_spill] sm:$0xff] }
 0x605   :  { %6094 = vmatprep.subr.bf16.mxu0 %v10100_v32  ;;  %6158 = vmatprep.subr.bf16.mxu1 %v10101_v46  ;;  %v10111_v32 = vld [vmem:[#allocation53_spill] sm:$0xff] }
 0x606   :  { %v10112_v46 = vld [vmem:[#allocation25_spill] sm:$0xff] }
 0x608   :  { %6096 = vmatpush1.bf16.msra.mxu0 %v10102_v50  ;;  %6160 = vmatpush1.bf16.msra.mxu1 %v10103_v23  ;;  %v10113_v50 = vld [vmem:[#allocation55_spill] sm:$0xff]  ;;  %v10114_v23 = vld [vmem:[#allocation26_spill] sm:$0xff] }
 0x609   :  { %6098 = vmatprep.subr.bf16.mxu0 %v10104_v6  ;;  %6162 = vmatprep.subr.bf16.mxu1 %v10105_v16  ;;  %v10115_v6 = vld [vmem:[#allocation57_spill] sm:$0xff]  ;;  %v10116_v16 = vld [vmem:[#allocation27_spill] sm:$0xff] }
 0x60c   :  { %6100 = vmatpush1.bf16.msra.mxu0 %v10106_v55  ;;  %6164 = vmatpush1.bf16.msra.mxu1 %v10107_v39  ;;  %v10117_v55 = vld [vmem:[#allocation58_spill] sm:$0xff]  ;;  %v10118_v39 = vld [vmem:[#allocation28_spill] sm:$0xff] }
 0x60d   :  { %6102 = vmatprep.subr.bf16.mxu0 %v10108_v62  ;;  %6166 = vmatprep.subr.bf16.mxu1 %v10109_v56  ;;  %v10119_v62 = vld [vmem:[#allocation60_spill] sm:$0xff]  ;;  %v10120_v56 = vld [vmem:[#allocation30_spill] sm:$0xff] }
 0x610   :  { %6104 = vmatpush1.bf16.msra.mxu0 %v10110_v19  ;;  %6168 = vmatpush1.bf16.msra.mxu1 %v10111_v32  ;;  %v10121_v19 = vld [vmem:[#allocation62_spill] sm:$0xff]  ;;  %v10122_v32 = vld [vmem:[#allocation32_spill] sm:$0xff] }
 0x611   :  { %6106 = vmatprep.subr.bf16.mxu0 %v10112_v46  ;;  %6170 = vmatprep.subr.bf16.mxu1 %v10113_v50  ;;  %v10123_v46 = vld [vmem:[#allocation64_spill] sm:$0xff]  ;;  %v10124_v50 = vld [vmem:[#allocation34_spill] sm:$0xff] }
 0x614   :  { %6108 = vmatpush1.bf16.msra.mxu0 %v10114_v23  ;;  %6172 = vmatpush1.bf16.msra.mxu1 %v10115_v6  ;;  %v10125_v23 = vld [vmem:[#allocation66_spill] sm:$0xff]  ;;  %v10126_v6 = vld [vmem:[#allocation36_spill] sm:$0xff] }
 0x615   :  { %6110 = vmatprep.subr.bf16.mxu0 %v10116_v16  ;;  %6174 = vmatprep.subr.bf16.mxu1 %v10117_v55  ;;  %v10127_v16 = vld [vmem:[#allocation68_spill] sm:$0xff]  ;;  %v10128_v55 = vld [vmem:[#allocation38_spill] sm:$0xff] }
 0x618   :  { %6112 = vmatpush1.bf16.msra.mxu0 %v10118_v39  ;;  %6176 = vmatpush1.bf16.msra.mxu1 %v10119_v62  ;;  %v10129_v39 = vld [vmem:[#allocation70_spill] sm:$0xff]  ;;  %v10130_v62 = vld [vmem:[#allocation40_spill] sm:$0xff] }
 0x619   :  { %6114 = vmatprep.subr.bf16.mxu0 %v10120_v56  ;;  %6178 = vmatprep.subr.bf16.mxu1 %v10121_v19  ;;  %v10131_v56 = vld [vmem:[#allocation72_spill] sm:$0xff]  ;;  %v10132_v19 = vld [vmem:[#allocation42_spill] sm:$0xff] }
 0x61c   :  { %6116 = vmatpush1.bf16.msra.mxu0 %v10122_v32  ;;  %6180 = vmatpush1.bf16.msra.mxu1 %v10123_v46  ;;  %v10133_v32 = vld [vmem:[#allocation74_spill] sm:$0xff]  ;;  %v10134_v46 = vld [vmem:[#allocation44_spill] sm:$0xff] }
 0x61d   :  { %6118 = vmatprep.subr.bf16.mxu0 %v10124_v50  ;;  %6182 = vmatprep.subr.bf16.mxu1 %v10125_v23  ;;  %v10135_v50 = vld [vmem:[#allocation76_spill] sm:$0xff]  ;;  %v10136_v23 = vld [vmem:[#allocation46_spill] sm:$0xff] }
 0x620   :  { %6120 = vmatpush1.bf16.msra.mxu0 %v10126_v6  ;;  %6184 = vmatpush1.bf16.msra.mxu1 %v10127_v16  ;;  %v10137_v6 = vld [vmem:[#allocation78_spill] sm:$0xff]  ;;  %v10138_v16 = vld [vmem:[#allocation48_spill] sm:$0xff] }
 0x621   :  { %6122 = vmatprep.subr.bf16.mxu0 %v10128_v55  ;;  %6186 = vmatprep.subr.bf16.mxu1 %v10129_v39  ;;  %v10139_v55 = vld [vmem:[#allocation80_spill] sm:$0xff]  ;;  %v10140_v39 = vld [vmem:[#allocation50_spill] sm:$0xff] }
 0x624   :  { %6124 = vmatpush1.bf16.msra.mxu0 %v10130_v62  ;;  %6188 = vmatpush1.bf16.msra.mxu1 %v10131_v56  ;;  %v10141_v62 = vld [vmem:[#allocation82_spill] sm:$0xff]  ;;  %v10142_v56 = vld [vmem:[#allocation52_spill] sm:$0xff] }
 0x625   :  { %6126 = vmatprep.subr.bf16.mxu0 %v10132_v19  ;;  %6190 = vmatprep.subr.bf16.mxu1 %v10133_v32  ;;  %v10143_v19 = vld [vmem:[#allocation84_spill] sm:$0xff]  ;;  %v10144_v32 = vld [vmem:[#allocation54_spill] sm:$0xff] }
 0x628   :  { %6128 = vmatpush1.bf16.msra.mxu0 %v10134_v46  ;;  %6192 = vmatpush1.bf16.msra.mxu1 %v10135_v50  ;;  %v10145_v46 = vld [vmem:[#allocation86_spill] sm:$0xff]  ;;  %v10146_v50 = vld [vmem:[#allocation56_spill] sm:$0xff] }
 0x629   :  { %6130 = vmatprep.subr.bf16.mxu0 %v10136_v23  ;;  %6194 = vmatprep.subr.bf16.mxu1 %v10137_v6  ;;  %v10147_v23 = vld [vmem:[#allocation88_spill] sm:$0xff]  ;;  %v10148_v6 = vld [vmem:[#allocation59_spill] sm:$0xff] }
 0x62c   :  { %6132 = vmatpush1.bf16.msra.mxu0 %v10138_v16  ;;  %6196 = vmatpush1.bf16.msra.mxu1 %v10139_v55  ;;  %v10149_v16 = vld [vmem:[#allocation91_spill] sm:$0xff] }
 0x62d   :  { %6134 = vmatprep.subr.bf16.mxu0 %v10140_v39  ;;  %6198 = vmatprep.subr.bf16.mxu1 %v10141_v62 }
 0x630   :  { %6136 = vmatpush1.bf16.msra.mxu0 %v10142_v56  ;;  %6200 = vmatpush1.bf16.msra.mxu1 %v10143_v19 }
 0x631   :  { %6138 = vmatprep.subr.bf16.mxu0 %v10144_v32  ;;  %6202 = vmatprep.subr.bf16.mxu1 %v10145_v46 }
 0x634   :  { %6140 = vmatpush1.bf16.msra.mxu0 %v10146_v50  ;;  %6204 = vmatpush1.bf16.msra.mxu1 %v10147_v23 }
 0x635   :  { %6206 = vmatprep.subr.bf16.mxu0 %v10148_v6  ;;  %6270 = vmatprep.subr.bf16.mxu1 %v10149_v16 }
 0x68a   :  { %v3059_v55 = vpop.f32.mrb[30].mxu0  ;;  %v3130_v39 = vpop.f32.mrb[16].mxu1 }
 0x68b   :  { %v6881_v62 = vadd.f32 %v3059_v55, %v10150_v40  ;;  %v3061_v21 = vpop.f32.mrb[31].mxu0  ;;  %v3132_v56 = vpop.f32.mrb[17].mxu1  ;;  %v3287_v32 = vadd.f32 %v3130_v39, %v8200_v63 }
 0x68c   :  { %v6882_v19 = vadd.f32 %v3061_v21, %v10151_v47  ;;  %v3288_v46 = vadd.f32 %v3132_v56, %v9874_v34 }
 0x68d   :  { %v3285_v50 = vadd.f32 %v6881_v62, %v10152_v4  ;;  %v4675_v54 = vmul.f32 -1.442695, %v3287_v32 }
 0x68e   :  { %v3286_v23 = vadd.f32 %v6882_v19, %v9873_v18  ;;  %v4676_v6 = vmul.f32 -1.442695, %v3288_v46  ;;  %v10153_v46 = vld [vmem:[#allocation152_spill] sm:$0xff] }
 0x68f   :  { %v4673_v37 = vmul.f32 -1.442695, %v3285_v50  ;;  %7142 = vpow2.f32 %v4675_v54 }
 0x690   :  { %v4674_v16 = vmul.f32 -1.442695, %v3286_v23  ;;  %7144 = vpow2.f32 %v4676_v6  ;;  %v10154_v23 = vld [vmem:[#allocation151_spill] sm:$0xff] }
 0x691   :  { %7146 = vpow2.f32 %v4673_v37 }
 0x692   :  { %7148 = vpow2.f32 %v4674_v16 }
 0x699   :  { %v7143_v40 = vpop.eup %7142 }
 0x69a   :  { %v7145_v55 = vpop.eup %7144  ;;  %v3311_v21 = vadd.f32 1.0, %v7143_v40 }
 0x69b   :  { %v7147_v9 = vpop.eup %7146  ;;  %v3312_v39 = vadd.f32 1.0, %v7145_v55 }
 0x69c   :  { %v7149_v47 = vpop.eup %7148  ;;  %v3299_v63 = vadd.f32 1.0, %v7147_v9  ;;  %7150 = vrcp.f32 %v3311_v21 }
 0x69d   :  { %v3300_v56 = vadd.f32 1.0, %v7149_v47  ;;  %7152 = vrcp.f32 %v3312_v39 }
 0x69e   :  { %7154 = vrcp.f32 %v3299_v63 }
 0x69f   :  { %7156 = vrcp.f32 %v3300_v56 }
 0x6a6   :  { %v7151_v55 = vpop.eup %7150 }
 0x6a7   :  { %v7153_v47 = vpop.eup %7152 }
 0x6a8   :  { %v7155_v63 = vpop.eup %7154 }
 0x6a9   :  { %v7157_v21 = vpop.eup %7156 }
 0x6ca   :  { %v3201_v62 = vpop.f32.mrb[16].mxu0  ;;  %v3272_v19 = vpop.f32.mrb[32].mxu1 }
 0x6cb   :  { %v3289_v32 = vadd.f32 %v3201_v62, %v9875_v58  ;;  %v3291_v54 = vadd.f32 %v3272_v19, %v10153_v46  ;;  %v3203_v50 = vpop.f32.mrb[17].mxu0  ;;  %v3274_v37 = vpop.f32.mrb[33].mxu1  ;;  %v3331_v19 = vmul.f32 %v7151_v55, %v8670_v45 }
 0x6cc   :  { %v3290_v6 = vadd.f32 %v3203_v50, %v10154_v23  ;;  %v3292_v16 = vadd.f32 %v3274_v37, %v8220_v36  ;;  %v3332_v50 = vmul.f32 %v7153_v47, %v8672_v13  ;;  %v10157_v47 = vld [vmem:[#allocation129_spill] sm:$0xff] }
 0x6cd   :  { %7158 = vtanh.f32 %v3289_v32  ;;  %v4677_v40 = vmul.f32 -1.442695, %v3291_v54 }
 0x6ce   :  { %7160 = vtanh.f32 %v3290_v6  ;;  %v4678_v9 = vmul.f32 -1.442695, %v3292_v16 }
 0x6cf   :  { %7162 = vpow2.f32 %v4677_v40 }
 0x6d0   :  { %7164 = vpow2.f32 %v4678_v9 }
 0x6d7   :  { %v7159_v39 = vpop.eup %7158 }
 0x6d8   :  { %v7161_v62 = vpop.eup %7160  ;;  %v3333_v46 = vmul.f32 %v7159_v39, %v7155_v63  ;;  %v10159_v39 = vld [vmem:[#allocation130_spill] sm:$0xff] }
 0x6d9   :  { %v7163_v56 = vpop.eup %7162  ;;  %v3334_v23 = vmul.f32 %v7161_v62, %v7157_v21  ;;  %v10158_v21 = vld [vmem:[#allocation102_spill] sm:$0xff]  ;;  %v10160_v62 = vld [vmem:[#allocation104_spill] sm:$0xff] }
 0x6da   :  { %v7165_v37 = vpop.eup %7164  ;;  %v8822_v32 = vadd.f32 %v3333_v46, %v3331_v19  ;;  %v3325_v54 = vadd.f32 1.0, %v7163_v56  ;;  %v10155_v46 = vld [vmem:[#allocation126_spill] sm:$0xff]  ;;  %v10161_v19 = vld [vmem:[#allocation133_spill] sm:$0xff] }
 0x6db   :  { %v8824_v6 = vadd.f32 %v3334_v23, %v3332_v50  ;;  %v3326_v16 = vadd.f32 1.0, %v7165_v37  ;;  %v10156_v23 = vld [vmem:[#allocation100_spill] sm:$0xff]  ;;  %v10162_v56 = vld [vmem:[#allocation106_spill] sm:$0xff] }
 0x6dc   :  { %7166 = vtanh.f32 %v8822_v32  ;;  %v10163_v50 = vld [vmem:[#allocation134_spill] sm:$0xff]  ;;  %v10164_v37 = vld [vmem:[#allocation108_spill] sm:$0xff] }
 0x6dd   :  { %7168 = vrcp.f32 %v3325_v54  ;;  %v10165_v54 = vld [vmem:[#allocation137_spill] sm:$0xff] }
 0x6de   :  { %7170 = vtanh.f32 %v8824_v6 }
 0x6df   :  { %7172 = vrcp.f32 %v3326_v16  ;;  %v10166_v16 = vld [vmem:[#allocation110_spill] sm:$0xff] }
 0x6e6   :  { %v7167_v40 = vpop.eup %7166 }
 0x6e7   :  { %v7169_v45 = vpop.eup %7168 }
 0x6e8   :  { %v7171_v9 = vpop.eup %7170  ;;  %v8828_v13 = vmul.f32 %v7169_v45, %v7167_v40  ;;  %v10167_v40 = vld [vmem:[#allocation138_spill] sm:$0xff]  ;;  %v10168_v45 = vld [vmem:[#allocation112_spill] sm:$0xff] }
 0x6e9   :  { %v7173_v55 = vpop.eup %7172 }
 0x6ea   :  { %v3340_v63 = vmul.f32 %v7173_v55, %v7171_v9  ;;  %v10169_v9 = vld [vmem:[#allocation141_spill] sm:$0xff]  ;;  %v10170_v55 = vld [vmem:[#allocation114_spill] sm:$0xff] }
 0x6ec   :  { %3429 = vmatprep.mubr.f32.mxu0 %v3340_v63  ;;  %3500 = vmatprep.mubr.f32.mxu1 %v3340_v63 }
 0x6ed   :  { %3430 = vmatmul.mubr.f32.vlgmr.msra.gmra.mrb[28].mxu0 %v8828_v13  ;;  %3501 = vmatmul.mubr.f32.vlgmr.msra.gmra.mrb[18].mxu1 %v8828_v13 }
 0x6ee   :  { %6208 = vmatpush1.bf16.msra.mxu0 %v9785_v11  ;;  %6272 = vmatpush1.bf16.msra.mxu1 %v9786_v57 }
 0x6ef   :  { %3571 = vmatprep.mubr.f32.mxu0 %v3340_v63  ;;  %3642 = vmatprep.mubr.f32.mxu1 %v3340_v63  ;;  %v10171_v63 = vld [vmem:[#allocation142_spill] sm:$0xff] }
 0x6f0   :  { %6210 = vmatprep.subr.bf16.mxu0 %v9787_v44  ;;  %6274 = vmatprep.subr.bf16.mxu1 %v9788_v14 }
 0x6f2   :  { %6212 = vmatpush1.bf16.msra.mxu0 %v9789_v51  ;;  %6276 = vmatpush1.bf16.msra.mxu1 %v9790_v49 }
 0x6f3   :  { %6214 = vmatprep.subr.bf16.mxu0 %v9877_v20  ;;  %6278 = vmatprep.subr.bf16.mxu1 %v9878_v5 }
 0x6f6   :  { %6216 = vmatpush1.bf16.msra.mxu0 %v9793_v2  ;;  %6280 = vmatpush1.bf16.msra.mxu1 %v9879_v43 }
 0x6f7   :  { %6218 = vmatprep.subr.bf16.mxu0 %v9795_v27  ;;  %6282 = vmatprep.subr.bf16.mxu1 %v9880_v10 }
 0x6fa   :  { %6220 = vmatpush1.bf16.msra.mxu0 %v9797_v33  ;;  %6284 = vmatpush1.bf16.msra.mxu1 %v9881_v29 }
 0x6fb   :  { %6222 = vmatprep.subr.bf16.mxu0 %v9799_v35  ;;  %6286 = vmatprep.subr.bf16.mxu1 %v9882_v15 }
 0x6fe   :  { %6224 = vmatpush1.bf16.msra.mxu0 %v9801_v60  ;;  %6288 = vmatpush1.bf16.msra.mxu1 %v9883_v30 }
 0x6ff   :  { %6226 = vmatprep.subr.bf16.mxu0 %v9803_v53  ;;  %6290 = vmatprep.subr.bf16.mxu1 %v9884_v48 }
 0x702   :  { %6228 = vmatpush1.bf16.msra.mxu0 %v9804_v3  ;;  %6292 = vmatpush1.bf16.msra.mxu1 %v9885_v22 }
 0x703   :  { %6230 = vmatprep.subr.bf16.mxu0 %v9805_v42  ;;  %6294 = vmatprep.subr.bf16.mxu1 %v9886_v25 }
 0x706   :  { %6232 = vmatpush1.bf16.msra.mxu0 %v9806_v38  ;;  %6296 = vmatpush1.bf16.msra.mxu1 %v9887_v8 }
 0x707   :  { %6234 = vmatprep.subr.bf16.mxu0 %v9807_v26  ;;  %6298 = vmatprep.subr.bf16.mxu1 %v9888_v1 }
 0x70a   :  { %6236 = vmatpush1.bf16.msra.mxu0 %v9969_v61  ;;  %6300 = vmatpush1.bf16.msra.mxu1 %v9889_v24 }
 0x70b   :  { %6238 = vmatprep.subr.bf16.mxu0 %v9970_v7  ;;  %6302 = vmatprep.subr.bf16.mxu1 %v9890_v31 }
 0x70e   :  { %6240 = vmatpush1.bf16.msra.mxu0 %v9810_v41  ;;  %6304 = vmatpush1.bf16.msra.mxu1 %v9891_v17 }
 0x70f   :  { %6242 = vmatprep.subr.bf16.mxu0 %v9971_v12  ;;  %6306 = vmatprep.subr.bf16.mxu1 %v9892_v28 }
 0x712   :  { %6244 = vmatpush1.bf16.msra.mxu0 %v9972_v52  ;;  %6308 = vmatpush1.bf16.msra.mxu1 %v9893_v59 }
 0x713   :  { %6246 = vmatprep.subr.bf16.mxu0 %v9973_v0  ;;  %6310 = vmatprep.subr.bf16.mxu1 %v10155_v46 }
 0x716   :  { %6248 = vmatpush1.bf16.msra.mxu0 %v10156_v23  ;;  %6312 = vmatpush1.bf16.msra.mxu1 %v10157_v47 }
 0x717   :  { %6250 = vmatprep.subr.bf16.mxu0 %v10158_v21  ;;  %6314 = vmatprep.subr.bf16.mxu1 %v10159_v39  ;;  %v10245_v39 = vld [vmem:[#allocation132_spill] sm:$0xff] }
 0x718   :  { %v10246_v21 = vld [vmem:[#allocation148_spill] sm:$0xff] }
 0x71a   :  { %6252 = vmatpush1.bf16.msra.mxu0 %v10160_v62  ;;  %6316 = vmatpush1.bf16.msra.mxu1 %v10161_v19  ;;  %v10172_v19 = vld [vmem:[#allocation116_spill] sm:$0xff] }
 0x71b   :  { %6254 = vmatprep.subr.bf16.mxu0 %v10162_v56  ;;  %6318 = vmatprep.subr.bf16.mxu1 %v10163_v50  ;;  %v10173_v56 = vld [vmem:[#allocation143_spill] sm:$0xff]  ;;  %v10174_v50 = vld [vmem:[#allocation118_spill] sm:$0xff] }
 0x71e   :  { %6256 = vmatpush1.bf16.msra.mxu0 %v10164_v37  ;;  %6320 = vmatpush1.bf16.msra.mxu1 %v10165_v54  ;;  %v10175_v37 = vld [vmem:[#allocation144_spill] sm:$0xff] }
 0x71f   :  { %6258 = vmatprep.subr.bf16.mxu0 %v10166_v16  ;;  %6322 = vmatprep.subr.bf16.mxu1 %v10167_v40  ;;  %v10176_v54 = vld [vmem:[#allocation120_spill] sm:$0xff]  ;;  %v10177_v16 = vld [vmem:[#allocation145_spill] sm:$0xff]  ;;  %v10178_v40 = vld [vmem:[#allocation10_spill] sm:$0xff] }
 0x722   :  { %6260 = vmatpush1.bf16.msra.mxu0 %v10168_v45  ;;  %6324 = vmatpush1.bf16.msra.mxu1 %v10169_v9  ;;  %v10179_v45 = vld [vmem:[#allocation15_spill] sm:$0xff] }
 0x723   :  { %6262 = vmatprep.subr.bf16.mxu0 %v10170_v55  ;;  %6326 = vmatprep.subr.bf16.mxu1 %v10171_v63  ;;  %v10180_v63 = vld [vmem:[#allocation11_spill] sm:$0xff]  ;;  %v10189_v55 = vld [vmem:[#allocation37_spill] sm:$0xff] }
 0x724   :  { %v10244_v9 = vld [vmem:[#allocation131_spill] sm:$0xff] }
 0x726   :  { %6264 = vmatpush1.bf16.msra.mxu0 %v10172_v19  ;;  %6328 = vmatpush1.bf16.msra.mxu1 %v10173_v56  ;;  %v10181_v19 = vld [vmem:[#allocation29_spill] sm:$0xff]  ;;  %v10182_v56 = vld [vmem:[#allocation12_spill] sm:$0xff] }
 0x727   :  { %6266 = vmatprep.subr.bf16.mxu0 %v10174_v50  ;;  %6330 = vmatprep.subr.bf16.mxu1 %v10175_v37  ;;  %v10183_v50 = vld [vmem:[#allocation31_spill] sm:$0xff]  ;;  %v10184_v37 = vld [vmem:[#allocation13_spill] sm:$0xff] }
 0x72a   :  { %6268 = vmatpush1.bf16.msra.mxu0 %v10176_v54  ;;  %6332 = vmatpush1.bf16.msra.mxu1 %v10177_v16  ;;  %v10185_v54 = vld [vmem:[#allocation33_spill] sm:$0xff]  ;;  %v10186_v16 = vld [vmem:[#allocation14_spill] sm:$0xff] }
 0x72b   :  { %6334 = vmatprep.subr.bf16.mxu0 %v10178_v40  ;;  %6398 = vmatprep.subr.bf16.mxu1 %v10179_v45  ;;  %v10187_v40 = vld [vmem:[#allocation35_spill] sm:$0xff]  ;;  %v10188_v45 = vld [vmem:[#allocation16_spill] sm:$0xff] }
 0x72d   :  { %3572 = vmatmul.mubr.f32.vlgmr.msra.gmra.mrb[18].mxu0 %v8828_v13  ;;  %3643 = vmatmul.mubr.f32.vlgmr.msra.gmra.mrb[34].mxu1 %v8828_v13  ;;  %v10190_v13 = vld [vmem:[#allocation17_spill] sm:$0xff] }
 0x72e   :  { %6336 = vmatpush1.bf16.msra.mxu0 %v10180_v63  ;;  %6400 = vmatpush1.bf16.msra.mxu1 %v10181_v19  ;;  %v10191_v63 = vld [vmem:[#allocation39_spill] sm:$0xff]  ;;  %v10192_v19 = vld [vmem:[#allocation18_spill] sm:$0xff] }
 0x72f   :  { %6338 = vmatprep.subr.bf16.mxu0 %v10182_v56  ;;  %6402 = vmatprep.subr.bf16.mxu1 %v10183_v50  ;;  %v10193_v56 = vld [vmem:[#allocation41_spill] sm:$0xff]  ;;  %v10194_v50 = vld [vmem:[#allocation19_spill] sm:$0xff] }
 0x732   :  { %6340 = vmatpush1.bf16.msra.mxu0 %v10184_v37  ;;  %6404 = vmatpush1.bf16.msra.mxu1 %v10185_v54  ;;  %v10195_v37 = vld [vmem:[#allocation43_spill] sm:$0xff]  ;;  %v10196_v54 = vld [vmem:[#allocation20_spill] sm:$0xff] }
 0x733   :  { %6342 = vmatprep.subr.bf16.mxu0 %v10186_v16  ;;  %6406 = vmatprep.subr.bf16.mxu1 %v10187_v40  ;;  %v10197_v16 = vld [vmem:[#allocation45_spill] sm:$0xff] }
 0x734   :  { %v10198_v40 = vld [vmem:[#allocation21_spill] sm:$0xff] }
 0x736   :  { %6344 = vmatpush1.bf16.msra.mxu0 %v10188_v45  ;;  %6408 = vmatpush1.bf16.msra.mxu1 %v10189_v55  ;;  %v10199_v45 = vld [vmem:[#allocation47_spill] sm:$0xff]  ;;  %v10200_v55 = vld [vmem:[#allocation22_spill] sm:$0xff] }
 0x737   :  { %6346 = vmatprep.subr.bf16.mxu0 %v10190_v13  ;;  %6410 = vmatprep.subr.bf16.mxu1 %v10191_v63  ;;  %v10201_v13 = vld [vmem:[#allocation49_spill] sm:$0xff]  ;;  %v10202_v63 = vld [vmem:[#allocation23_spill] sm:$0xff] }
 0x73a   :  { %6348 = vmatpush1.bf16.msra.mxu0 %v10192_v19  ;;  %6412 = vmatpush1.bf16.msra.mxu1 %v10193_v56  ;;  %v10203_v19 = vld [vmem:[#allocation51_spill] sm:$0xff]  ;;  %v10204_v56 = vld [vmem:[#allocation24_spill] sm:$0xff] }
 0x73b   :  { %6350 = vmatprep.subr.bf16.mxu0 %v10194_v50  ;;  %6414 = vmatprep.subr.bf16.mxu1 %v10195_v37  ;;  %v10205_v50 = vld [vmem:[#allocation53_spill] sm:$0xff] }
 0x73c   :  { %v10206_v37 = vld [vmem:[#allocation25_spill] sm:$0xff] }
 0x73e   :  { %6352 = vmatpush1.bf16.msra.mxu0 %v10196_v54  ;;  %6416 = vmatpush1.bf16.msra.mxu1 %v10197_v16  ;;  %v10207_v54 = vld [vmem:[#allocation55_spill] sm:$0xff]  ;;  %v10208_v16 = vld [vmem:[#allocation26_spill] sm:$0xff] }
 0x73f   :  { %6354 = vmatprep.subr.bf16.mxu0 %v10198_v40  ;;  %6418 = vmatprep.subr.bf16.mxu1 %v10199_v45  ;;  %v10209_v40 = vld [vmem:[#allocation57_spill] sm:$0xff]  ;;  %v10210_v45 = vld [vmem:[#allocation27_spill] sm:$0xff] }
 0x742   :  { %6356 = vmatpush1.bf16.msra.mxu0 %v10200_v55  ;;  %6420 = vmatpush1.bf16.msra.mxu1 %v10201_v13  ;;  %v10211_v55 = vld [vmem:[#allocation58_spill] sm:$0xff]  ;;  %v10212_v13 = vld [vmem:[#allocation28_spill] sm:$0xff] }
 0x743   :  { %6358 = vmatprep.subr.bf16.mxu0 %v10202_v63  ;;  %6422 = vmatprep.subr.bf16.mxu1 %v10203_v19  ;;  %v10213_v63 = vld [vmem:[#allocation60_spill] sm:$0xff]  ;;  %v10214_v19 = vld [vmem:[#allocation30_spill] sm:$0xff] }
 0x746   :  { %6360 = vmatpush1.bf16.msra.mxu0 %v10204_v56  ;;  %6424 = vmatpush1.bf16.msra.mxu1 %v10205_v50  ;;  %v10215_v56 = vld [vmem:[#allocation62_spill] sm:$0xff]  ;;  %v10216_v50 = vld [vmem:[#allocation32_spill] sm:$0xff] }
 0x747   :  { %6362 = vmatprep.subr.bf16.mxu0 %v10206_v37  ;;  %6426 = vmatprep.subr.bf16.mxu1 %v10207_v54  ;;  %v10217_v37 = vld [vmem:[#allocation64_spill] sm:$0xff]  ;;  %v10218_v54 = vld [vmem:[#allocation34_spill] sm:$0xff] }
 0x74a   :  { %6364 = vmatpush1.bf16.msra.mxu0 %v10208_v16  ;;  %6428 = vmatpush1.bf16.msra.mxu1 %v10209_v40  ;;  %v10219_v16 = vld [vmem:[#allocation66_spill] sm:$0xff]  ;;  %v10220_v40 = vld [vmem:[#allocation36_spill] sm:$0xff] }
 0x74b   :  { %6366 = vmatprep.subr.bf16.mxu0 %v10210_v45  ;;  %6430 = vmatprep.subr.bf16.mxu1 %v10211_v55  ;;  %v10221_v45 = vld [vmem:[#allocation68_spill] sm:$0xff]  ;;  %v10222_v55 = vld [vmem:[#allocation38_spill] sm:$0xff] }
 0x74e   :  { %6368 = vmatpush1.bf16.msra.mxu0 %v10212_v13  ;;  %6432 = vmatpush1.bf16.msra.mxu1 %v10213_v63  ;;  %v10223_v13 = vld [vmem:[#allocation70_spill] sm:$0xff]  ;;  %v10224_v63 = vld [vmem:[#allocation40_spill] sm:$0xff] }
 0x74f   :  { %6370 = vmatprep.subr.bf16.mxu0 %v10214_v19  ;;  %6434 = vmatprep.subr.bf16.mxu1 %v10215_v56  ;;  %v10225_v19 = vld [vmem:[#allocation72_spill] sm:$0xff]  ;;  %v10226_v56 = vld [vmem:[#allocation42_spill] sm:$0xff] }
 0x752   :  { %6372 = vmatpush1.bf16.msra.mxu0 %v10216_v50  ;;  %6436 = vmatpush1.bf16.msra.mxu1 %v10217_v37  ;;  %v10227_v50 = vld [vmem:[#allocation74_spill] sm:$0xff]  ;;  %v10228_v37 = vld [vmem:[#allocation44_spill] sm:$0xff] }
 0x753   :  { %6374 = vmatprep.subr.bf16.mxu0 %v10218_v54  ;;  %6438 = vmatprep.subr.bf16.mxu1 %v10219_v16  ;;  %v10229_v54 = vld [vmem:[#allocation76_spill] sm:$0xff]  ;;  %v10230_v16 = vld [vmem:[#allocation46_spill] sm:$0xff] }
 0x756   :  { %6376 = vmatpush1.bf16.msra.mxu0 %v10220_v40  ;;  %6440 = vmatpush1.bf16.msra.mxu1 %v10221_v45  ;;  %v10231_v40 = vld [vmem:[#allocation78_spill] sm:$0xff]  ;;  %v10232_v45 = vld [vmem:[#allocation48_spill] sm:$0xff] }
 0x757   :  { %6378 = vmatprep.subr.bf16.mxu0 %v10222_v55  ;;  %6442 = vmatprep.subr.bf16.mxu1 %v10223_v13  ;;  %v10233_v55 = vld [vmem:[#allocation80_spill] sm:$0xff]  ;;  %v10234_v13 = vld [vmem:[#allocation50_spill] sm:$0xff] }
 0x75a   :  { %6380 = vmatpush1.bf16.msra.mxu0 %v10224_v63  ;;  %6444 = vmatpush1.bf16.msra.mxu1 %v10225_v19  ;;  %v10235_v63 = vld [vmem:[#allocation82_spill] sm:$0xff]  ;;  %v10236_v19 = vld [vmem:[#allocation52_spill] sm:$0xff] }
 0x75b   :  { %6382 = vmatprep.subr.bf16.mxu0 %v10226_v56  ;;  %6446 = vmatprep.subr.bf16.mxu1 %v10227_v50  ;;  %v10237_v56 = vld [vmem:[#allocation84_spill] sm:$0xff]  ;;  %v10238_v50 = vld [vmem:[#allocation54_spill] sm:$0xff] }
 0x75e   :  { %6384 = vmatpush1.bf16.msra.mxu0 %v10228_v37  ;;  %6448 = vmatpush1.bf16.msra.mxu1 %v10229_v54  ;;  %v10239_v37 = vld [vmem:[#allocation86_spill] sm:$0xff]  ;;  %v10240_v54 = vld [vmem:[#allocation56_spill] sm:$0xff] }
 0x75f   :  { %6386 = vmatprep.subr.bf16.mxu0 %v10230_v16  ;;  %6450 = vmatprep.subr.bf16.mxu1 %v10231_v40  ;;  %v10241_v16 = vld [vmem:[#allocation88_spill] sm:$0xff]  ;;  %v10242_v40 = vld [vmem:[#allocation59_spill] sm:$0xff] }
 0x762   :  { %6388 = vmatpush1.bf16.msra.mxu0 %v10232_v45  ;;  %6452 = vmatpush1.bf16.msra.mxu1 %v10233_v55  ;;  %v10243_v45 = vld [vmem:[#allocation91_spill] sm:$0xff] }
 0x763   :  { %6390 = vmatprep.subr.bf16.mxu0 %v10234_v13  ;;  %6454 = vmatprep.subr.bf16.mxu1 %v10235_v63 }
 0x766   :  { %6392 = vmatpush1.bf16.msra.mxu0 %v10236_v19  ;;  %6456 = vmatpush1.bf16.msra.mxu1 %v10237_v56 }
 0x767   :  { %6394 = vmatprep.subr.bf16.mxu0 %v10238_v50  ;;  %6458 = vmatprep.subr.bf16.mxu1 %v10239_v37 }
 0x76a   :  { %6396 = vmatpush1.bf16.msra.mxu0 %v10240_v54  ;;  %6460 = vmatpush1.bf16.msra.mxu1 %v10241_v16 }
 0x76b   :  { %6462 = vmatprep.subr.bf16.mxu0 %v10242_v40  ;;  %6526 = vmatprep.subr.bf16.mxu1 %v10243_v45 }
 0x7c0   :  { %v3431_v55 = vpop.f32.mrb[28].mxu0  ;;  %v3502_v13 = vpop.f32.mrb[18].mxu1 }
 0x7c1   :  { %v6883_v63 = vadd.f32 %v3431_v55, %v10244_v9  ;;  %v3433_v62 = vpop.f32.mrb[29].mxu0  ;;  %v3504_v19 = vpop.f32.mrb[19].mxu1  ;;  %v3659_v50 = vadd.f32 %v3502_v13, %v10246_v21 }
 0x7c2   :  { %v6884_v56 = vadd.f32 %v3433_v62, %v10245_v39  ;;  %v3660_v37 = vadd.f32 %v3504_v19, %v9874_v34 }
 0x7c3   :  { %v3657_v54 = vadd.f32 %v6883_v63, %v10152_v4  ;;  %v4681_v47 = vmul.f32 -1.442695, %v3659_v50 }
 0x7c4   :  { %v3658_v16 = vadd.f32 %v6884_v56, %v9873_v18  ;;  %v4682_v40 = vmul.f32 -1.442695, %v3660_v37  ;;  %v10247_v37 = vld [vmem:[#allocation152_spill] sm:$0xff] }
 0x7c5   :  { %v4679_v23 = vmul.f32 -1.442695, %v3657_v54  ;;  %7174 = vpow2.f32 %v4681_v47 }
 0x7c6   :  { %v4680_v45 = vmul.f32 -1.442695, %v3658_v16  ;;  %7176 = vpow2.f32 %v4682_v40  ;;  %v10248_v16 = vld [vmem:[#allocation151_spill] sm:$0xff] }
 0x7c7   :  { %7178 = vpow2.f32 %v4679_v23 }
 0x7c8   :  { %7180 = vpow2.f32 %v4680_v45 }
 0x7cf   :  { %v7175_v9 = vpop.eup %7174 }
 0x7d0   :  { %v7177_v55 = vpop.eup %7176  ;;  %v3683_v62 = vadd.f32 1.0, %v7175_v9 }
 0x7d1   :  { %v7179_v46 = vpop.eup %7178  ;;  %v3684_v13 = vadd.f32 1.0, %v7177_v55 }
 0x7d2   :  { %v7181_v39 = vpop.eup %7180  ;;  %v3671_v21 = vadd.f32 1.0, %v7179_v46  ;;  %7182 = vrcp.f32 %v3683_v62 }
 0x7d3   :  { %v3672_v19 = vadd.f32 1.0, %v7181_v39  ;;  %7184 = vrcp.f32 %v3684_v13 }
 0x7d4   :  { %7186 = vrcp.f32 %v3671_v21 }
 0x7d5   :  { %7188 = vrcp.f32 %v3672_v19 }
 0x7dc   :  { %v7183_v55 = vpop.eup %7182 }
 0x7dd   :  { %v7185_v39 = vpop.eup %7184 }
 0x7de   :  { %v7187_v21 = vpop.eup %7186 }
 0x7df   :  { %v7189_v62 = vpop.eup %7188 }
 0x800   :  { %v3573_v63 = vpop.f32.mrb[18].mxu0  ;;  %v3644_v56 = vpop.f32.mrb[34].mxu1 }
 0x801   :  { %v3661_v50 = vadd.f32 %v3573_v63, %v9875_v58  ;;  %v3663_v47 = vadd.f32 %v3644_v56, %v10247_v37  ;;  %v3575_v54 = vpop.f32.mrb[19].mxu0  ;;  %v3646_v23 = vpop.f32.mrb[35].mxu1  ;;  %v3703_v56 = vmul.f32 %v7183_v55, %v8822_v32 }
 0x802   :  { %v3662_v40 = vadd.f32 %v3575_v54, %v10248_v16  ;;  %v3664_v45 = vadd.f32 %v3646_v23, %v8220_v36  ;;  %v3704_v54 = vmul.f32 %v7185_v39, %v8824_v6  ;;  %v10251_v39 = vld [vmem:[#allocation129_spill] sm:$0xff] }
 0x803   :  { %7190 = vtanh.f32 %v3661_v50  ;;  %v4683_v9 = vmul.f32 -1.442695, %v3663_v47 }
 0x804   :  { %7192 = vtanh.f32 %v3662_v40  ;;  %v4684_v46 = vmul.f32 -1.442695, %v3664_v45 }
 0x805   :  { %7194 = vpow2.f32 %v4683_v9 }
 0x806   :  { %7196 = vpow2.f32 %v4684_v46 }
 0x80d   :  { %v7191_v13 = vpop.eup %7190 }
 0x80e   :  { %v7193_v63 = vpop.eup %7192  ;;  %v3705_v37 = vmul.f32 %v7191_v13, %v7187_v21  ;;  %v10253_v13 = vld [vmem:[#allocation130_spill] sm:$0xff] }
 0x80f   :  { %v7195_v19 = vpop.eup %7194  ;;  %v3706_v16 = vmul.f32 %v7193_v63, %v7189_v62  ;;  %v10252_v62 = vld [vmem:[#allocation102_spill] sm:$0xff]  ;;  %v10254_v63 = vld [vmem:[#allocation104_spill] sm:$0xff] }
 0x810   :  { %v7197_v23 = vpop.eup %7196  ;;  %v8974_v50 = vadd.f32 %v3705_v37, %v3703_v56  ;;  %v3697_v47 = vadd.f32 1.0, %v7195_v19  ;;  %v10249_v37 = vld [vmem:[#allocation126_spill] sm:$0xff]  ;;  %v10255_v56 = vld [vmem:[#allocation133_spill] sm:$0xff] }
 0x811   :  { %v8976_v40 = vadd.f32 %v3706_v16, %v3704_v54  ;;  %v3698_v45 = vadd.f32 1.0, %v7197_v23  ;;  %v10250_v16 = vld [vmem:[#allocation100_spill] sm:$0xff]  ;;  %v10256_v19 = vld [vmem:[#allocation106_spill] sm:$0xff] }
 0x812   :  { %7198 = vtanh.f32 %v8974_v50  ;;  %v10257_v54 = vld [vmem:[#allocation134_spill] sm:$0xff]  ;;  %v10258_v23 = vld [vmem:[#allocation108_spill] sm:$0xff] }
 0x813   :  { %7200 = vrcp.f32 %v3697_v47  ;;  %v10259_v47 = vld [vmem:[#allocation137_spill] sm:$0xff] }
 0x814   :  { %7202 = vtanh.f32 %v8976_v40 }
 0x815   :  { %7204 = vrcp.f32 %v3698_v45  ;;  %v10260_v45 = vld [vmem:[#allocation110_spill] sm:$0xff] }
 0x81c   :  { %v7199_v9 = vpop.eup %7198 }
 0x81d   :  { %v7201_v32 = vpop.eup %7200 }
 0x81e   :  { %v7203_v46 = vpop.eup %7202  ;;  %v8980_v6 = vmul.f32 %v7201_v32, %v7199_v9  ;;  %v10261_v9 = vld [vmem:[#allocation138_spill] sm:$0xff]  ;;  %v10262_v32 = vld [vmem:[#allocation112_spill] sm:$0xff] }
 0x81f   :  { %v7205_v55 = vpop.eup %7204 }
 0x820   :  { %v3712_v21 = vmul.f32 %v7205_v55, %v7203_v46  ;;  %v10263_v46 = vld [vmem:[#allocation141_spill] sm:$0xff]  ;;  %v10264_v55 = vld [vmem:[#allocation114_spill] sm:$0xff] }
 0x822   :  { %3801 = vmatprep.mubr.f32.mxu0 %v3712_v21  ;;  %3872 = vmatprep.mubr.f32.mxu1 %v3712_v21 }
 0x823   :  { %3802 = vmatmul.mubr.f32.vlgmr.msra.gmra.mrb[26].mxu0 %v8980_v6  ;;  %3873 = vmatmul.mubr.f32.vlgmr.msra.gmra.mrb[20].mxu1 %v8980_v6 }
 0x824   :  { %6464 = vmatpush1.bf16.msra.mxu0 %v9785_v11  ;;  %6528 = vmatpush1.bf16.msra.mxu1 %v9786_v57 }
 0x825   :  { %3943 = vmatprep.mubr.f32.mxu0 %v3712_v21  ;;  %4014 = vmatprep.mubr.f32.mxu1 %v3712_v21  ;;  %v10265_v21 = vld [vmem:[#allocation142_spill] sm:$0xff] }
 0x826   :  { %6466 = vmatprep.subr.bf16.mxu0 %v9787_v44  ;;  %6530 = vmatprep.subr.bf16.mxu1 %v9788_v14 }
 0x828   :  { %6468 = vmatpush1.bf16.msra.mxu0 %v9789_v51  ;;  %6532 = vmatpush1.bf16.msra.mxu1 %v9790_v49 }
 0x829   :  { %6470 = vmatprep.subr.bf16.mxu0 %v9877_v20  ;;  %6534 = vmatprep.subr.bf16.mxu1 %v9878_v5 }
 0x82c   :  { %6472 = vmatpush1.bf16.msra.mxu0 %v9793_v2  ;;  %6536 = vmatpush1.bf16.msra.mxu1 %v9879_v43 }
 0x82d   :  { %6474 = vmatprep.subr.bf16.mxu0 %v9795_v27  ;;  %6538 = vmatprep.subr.bf16.mxu1 %v9880_v10 }
 0x830   :  { %6476 = vmatpush1.bf16.msra.mxu0 %v9797_v33  ;;  %6540 = vmatpush1.bf16.msra.mxu1 %v9881_v29 }
 0x831   :  { %6478 = vmatprep.subr.bf16.mxu0 %v9799_v35  ;;  %6542 = vmatprep.subr.bf16.mxu1 %v9882_v15 }
 0x834   :  { %6480 = vmatpush1.bf16.msra.mxu0 %v9801_v60  ;;  %6544 = vmatpush1.bf16.msra.mxu1 %v9883_v30 }
 0x835   :  { %6482 = vmatprep.subr.bf16.mxu0 %v9803_v53  ;;  %6546 = vmatprep.subr.bf16.mxu1 %v9884_v48 }
 0x838   :  { %6484 = vmatpush1.bf16.msra.mxu0 %v9804_v3  ;;  %6548 = vmatpush1.bf16.msra.mxu1 %v9885_v22 }
 0x839   :  { %6486 = vmatprep.subr.bf16.mxu0 %v9805_v42  ;;  %6550 = vmatprep.subr.bf16.mxu1 %v9886_v25 }
 0x83c   :  { %6488 = vmatpush1.bf16.msra.mxu0 %v9806_v38  ;;  %6552 = vmatpush1.bf16.msra.mxu1 %v9887_v8 }
 0x83d   :  { %6490 = vmatprep.subr.bf16.mxu0 %v9807_v26  ;;  %6554 = vmatprep.subr.bf16.mxu1 %v9888_v1 }
 0x840   :  { %6492 = vmatpush1.bf16.msra.mxu0 %v9969_v61  ;;  %6556 = vmatpush1.bf16.msra.mxu1 %v9889_v24 }
 0x841   :  { %6494 = vmatprep.subr.bf16.mxu0 %v9970_v7  ;;  %6558 = vmatprep.subr.bf16.mxu1 %v9890_v31 }
 0x844   :  { %6496 = vmatpush1.bf16.msra.mxu0 %v9810_v41  ;;  %6560 = vmatpush1.bf16.msra.mxu1 %v9891_v17 }
 0x845   :  { %6498 = vmatprep.subr.bf16.mxu0 %v9971_v12  ;;  %6562 = vmatprep.subr.bf16.mxu1 %v9892_v28 }
 0x848   :  { %6500 = vmatpush1.bf16.msra.mxu0 %v9972_v52  ;;  %6564 = vmatpush1.bf16.msra.mxu1 %v9893_v59 }
 0x849   :  { %6502 = vmatprep.subr.bf16.mxu0 %v9973_v0  ;;  %6566 = vmatprep.subr.bf16.mxu1 %v10249_v37 }
 0x84c   :  { %6504 = vmatpush1.bf16.msra.mxu0 %v10250_v16  ;;  %6568 = vmatpush1.bf16.msra.mxu1 %v10251_v39 }
 0x84d   :  { %6506 = vmatprep.subr.bf16.mxu0 %v10252_v62  ;;  %6570 = vmatprep.subr.bf16.mxu1 %v10253_v13  ;;  %v10339_v13 = vld [vmem:[#allocation136_spill] sm:$0xff] }
 0x84e   :  { %v10340_v62 = vld [vmem:[#allocation148_spill] sm:$0xff] }
 0x850   :  { %6508 = vmatpush1.bf16.msra.mxu0 %v10254_v63  ;;  %6572 = vmatpush1.bf16.msra.mxu1 %v10255_v56  ;;  %v10266_v56 = vld [vmem:[#allocation116_spill] sm:$0xff] }
 0x851   :  { %6510 = vmatprep.subr.bf16.mxu0 %v10256_v19  ;;  %6574 = vmatprep.subr.bf16.mxu1 %v10257_v54  ;;  %v10267_v19 = vld [vmem:[#allocation143_spill] sm:$0xff]  ;;  %v10268_v54 = vld [vmem:[#allocation118_spill] sm:$0xff] }
 0x854   :  { %6512 = vmatpush1.bf16.msra.mxu0 %v10258_v23  ;;  %6576 = vmatpush1.bf16.msra.mxu1 %v10259_v47  ;;  %v10269_v23 = vld [vmem:[#allocation144_spill] sm:$0xff] }
 0x855   :  { %6514 = vmatprep.subr.bf16.mxu0 %v10260_v45  ;;  %6578 = vmatprep.subr.bf16.mxu1 %v10261_v9  ;;  %v10270_v47 = vld [vmem:[#allocation120_spill] sm:$0xff]  ;;  %v10271_v45 = vld [vmem:[#allocation145_spill] sm:$0xff]  ;;  %v10272_v9 = vld [vmem:[#allocation10_spill] sm:$0xff] }
 0x858   :  { %6516 = vmatpush1.bf16.msra.mxu0 %v10262_v32  ;;  %6580 = vmatpush1.bf16.msra.mxu1 %v10263_v46  ;;  %v10273_v32 = vld [vmem:[#allocation15_spill] sm:$0xff] }
 0x859   :  { %6518 = vmatprep.subr.bf16.mxu0 %v10264_v55  ;;  %6582 = vmatprep.subr.bf16.mxu1 %v10265_v21  ;;  %v10274_v21 = vld [vmem:[#allocation11_spill] sm:$0xff]  ;;  %v10283_v55 = vld [vmem:[#allocation37_spill] sm:$0xff] }
 0x85a   :  { %v10338_v46 = vld [vmem:[#allocation135_spill] sm:$0xff] }
 0x85c   :  { %6520 = vmatpush1.bf16.msra.mxu0 %v10266_v56  ;;  %6584 = vmatpush1.bf16.msra.mxu1 %v10267_v19  ;;  %v10275_v56 = vld [vmem:[#allocation29_spill] sm:$0xff]  ;;  %v10276_v19 = vld [vmem:[#allocation12_spill] sm:$0xff] }
 0x85d   :  { %6522 = vmatprep.subr.bf16.mxu0 %v10268_v54  ;;  %6586 = vmatprep.subr.bf16.mxu1 %v10269_v23  ;;  %v10277_v54 = vld [vmem:[#allocation31_spill] sm:$0xff]  ;;  %v10278_v23 = vld [vmem:[#allocation13_spill] sm:$0xff] }
 0x860   :  { %6524 = vmatpush1.bf16.msra.mxu0 %v10270_v47  ;;  %6588 = vmatpush1.bf16.msra.mxu1 %v10271_v45  ;;  %v10279_v47 = vld [vmem:[#allocation33_spill] sm:$0xff]  ;;  %v10280_v45 = vld [vmem:[#allocation14_spill] sm:$0xff] }
 0x861   :  { %6590 = vmatprep.subr.bf16.mxu0 %v10272_v9  ;;  %6654 = vmatprep.subr.bf16.mxu1 %v10273_v32  ;;  %v10281_v9 = vld [vmem:[#allocation35_spill] sm:$0xff]  ;;  %v10282_v32 = vld [vmem:[#allocation16_spill] sm:$0xff] }
 0x863   :  { %3944 = vmatmul.mubr.f32.vlgmr.msra.gmra.mrb[20].mxu0 %v8980_v6  ;;  %4015 = vmatmul.mubr.f32.vlgmr.msra.gmra.mrb[36].mxu1 %v8980_v6  ;;  %v10284_v6 = vld [vmem:[#allocation17_spill] sm:$0xff] }
 0x864   :  { %6592 = vmatpush1.bf16.msra.mxu0 %v10274_v21  ;;  %6656 = vmatpush1.bf16.msra.mxu1 %v10275_v56  ;;  %v10285_v21 = vld [vmem:[#allocation39_spill] sm:$0xff]  ;;  %v10286_v56 = vld [vmem:[#allocation18_spill] sm:$0xff] }
 0x865   :  { %6594 = vmatprep.subr.bf16.mxu0 %v10276_v19  ;;  %6658 = vmatprep.subr.bf16.mxu1 %v10277_v54  ;;  %v10287_v19 = vld [vmem:[#allocation41_spill] sm:$0xff]  ;;  %v10288_v54 = vld [vmem:[#allocation19_spill] sm:$0xff] }
 0x868   :  { %6596 = vmatpush1.bf16.msra.mxu0 %v10278_v23  ;;  %6660 = vmatpush1.bf16.msra.mxu1 %v10279_v47  ;;  %v10289_v23 = vld [vmem:[#allocation43_spill] sm:$0xff]  ;;  %v10290_v47 = vld [vmem:[#allocation20_spill] sm:$0xff] }
 0x869   :  { %6598 = vmatprep.subr.bf16.mxu0 %v10280_v45  ;;  %6662 = vmatprep.subr.bf16.mxu1 %v10281_v9  ;;  %v10291_v45 = vld [vmem:[#allocation45_spill] sm:$0xff] }
 0x86a   :  { %v10292_v9 = vld [vmem:[#allocation21_spill] sm:$0xff] }
 0x86c   :  { %6600 = vmatpush1.bf16.msra.mxu0 %v10282_v32  ;;  %6664 = vmatpush1.bf16.msra.mxu1 %v10283_v55  ;;  %v10293_v32 = vld [vmem:[#allocation47_spill] sm:$0xff]  ;;  %v10294_v55 = vld [vmem:[#allocation22_spill] sm:$0xff] }
 0x86d   :  { %6602 = vmatprep.subr.bf16.mxu0 %v10284_v6  ;;  %6666 = vmatprep.subr.bf16.mxu1 %v10285_v21  ;;  %v10295_v6 = vld [vmem:[#allocation49_spill] sm:$0xff]  ;;  %v10296_v21 = vld [vmem:[#allocation23_spill] sm:$0xff] }
 0x870   :  { %6604 = vmatpush1.bf16.msra.mxu0 %v10286_v56  ;;  %6668 = vmatpush1.bf16.msra.mxu1 %v10287_v19  ;;  %v10297_v56 = vld [vmem:[#allocation51_spill] sm:$0xff]  ;;  %v10298_v19 = vld [vmem:[#allocation24_spill] sm:$0xff] }
 0x871   :  { %6606 = vmatprep.subr.bf16.mxu0 %v10288_v54  ;;  %6670 = vmatprep.subr.bf16.mxu1 %v10289_v23  ;;  %v10299_v54 = vld [vmem:[#allocation53_spill] sm:$0xff] }
 0x872   :  { %v10300_v23 = vld [vmem:[#allocation25_spill] sm:$0xff] }
 0x874   :  { %6608 = vmatpush1.bf16.msra.mxu0 %v10290_v47  ;;  %6672 = vmatpush1.bf16.msra.mxu1 %v10291_v45  ;;  %v10301_v47 = vld [vmem:[#allocation55_spill] sm:$0xff]  ;;  %v10302_v45 = vld [vmem:[#allocation26_spill] sm:$0xff] }
 0x875   :  { %6610 = vmatprep.subr.bf16.mxu0 %v10292_v9  ;;  %6674 = vmatprep.subr.bf16.mxu1 %v10293_v32  ;;  %v10303_v9 = vld [vmem:[#allocation57_spill] sm:$0xff]  ;;  %v10304_v32 = vld [vmem:[#allocation27_spill] sm:$0xff] }
 0x878   :  { %6612 = vmatpush1.bf16.msra.mxu0 %v10294_v55  ;;  %6676 = vmatpush1.bf16.msra.mxu1 %v10295_v6  ;;  %v10305_v55 = vld [vmem:[#allocation58_spill] sm:$0xff]  ;;  %v10306_v6 = vld [vmem:[#allocation28_spill] sm:$0xff] }
 0x879   :  { %6614 = vmatprep.subr.bf16.mxu0 %v10296_v21  ;;  %6678 = vmatprep.subr.bf16.mxu1 %v10297_v56  ;;  %v10307_v21 = vld [vmem:[#allocation60_spill] sm:$0xff]  ;;  %v10308_v56 = vld [vmem:[#allocation30_spill] sm:$0xff] }
 0x87c   :  { %6616 = vmatpush1.bf16.msra.mxu0 %v10298_v19  ;;  %6680 = vmatpush1.bf16.msra.mxu1 %v10299_v54  ;;  %v10309_v19 = vld [vmem:[#allocation62_spill] sm:$0xff]  ;;  %v10310_v54 = vld [vmem:[#allocation32_spill] sm:$0xff] }
 0x87d   :  { %6618 = vmatprep.subr.bf16.mxu0 %v10300_v23  ;;  %6682 = vmatprep.subr.bf16.mxu1 %v10301_v47  ;;  %v10311_v23 = vld [vmem:[#allocation64_spill] sm:$0xff]  ;;  %v10312_v47 = vld [vmem:[#allocation34_spill] sm:$0xff] }
 0x880   :  { %6620 = vmatpush1.bf16.msra.mxu0 %v10302_v45  ;;  %6684 = vmatpush1.bf16.msra.mxu1 %v10303_v9  ;;  %v10313_v45 = vld [vmem:[#allocation66_spill] sm:$0xff]  ;;  %v10314_v9 = vld [vmem:[#allocation36_spill] sm:$0xff] }
 0x881   :  { %6622 = vmatprep.subr.bf16.mxu0 %v10304_v32  ;;  %6686 = vmatprep.subr.bf16.mxu1 %v10305_v55  ;;  %v10315_v32 = vld [vmem:[#allocation68_spill] sm:$0xff]  ;;  %v10316_v55 = vld [vmem:[#allocation38_spill] sm:$0xff] }
 0x884   :  { %6624 = vmatpush1.bf16.msra.mxu0 %v10306_v6  ;;  %6688 = vmatpush1.bf16.msra.mxu1 %v10307_v21  ;;  %v10317_v6 = vld [vmem:[#allocation70_spill] sm:$0xff]  ;;  %v10318_v21 = vld [vmem:[#allocation40_spill] sm:$0xff] }
 0x885   :  { %6626 = vmatprep.subr.bf16.mxu0 %v10308_v56  ;;  %6690 = vmatprep.subr.bf16.mxu1 %v10309_v19  ;;  %v10319_v56 = vld [vmem:[#allocation72_spill] sm:$0xff]  ;;  %v10320_v19 = vld [vmem:[#allocation42_spill] sm:$0xff] }
 0x888   :  { %6628 = vmatpush1.bf16.msra.mxu0 %v10310_v54  ;;  %6692 = vmatpush1.bf16.msra.mxu1 %v10311_v23  ;;  %v10321_v54 = vld [vmem:[#allocation74_spill] sm:$0xff]  ;;  %v10322_v23 = vld [vmem:[#allocation44_spill] sm:$0xff] }
 0x889   :  { %6630 = vmatprep.subr.bf16.mxu0 %v10312_v47  ;;  %6694 = vmatprep.subr.bf16.mxu1 %v10313_v45  ;;  %v10323_v47 = vld [vmem:[#allocation76_spill] sm:$0xff]  ;;  %v10324_v45 = vld [vmem:[#allocation46_spill] sm:$0xff] }
 0x88c   :  { %6632 = vmatpush1.bf16.msra.mxu0 %v10314_v9  ;;  %6696 = vmatpush1.bf16.msra.mxu1 %v10315_v32  ;;  %v10325_v9 = vld [vmem:[#allocation78_spill] sm:$0xff]  ;;  %v10326_v32 = vld [vmem:[#allocation48_spill] sm:$0xff] }
 0x88d   :  { %6634 = vmatprep.subr.bf16.mxu0 %v10316_v55  ;;  %6698 = vmatprep.subr.bf16.mxu1 %v10317_v6  ;;  %v10327_v55 = vld [vmem:[#allocation80_spill] sm:$0xff]  ;;  %v10328_v6 = vld [vmem:[#allocation50_spill] sm:$0xff] }
 0x890   :  { %6636 = vmatpush1.bf16.msra.mxu0 %v10318_v21  ;;  %6700 = vmatpush1.bf16.msra.mxu1 %v10319_v56  ;;  %v10329_v21 = vld [vmem:[#allocation82_spill] sm:$0xff]  ;;  %v10330_v56 = vld [vmem:[#allocation52_spill] sm:$0xff] }
 0x891   :  { %6638 = vmatprep.subr.bf16.mxu0 %v10320_v19  ;;  %6702 = vmatprep.subr.bf16.mxu1 %v10321_v54  ;;  %v10331_v19 = vld [vmem:[#allocation84_spill] sm:$0xff]  ;;  %v10332_v54 = vld [vmem:[#allocation54_spill] sm:$0xff] }
 0x894   :  { %6640 = vmatpush1.bf16.msra.mxu0 %v10322_v23  ;;  %6704 = vmatpush1.bf16.msra.mxu1 %v10323_v47  ;;  %v10333_v23 = vld [vmem:[#allocation86_spill] sm:$0xff]  ;;  %v10334_v47 = vld [vmem:[#allocation56_spill] sm:$0xff] }
 0x895   :  { %6642 = vmatprep.subr.bf16.mxu0 %v10324_v45  ;;  %6706 = vmatprep.subr.bf16.mxu1 %v10325_v9  ;;  %v10335_v45 = vld [vmem:[#allocation88_spill] sm:$0xff]  ;;  %v10336_v9 = vld [vmem:[#allocation59_spill] sm:$0xff] }
 0x898   :  { %6644 = vmatpush1.bf16.msra.mxu0 %v10326_v32  ;;  %6708 = vmatpush1.bf16.msra.mxu1 %v10327_v55  ;;  %v10337_v32 = vld [vmem:[#allocation91_spill] sm:$0xff] }
 0x899   :  { %6646 = vmatprep.subr.bf16.mxu0 %v10328_v6  ;;  %6710 = vmatprep.subr.bf16.mxu1 %v10329_v21 }
 0x89c   :  { %6648 = vmatpush1.bf16.msra.mxu0 %v10330_v56  ;;  %6712 = vmatpush1.bf16.msra.mxu1 %v10331_v19 }
 0x89d   :  { %6650 = vmatprep.subr.bf16.mxu0 %v10332_v54  ;;  %6714 = vmatprep.subr.bf16.mxu1 %v10333_v23 }
 0x8a0   :  { %6652 = vmatpush1.bf16.msra.mxu0 %v10334_v47  ;;  %6716 = vmatpush1.bf16.msra.mxu1 %v10335_v45 }
 0x8a1   :  { %6718 = vmatprep.subr.bf16.mxu0 %v10336_v9  ;;  %6782 = vmatprep.subr.bf16.mxu1 %v10337_v32 }
 0x8f6   :  { %v3803_v55 = vpop.f32.mrb[26].mxu0  ;;  %v3874_v6 = vpop.f32.mrb[20].mxu1 }
 0x8f7   :  { %v6885_v21 = vadd.f32 %v3803_v55, %v10338_v46  ;;  %v3805_v63 = vpop.f32.mrb[27].mxu0  ;;  %v3876_v56 = vpop.f32.mrb[21].mxu1  ;;  %v4031_v54 = vadd.f32 %v3874_v6, %v10340_v62 }
 0x8f8   :  { %v6886_v19 = vadd.f32 %v3805_v63, %v10339_v13  ;;  %v4032_v23 = vadd.f32 %v3876_v56, %v9874_v34 }
 0x8f9   :  { %v4029_v47 = vadd.f32 %v6885_v21, %v10152_v4  ;;  %v4687_v39 = vmul.f32 -1.442695, %v4031_v54 }
 0x8fa   :  { %v4030_v45 = vadd.f32 %v6886_v19, %v9873_v18  ;;  %v4688_v9 = vmul.f32 -1.442695, %v4032_v23  ;;  %v10341_v23 = vld [vmem:[#allocation152_spill] sm:$0xff] }
 0x8fb   :  { %v4685_v16 = vmul.f32 -1.442695, %v4029_v47  ;;  %7206 = vpow2.f32 %v4687_v39 }
 0x8fc   :  { %v4686_v32 = vmul.f32 -1.442695, %v4030_v45  ;;  %7208 = vpow2.f32 %v4688_v9  ;;  %v10342_v45 = vld [vmem:[#allocation151_spill] sm:$0xff] }
 0x8fd   :  { %7210 = vpow2.f32 %v4685_v16 }
 0x8fe   :  { %7212 = vpow2.f32 %v4686_v32 }
 0x905   :  { %v7207_v46 = vpop.eup %7206 }
 0x906   :  { %v7209_v55 = vpop.eup %7208  ;;  %v4055_v63 = vadd.f32 1.0, %v7207_v46 }
 0x907   :  { %v7211_v37 = vpop.eup %7210  ;;  %v4056_v6 = vadd.f32 1.0, %v7209_v55 }
 0x908   :  { %v7213_v13 = vpop.eup %7212  ;;  %v4043_v62 = vadd.f32 1.0, %v7211_v37  ;;  %7214 = vrcp.f32 %v4055_v63 }
 0x909   :  { %v4044_v56 = vadd.f32 1.0, %v7213_v13  ;;  %7216 = vrcp.f32 %v4056_v6 }
 0x90a   :  { %7218 = vrcp.f32 %v4043_v62 }
 0x90b   :  { %7220 = vrcp.f32 %v4044_v56 }
 0x912   :  { %v7215_v55 = vpop.eup %7214 }
 0x913   :  { %v7217_v13 = vpop.eup %7216 }
 0x914   :  { %v7219_v62 = vpop.eup %7218 }
 0x915   :  { %v7221_v63 = vpop.eup %7220 }
 0x936   :  { %v3945_v21 = vpop.f32.mrb[20].mxu0  ;;  %v4016_v19 = vpop.f32.mrb[36].mxu1 }
 0x937   :  { %v4033_v54 = vadd.f32 %v3945_v21, %v9875_v58  ;;  %v4035_v39 = vadd.f32 %v4016_v19, %v10341_v23  ;;  %v3947_v47 = vpop.f32.mrb[21].mxu0  ;;  %v4018_v16 = vpop.f32.mrb[37].mxu1  ;;  %v4075_v19 = vmul.f32 %v7215_v55, %v8974_v50 }
 0x938   :  { %v4034_v9 = vadd.f32 %v3947_v47, %v10342_v45  ;;  %v4036_v32 = vadd.f32 %v4018_v16, %v8220_v36  ;;  %v4076_v47 = vmul.f32 %v7217_v13, %v8976_v40  ;;  %v4479_v13 = vld [vmem:[%s9319_s5 + $0xb0] sm:$0xff] }
 0x939   :  { %7222 = vtanh.f32 %v4033_v54  ;;  %v4689_v46 = vmul.f32 -1.442695, %v4035_v39 }
 0x93a   :  { %7224 = vtanh.f32 %v4034_v9  ;;  %v4690_v37 = vmul.f32 -1.442695, %v4036_v32 }
 0x93b   :  { %7226 = vpow2.f32 %v4689_v46 }
 0x93c   :  { %7228 = vpow2.f32 %v4690_v37 }
 0x943   :  { %v7223_v6 = vpop.eup %7222 }
 0x944   :  { %v7225_v21 = vpop.eup %7224  ;;  %v4077_v23 = vmul.f32 %v7223_v6, %v7219_v62 }
 0x945   :  { %v7227_v56 = vpop.eup %7226  ;;  %v4078_v45 = vmul.f32 %v7225_v21, %v7221_v63  ;;  %v4480_v63 = vld [vmem:[%s9319_s5 + $0xb8] sm:$0xff]  ;;  %v4463_v21 = vld [vmem:[%s9319_s5 + $0x30] sm:$0xff] }
 0x946   :  { %v7229_v16 = vpop.eup %7228  ;;  %v9126_v54 = vadd.f32 %v4077_v23, %v4075_v19  ;;  %v4069_v39 = vadd.f32 1.0, %v7227_v56  ;;  %v4462_v23 = vld [vmem:[%s9319_s5 + $0x28] sm:$0xff]  ;;  %v6857_v6 = vpack.c.bf16 %v4480_v63, %v4479_v13  ;;  %v4464_v19 = vld [vmem:[%s9319_s5 + $0x38] sm:$0xff] }
 0x947   :  { %v9128_v9 = vadd.f32 %v4078_v45, %v4076_v47  ;;  %v4070_v32 = vadd.f32 1.0, %v7229_v16  ;;  %v6859_v56 = vpack.c.bf16 %v4464_v19, %v4463_v21  ;;  %v4481_v47 = vld [vmem:[%s9319_s5 + $0xc0] sm:$0xff]  ;;  %v4482_v16 = vld [vmem:[%s9319_s5 + $0xc8] sm:$0xff] }
 0x948   :  { %7230 = vtanh.f32 %v9126_v54 }
 0x949   :  { %7232 = vrcp.f32 %v4069_v39  ;;  %v6861_v39 = vpack.c.bf16 %v4482_v16, %v4481_v47 }
 0x94a   :  { %7234 = vtanh.f32 %v9128_v9 }
 0x94b   :  { %7236 = vrcp.f32 %v4070_v32  ;;  %v4465_v32 = vld [vmem:[%s9319_s5 + $0x40] sm:$0xff] }
 0x952   :  { %v7231_v46 = vpop.eup %7230 }
 0x953   :  { %v7233_v50 = vpop.eup %7232 }
 0x954   :  { %v7235_v37 = vpop.eup %7234  ;;  %v9132_v40 = vmul.f32 %v7233_v50, %v7231_v46  ;;  %v4466_v46 = vld [vmem:[%s9319_s5 + $0x48] sm:$0xff] }
 0x955   :  { %v7237_v55 = vpop.eup %7236  ;;  %v6863_v50 = vpack.c.bf16 %v4466_v46, %v4465_v32 }
 0x956   :  { %v4084_v62 = vmul.f32 %v7237_v55, %v7235_v37  ;;  %v4483_v37 = vld [vmem:[%s9319_s5 + $0xd0] sm:$0xff]  ;;  %v4484_v55 = vld [vmem:[%s9319_s5 + $0xd8] sm:$0xff] }
 0x958   :  { %4173 = vmatprep.mubr.f32.mxu0 %v4084_v62  ;;  %4244 = vmatprep.mubr.f32.mxu1 %v4084_v62 }
 0x959   :  { %4174 = vmatmul.mubr.f32.vlgmr.msra.gmra.mrb[24].mxu0 %v9132_v40  ;;  %4245 = vmatmul.mubr.f32.vlgmr.msra.gmra.mrb[22].mxu1 %v9132_v40 }
 0x95a   :  { %6720 = vmatpush1.bf16.msra.mxu0 %v9785_v11  ;;  %6784 = vmatpush1.bf16.msra.mxu1 %v9786_v57  ;;  %v10343_v11 = vld [vmem:[#allocation126_spill] sm:$0xff]  ;;  %v10344_v57 = vld [vmem:[#allocation100_spill] sm:$0xff] }
 0x95b   :  { %4315 = vmatprep.mubr.f32.mxu0 %v4084_v62  ;;  %4386 = vmatprep.mubr.f32.mxu1 %v4084_v62  ;;  %v6865_v62 = vpack.c.bf16 %v4484_v55, %v4483_v37 }
 0x95c   :  { %6722 = vmatprep.subr.bf16.mxu0 %v9787_v44  ;;  %6786 = vmatprep.subr.bf16.mxu1 %v9788_v14  ;;  %v10345_v44 = vld [vmem:[#allocation129_spill] sm:$0xff]  ;;  %v10346_v14 = vld [vmem:[#allocation102_spill] sm:$0xff] }
 0x95e   :  { %6724 = vmatpush1.bf16.msra.mxu0 %v9789_v51  ;;  %6788 = vmatpush1.bf16.msra.mxu1 %v9790_v49  ;;  %v10348_v51 = vld [vmem:[#allocation104_spill] sm:$0xff]  ;;  %v10349_v49 = vld [vmem:[#allocation133_spill] sm:$0xff] }
 0x95f   :  { %6726 = vmatprep.subr.bf16.mxu0 %v9877_v20  ;;  %6790 = vmatprep.subr.bf16.mxu1 %v9878_v5  ;;  %v10360_v20 = vld [vmem:[#allocation116_spill] sm:$0xff]  ;;  %v10361_v5 = vld [vmem:[#allocation143_spill] sm:$0xff] }
 0x962   :  { %6728 = vmatpush1.bf16.msra.mxu0 %v9793_v2  ;;  %6792 = vmatpush1.bf16.msra.mxu1 %v9879_v43  ;;  %v10351_v2 = vld [vmem:[#allocation134_spill] sm:$0xff] }
 0x963   :  { %6730 = vmatprep.subr.bf16.mxu0 %v9795_v27  ;;  %6794 = vmatprep.subr.bf16.mxu1 %v9880_v10  ;;  %v10353_v27 = vld [vmem:[#allocation137_spill] sm:$0xff]  ;;  %v10362_v43 = vld [vmem:[#allocation118_spill] sm:$0xff]  ;;  %v10363_v10 = vld [vmem:[#allocation144_spill] sm:$0xff] }
 0x966   :  { %6732 = vmatpush1.bf16.msra.mxu0 %v9797_v33  ;;  %6796 = vmatpush1.bf16.msra.mxu1 %v9881_v29  ;;  %v10355_v33 = vld [vmem:[#allocation138_spill] sm:$0xff]  ;;  %v10364_v29 = vld [vmem:[#allocation120_spill] sm:$0xff] }
 0x967   :  { %6734 = vmatprep.subr.bf16.mxu0 %v9799_v35  ;;  %6798 = vmatprep.subr.bf16.mxu1 %v9882_v15  ;;  %v10357_v35 = vld [vmem:[#allocation141_spill] sm:$0xff] }
 0x968   :  { %v10365_v15 = vld [vmem:[#allocation145_spill] sm:$0xff] }
 0x96a   :  { %6736 = vmatpush1.bf16.msra.mxu0 %v9801_v60  ;;  %6800 = vmatpush1.bf16.msra.mxu1 %v9883_v30  ;;  %v10359_v60 = vld [vmem:[#allocation142_spill] sm:$0xff] }
 0x96b   :  { %6738 = vmatprep.subr.bf16.mxu0 %v9803_v53  ;;  %6802 = vmatprep.subr.bf16.mxu1 %v9884_v48  ;;  %v10350_v53 = vld [vmem:[#allocation106_spill] sm:$0xff]  ;;  %v4474_v48 = vld [vmem:[%s9319_s5 + $0x88] sm:$0xff] }
 0x96c   :  { %v4473_v30 = vld [vmem:[%s9319_s5 + $0x80] sm:$0xff] }
 0x96e   :  { %6740 = vmatpush1.bf16.msra.mxu0 %v9804_v3  ;;  %6804 = vmatpush1.bf16.msra.mxu1 %v9885_v22  ;;  %v10352_v3 = vld [vmem:[#allocation108_spill] sm:$0xff]  ;;  %v6845_v22 = vpack.c.bf16 %v4474_v48, %v4473_v30 }
 0x96f   :  { %6742 = vmatprep.subr.bf16.mxu0 %v9805_v42  ;;  %6806 = vmatprep.subr.bf16.mxu1 %v9886_v25  ;;  %v10354_v42 = vld [vmem:[#allocation110_spill] sm:$0xff] }
 0x970   :  { %v4457_v25 = vld [vmem:[%s9319_s5] sm:$0xff] }
 0x972   :  { %6744 = vmatpush1.bf16.msra.mxu0 %v9806_v38  ;;  %6808 = vmatpush1.bf16.msra.mxu1 %v9887_v8  ;;  %v10356_v38 = vld [vmem:[#allocation112_spill] sm:$0xff]  ;;  %v4458_v8 = vld [vmem:[%s9319_s5 + $0x8] sm:$0xff] }
 0x973   :  { %6746 = vmatprep.subr.bf16.mxu0 %v9807_v26  ;;  %6810 = vmatprep.subr.bf16.mxu1 %v9888_v1  ;;  %v10358_v26 = vld [vmem:[#allocation114_spill] sm:$0xff]  ;;  %v6847_v1 = vpack.c.bf16 %v4458_v8, %v4457_v25 }
 0x976   :  { %6748 = vmatpush1.bf16.msra.mxu0 %v9969_v61  ;;  %6812 = vmatpush1.bf16.msra.mxu1 %v9889_v24  ;;  %v4475_v24 = vld [vmem:[%s9319_s5 + $0x90] sm:$0xff] }
 0x977   :  { %6750 = vmatprep.subr.bf16.mxu0 %v9970_v7  ;;  %6814 = vmatprep.subr.bf16.mxu1 %v9890_v31  ;;  %v4476_v31 = vld [vmem:[%s9319_s5 + $0x98] sm:$0xff]  ;;  %v4477_v7 = vld [vmem:[%s9319_s5 + $0xa0] sm:$0xff] }
 0x97a   :  { %6752 = vmatpush1.bf16.msra.mxu0 %v9810_v41  ;;  %6816 = vmatpush1.bf16.msra.mxu1 %v9891_v17  ;;  %v10347_v41 = vld [vmem:[#allocation130_spill] sm:$0xff]  ;;  %v6849_v17 = vpack.c.bf16 %v4476_v31, %v4475_v24 }
 0x97b   :  { %6754 = vmatprep.subr.bf16.mxu0 %v9971_v12  ;;  %6818 = vmatprep.subr.bf16.mxu1 %v9892_v28  ;;  %v4459_v28 = vld [vmem:[%s9319_s5 + $0x10] sm:$0xff]  ;;  %v4478_v12 = vld [vmem:[%s9319_s5 + $0xa8] sm:$0xff] }
 0x97e   :  { %6756 = vmatpush1.bf16.msra.mxu0 %v9972_v52  ;;  %6820 = vmatpush1.bf16.msra.mxu1 %v9893_v59  ;;  %v4460_v59 = vld [vmem:[%s9319_s5 + $0x18] sm:$0xff]  ;;  %v6853_v52 = vpack.c.bf16 %v4478_v12, %v4477_v7 }
 0x97f   :  { %6758 = vmatprep.subr.bf16.mxu0 %v9973_v0  ;;  %6822 = vmatprep.subr.bf16.mxu1 %v10343_v11  ;;  %v6851_v61 = vpack.c.bf16 %v4460_v59, %v4459_v28  ;;  %v4461_v0 = vld [vmem:[%s9319_s5 + $0x20] sm:$0xff]  ;;  %v4468_v11 = vld [vmem:[%s9319_s5 + $0x58] sm:$0xff] }
 0x980   :  { %v6855_v45 = vpack.c.bf16 %v4462_v23, %v4461_v0  ;;  %v10369_v23 = vld [vmem:[#allocation152_spill] sm:$0xff] }
 0x982   :  { %6760 = vmatpush1.bf16.msra.mxu0 %v10344_v57  ;;  %6824 = vmatpush1.bf16.msra.mxu1 %v10345_v44  ;;  %v4485_v57 = vld [vmem:[%s9319_s5 + $0xe0] sm:$0xff] }
 0x983   :  { %6762 = vmatprep.subr.bf16.mxu0 %v10346_v14  ;;  %6826 = vmatprep.subr.bf16.mxu1 %v10347_v41  ;;  %v4486_v14 = vld [vmem:[%s9319_s5 + $0xe8] sm:$0xff]  ;;  %v4469_v41 = vld [vmem:[%s9319_s5 + $0x60] sm:$0xff] }
 0x986   :  { %6764 = vmatpush1.bf16.msra.mxu0 %v10348_v51  ;;  %6828 = vmatpush1.bf16.msra.mxu1 %v10349_v49  ;;  %v4470_v51 = vld [vmem:[%s9319_s5 + $0x68] sm:$0xff]  ;;  %v6869_v49 = vpack.c.bf16 %v4486_v14, %v4485_v57 }
 0x987   :  { %6766 = vmatprep.subr.bf16.mxu0 %v10350_v53  ;;  %6830 = vmatprep.subr.bf16.mxu1 %v10351_v2  ;;  %v4487_v53 = vld [vmem:[%s9319_s5 + $0xf0] sm:$0xff]  ;;  %v4488_v2 = vld [vmem:[%s9319_s5 + $0xf8] sm:$0xff] }
 0x98a   :  { %6768 = vmatpush1.bf16.msra.mxu0 %v10352_v3  ;;  %6832 = vmatpush1.bf16.msra.mxu1 %v10353_v27  ;;  %v6871_v3 = vpack.c.bf16 %v4470_v51, %v4469_v41  ;;  %v6873_v27 = vpack.c.bf16 %v4488_v2, %v4487_v53 }
 0x98b   :  { %6770 = vmatprep.subr.bf16.mxu0 %v10354_v42  ;;  %6834 = vmatprep.subr.bf16.mxu1 %v10355_v33  ;;  %v4471_v42 = vld [vmem:[%s9319_s5 + $0x70] sm:$0xff]  ;;  %v4472_v33 = vld [vmem:[%s9319_s5 + $0x78] sm:$0xff] }
 0x98e   :  { %6772 = vmatpush1.bf16.msra.mxu0 %v10356_v38  ;;  %6836 = vmatpush1.bf16.msra.mxu1 %v10357_v35  ;;  %v6875_v38 = vpack.c.bf16 %v4472_v33, %v4471_v42  ;;  %v4697_v42 = vld [vmem:[%s9320_s6] ss:$0 sm:$0xff] }
 0x98f   :  { %6774 = vmatprep.subr.bf16.mxu0 %v10358_v26  ;;  %6838 = vmatprep.subr.bf16.mxu1 %v10359_v60  ;;  %v10366_v60 = vld [vmem:[#allocation139_spill] sm:$0xff] }
 0x992   :  { %6776 = vmatpush1.bf16.msra.mxu0 %v10360_v20  ;;  %6840 = vmatpush1.bf16.msra.mxu1 %v10361_v5 }
 0x993   :  { %6778 = vmatprep.subr.bf16.mxu0 %v10362_v43  ;;  %6842 = vmatprep.subr.bf16.mxu1 %v10363_v10  ;;  %v10367_v10 = vld [vmem:[#allocation140_spill] sm:$0xff] }
 0x996   :  { %6780 = vmatpush1.bf16.msra.mxu0 %v10364_v29  ;;  %6844 = vmatpush1.bf16.msra.mxu1 %v10365_v15  ;;  %v10368_v15 = vld [vmem:[#allocation148_spill] sm:$0xff] }
 0x997   :  { %6846 = vmatprep.subr.bf16.mxu0 %v6845_v22 }
 0x999   :  { %4316 = vmatmul.mubr.f32.vlgmr.msra.gmra.mrb[22].mxu0 %v9132_v40  ;;  %4387 = vmatmul.mubr.f32.vlgmr.msra.gmra.mrb[38].mxu1 %v9132_v40  ;;  %v4467_v40 = vld [vmem:[%s9319_s5 + $0x50] sm:$0xff] }
 0x99a   :  { %6848 = vmatpush3.bf16.msra.mxu0 %v6847_v1  ;;  %v6867_v44 = vpack.c.bf16 %v4468_v11, %v4467_v40 }
 0x99b   :  { %6850 = vmatprep.subr.bf16.mxu0 %v6849_v17 }
 0x99e   :  { %6852 = vmatpush3.bf16.msra.mxu0 %v6851_v61 }
 0x99f   :  { %6854 = vmatprep.subr.bf16.mxu0 %v6853_v52 }
 0x9a2   :  { %6856 = vmatpush3.bf16.msra.mxu0 %v6855_v45 }
 0x9a3   :  { %6858 = vmatprep.subr.bf16.mxu0 %v6857_v6  ;;  %v10370_v6 = vld [vmem:[#allocation151_spill] sm:$0xff] }
 0x9a6   :  { %6860 = vmatpush3.bf16.msra.mxu0 %v6859_v56 }
 0x9a7   :  { %6862 = vmatprep.subr.bf16.mxu0 %v6861_v39 }
 0x9aa   :  { %6864 = vmatpush3.bf16.msra.mxu0 %v6863_v50 }
 0x9ab   :  { %6866 = vmatprep.subr.bf16.mxu0 %v6865_v62 }
 0x9ae   :  { %6868 = vmatpush3.bf16.msra.mxu0 %v6867_v44 }
 0x9af   :  { %6870 = vmatprep.subr.bf16.mxu0 %v6869_v49 }
 0x9b2   :  { %6872 = vmatpush3.bf16.msra.mxu0 %v6871_v3 }
 0x9b3   :  { %6874 = vmatprep.subr.bf16.mxu0 %v6873_v27 }
 0x9b6   :  { %6876 = vmatpush3.bf16.msra.mxu0 %v6875_v38 }
 0xa2c   :  { %v4175_v35 = vpop.f32.mrb[24].mxu0  ;;  %v4246_v26 = vpop.f32.mrb[22].mxu1 }
 0xa2d   :  { %v6887_v20 = vadd.f32 %v4175_v35, %v10366_v60  ;;  %v4177_v5 = vpop.f32.mrb[25].mxu0  ;;  %v4248_v43 = vpop.f32.mrb[23].mxu1  ;;  %v4403_v30 = vadd.f32 %v4246_v26, %v10368_v15 }
 0xa2e   :  { %v6888_v29 = vadd.f32 %v4177_v5, %v10367_v10  ;;  %v4404_v48 = vadd.f32 %v4248_v43, %v9874_v34 }
 0xa2f   :  { %v4401_v22 = vadd.f32 %v6887_v20, %v10152_v4  ;;  %v4693_v8 = vmul.f32 -1.442695, %v4403_v30 }
 0xa30   :  { %v4402_v25 = vadd.f32 %v6888_v29, %v9873_v18  ;;  %v4694_v1 = vmul.f32 -1.442695, %v4404_v48 }
 0xa31   :  { %v4691_v24 = vmul.f32 -1.442695, %v4401_v22  ;;  %7238 = vpow2.f32 %v4693_v8 }
 0xa32   :  { %v4692_v31 = vmul.f32 -1.442695, %v4402_v25  ;;  %7240 = vpow2.f32 %v4694_v1 }
 0xa33   :  { %7242 = vpow2.f32 %v4691_v24 }
 0xa34   :  { %7244 = vpow2.f32 %v4692_v31 }
 0xa3b   :  { %v7239_v17 = vpop.eup %7238 }
 0xa3c   :  { %v7241_v28 = vpop.eup %7240  ;;  %v4427_v7 = vadd.f32 1.0, %v7239_v17 }
 0xa3d   :  { %v7243_v59 = vpop.eup %7242  ;;  %v4428_v12 = vadd.f32 1.0, %v7241_v28 }
 0xa3e   :  { %v7245_v61 = vpop.eup %7244  ;;  %v4415_v52 = vadd.f32 1.0, %v7243_v59  ;;  %7246 = vrcp.f32 %v4427_v7 }
 0xa3f   :  { %v4416_v34 = vadd.f32 1.0, %v7245_v61  ;;  %7248 = vrcp.f32 %v4428_v12 }
 0xa40   :  { %7250 = vrcp.f32 %v4415_v52 }
 0xa41   :  { %7252 = vrcp.f32 %v4416_v34 }
 0xa48   :  { %v7247_v16 = vpop.eup %7246 }
 0xa49   :  { %v7249_v39 = vpop.eup %7248  ;;  %v4447_v37 = vmul.f32 %v7247_v16, %v9126_v54 }
 0xa4a   :  { %v7251_v32 = vpop.eup %7250  ;;  %v4448_v40 = vmul.f32 %v7249_v39, %v9128_v9 }
 0xa4b   :  { %v7253_v46 = vpop.eup %7252 }
 0xa6c   :  { %v4317_v4 = vpop.f32.mrb[22].mxu0  ;;  %v4388_v18 = vpop.f32.mrb[38].mxu1 }
 0xa6d   :  { %v4405_v0 = vadd.f32 %v4317_v4, %v9875_v58  ;;  %v4407_v45 = vadd.f32 %v4388_v18, %v10369_v23  ;;  %v4319_v13 = vpop.f32.mrb[23].mxu0  ;;  %v4390_v63 = vpop.f32.mrb[39].mxu1 }
 0xa6e   :  { %v4406_v21 = vadd.f32 %v4319_v13, %v10370_v6  ;;  %v4408_v19 = vadd.f32 %v4390_v63, %v8220_v36 }
 0xa6f   :  { %7254 = vtanh.f32 %v4405_v0  ;;  %v4695_v56 = vmul.f32 -1.442695, %v4407_v45 }
 0xa70   :  { %7256 = vtanh.f32 %v4406_v21  ;;  %v4696_v47 = vmul.f32 -1.442695, %v4408_v19 }
 0xa71   :  { %7258 = vpow2.f32 %v4695_v56 }
 0xa72   :  { %7260 = vpow2.f32 %v4696_v47 }
 0xa79   :  { %v7255_v58 = vpop.eup %7254 }
 0xa7a   :  { %v7257_v50 = vpop.eup %7256  ;;  %v4449_v55 = vmul.f32 %v7255_v58, %v7251_v32 }
 0xa7b   :  { %v7259_v62 = vpop.eup %7258  ;;  %v4450_v11 = vmul.f32 %v7257_v50, %v7253_v46 }
 0xa7c   :  { %v7261_v36 = vpop.eup %7260  ;;  %v4451_v57 = vadd.f32 %v4449_v55, %v4447_v37  ;;  %v4441_v44 = vadd.f32 1.0, %v7259_v62 }
 0xa7d   :  { %v4452_v14 = vadd.f32 %v4450_v11, %v4448_v40  ;;  %v4442_v41 = vadd.f32 1.0, %v7261_v36 }
 0xa7e   :  { %7262 = vtanh.f32 %v4451_v57 }
 0xa7f   :  { %7264 = vrcp.f32 %v4441_v44 }
 0xa80   :  { %7266 = vtanh.f32 %v4452_v14 }
 0xa81   :  { %7268 = vrcp.f32 %v4442_v41 }
 0xa88   :  { %v7263_v51 = vpop.eup %7262 }
 0xa89   :  { %v7265_v49 = vpop.eup %7264 }
 0xa8a   :  { %v7267_v53 = vpop.eup %7266  ;;  %v4455_v2 = vmul.f32 %v7265_v49, %v7263_v51 }
 0xa8b   :  { %v7269_v3 = vpop.eup %7268 }
 0xa8c   :  { %v4456_v54 = vmul.f32 %v7269_v3, %v7267_v53 }
 0xa8e   :  { %4560 = vmatprep.mubr.f32.mxu0 %v4456_v54 }
 0xa8f   :  { %4561 = vmatmul.mubr.f32.vlgmr.msra.gmra.mrb[32].mxu0 %v4455_v2 }
 0xb62   :  { %v4730_v27 = vpop.f32.mrb[32].mxu0 }
 0xb63   :  { %v4731_v9 = vpop.f32.mrb[33].mxu0 }
 0xb64   :  { %v4732_v33 = vadd.f32 %v4731_v9, %v4730_v27 }
 0xb66   :  { %v4563_v38 = vadd.f32 %v4732_v33, %v4697_v42 }
 0xb68   :  { %v4567_v35 = vsel %vm4566_vm1, %v4563_v38, -inf }
 0xb69   :  { %4568 = vmax.xlane.f32.xlu0 %v4567_v35 }
 0xbf6   :  { %v4569_v26 = vpop.xlane.xlu0 %4568 }
 0xbf7   :  { %v4570_v60 = vsub.f32 %v4563_v38, %v4569_v26 }
 0xbf9   :  { %v4571_v20 = vmul.f32 1.442695, %v4570_v60 }
 0xbfb   :  { %7270 = vpow2.f32 %v4571_v20 }
 0xc05   :  { %v7271_v5 = vpop.eup %7270 }
 0xc06   :  { %v4573_v43 = vsel %vm4566_vm1, %v7271_v5, 0.0 }
 0xc07   :  { %4574 = vadd.xlane.f32.xlu0 %v4573_v43 }
 0xc94   :  { %v4575_v10 = vpop.xlane.xlu0 %4574 }
 0xc95   :  { %7272 = vrcp.f32 %v4575_v10 }
 0xc9f   :  { %v7273_v29 = vpop.eup %7272 }
 0xca0   :  { %v4577_v15 = vmul.f32 %v7273_v29, %v7271_v5 }
 0xca2   :  { %4578 = vst.msk [vmem:[%s9321_s7] sm:$0xff] %vm4566_vm1, %v4577_v15 }
 0xca3   :  { %4583 = vsyncpa [#allocation5], 1 }
 0xca4   :  { %4584 = vsyncpa [#allocation7], 1 }

</bundles_post_ra>
